<compile_context>
chip_gen: v5e
topology: v5e:2x2
jax: 0.10.0
libtpu: 0.0.40
codegen_flags: <defaults>
</compile_context>

<pallas_src>
import functools

import jax
import jax.numpy as jnp
from jax.experimental import pallas as pl
from jax.experimental.pallas import tpu as pltpu

# -------------------- synthetic (TSSL-BP-shaped) configuration --------------------
NETWORK_CONFIG = dict(model="LIF", rule="TSSLBP", n_steps=8, tau_m=5.0, tau_s=3.0)
LAYERS_CONFIG = {
    "conv1": dict(type="conv", in_channels=4, out_channels=8,
                  kernel_size=3, padding=1, stride=1, threshold=1.0),
    "pool1": dict(type="pooling", kernel_size=2),
    "fc1":   dict(type="linear", out_features=10, threshold=1.0),
}
# (no dropout layer in this config; with is_train=False dropout is a no-op anyway)

O_PAD = 16  # fc output columns padded 10 -> 16 so C_out * O_PAD == 128 lanes


# -------------------- fused Pallas kernel --------------------
def _snn_fused_kernel(x_ref, wc_ref, bc_ref, wcat_ref, mask_ref, lmat_ref,
                      rmat_ref, bfc_ref, out_ref, cur_ref, syn_ref, *,
                      n_steps, s_conv, c_out, nb, o_pad,
                      theta_m, theta_s, thr_conv, thr_fc):
    """Whole network for NB samples (grid axis 0 == sample group, 'parallel').

    x_ref    : (K, NB*T*S) bf16   im2col spike patches, columns ordered (t, n, s)
    wc_ref   : (C, K)      f32    conv weight (transposed orientation)
    bc_ref   : (C, 1)      f32    conv bias
    wcat_ref : (S, C*OP)   f32    avg-pool + fc weight folded, cols ordered (c, o)
    mask_ref : (T*C, C*OP) f32    host-built c==c' selection mask
    lmat_ref : (T, T*C)    f32    host-built within-t row-sum matrix
    rmat_ref : (C*OP, OP)  f32    host-built column-block-sum matrix
    bfc_ref  : (1, OP)     f32    fc bias (zero padded)
    out_ref  : (NB*T, OP)  f32    fc-layer PSP output, rows ordered (n, t)
    cur_ref  : (C, NB*T*S) f32    VMEM scratch: conv currents for all samples/steps
    syn_ref  : (T*C, NB*S) f32    VMEM scratch: conv-layer syn output per t
    """
    T, S, C, NB, OP = n_steps, s_conv, c_out, nb, o_pad
    L = NB * S  # lanes per time step

    # ---- hoisted conv matmul for ALL samples & time steps: one MXU op ----
    x = x_ref[...].astype(jnp.float32)                                # bf16 -> f32 (exact)
    cur_ref[...] = jnp.dot(wc_ref[...], x,
                           preferred_element_type=jnp.float32)        # (C, NB*T*S)

    # ---- conv layer: input-PSP filter (on currents, exact by linearity) + LIF ----
    b_conv = jnp.broadcast_to(bc_ref[...], (C, L))                    # hoisted broadcast
    syn_in = jnp.zeros((C, L), jnp.float32)
    mem = jnp.zeros((C, L), jnp.float32)
    syn_o = jnp.zeros((C, L), jnp.float32)
    for t in range(T):                                                # T=8, unrolled, VPU only
        cur_t = cur_ref[:, pl.ds(t * L, L)]                           # (C, NB*S) lane slice
        syn_in = syn_in * (1.0 - theta_s) + cur_t                     # f.psp on conv currents
        i_t = syn_in * theta_s + b_conv
        mem = mem * (1.0 - theta_m) + i_t
        spike = (mem > thr_conv).astype(jnp.float32)
        mem = mem * (1.0 - spike)
        syn_o = syn_o + (spike - syn_o) * theta_s
        syn_ref[pl.ds(t * C, C), :] = syn_o                           # rows (t, c), cols (n, s)

    # ---- fused avg-pool + fc + LIF per sample (all selector matrices host-built) ----
    wcat = wcat_ref[...]                                              # (S, C*OP)
    mask = mask_ref[...]                                              # (T*C, C*OP)
    lmat = lmat_ref[...]                                              # (T, T*C)
    rmat = rmat_ref[...]                                              # (C*OP, OP)
    b_fc = bfc_ref[...]                                               # (1, OP)
    for n in range(NB):                                               # NB small, unrolled
        syn_n = syn_ref[:, pl.ds(n * S, S)]                           # (T*C, S)
        p_all = jnp.dot(syn_n, wcat, preferred_element_type=jnp.float32)   # (T*C, C*OP)
        p_sel = p_all * mask                                          # keep c == c' terms
        z = jnp.dot(lmat, p_sel, preferred_element_type=jnp.float32)  # (T, C*OP)
        fc_cur = jnp.dot(z, rmat, preferred_element_type=jnp.float32) + b_fc  # (T, OP)

        mem_fc = jnp.zeros((1, OP), jnp.float32)
        syn_fc = jnp.zeros((1, OP), jnp.float32)
        for t in range(T):                                            # tiny VPU recurrence
            i_t = fc_cur[t:t + 1, :]
            mem_fc = mem_fc * (1.0 - theta_m) + i_t
            spike = (mem_fc > thr_fc).astype(jnp.float32)
            mem_fc = mem_fc * (1.0 - spike)
            syn_fc = syn_fc + (spike - syn_fc) * theta_s
            out_ref[pl.ds(n * T + t, 1), :] = syn_fc


def snn_forward_fused(patches, w_conv, b_conv, wcat, mask, lmat, rmat, b_fc, *,
                      n_steps, s_conv, nb, o_pad, theta_m, theta_s, thr_conv, thr_fc):
    """patches: (G, K, NB*T*S) bf16; returns (G, NB*T, OP) f32 fc-layer PSP output."""
    G, K, _ = patches.shape
    C = w_conv.shape[0]
    T, S, NB, OP = n_steps, s_conv, nb, o_pad

    kernel = functools.partial(
        _snn_fused_kernel, n_steps=T, s_conv=S, c_out=C, nb=NB, o_pad=OP,
        theta_m=theta_m, theta_s=theta_s, thr_conv=thr_conv, thr_fc=thr_fc)

    flops = 2 * G * (C * K * NB * T * S
                     + NB * (T * C * S * C * OP + T * T * C * C * OP + T * C * OP * OP))
    bytes_accessed = (G * (K * NB * T * S * patches.dtype.itemsize + NB * T * OP * 4)
                      + 4 * (w_conv.size + b_conv.size + wcat.size + mask.size
                             + lmat.size + rmat.size + b_fc.size))

    return pl.pallas_call(
        kernel,
        out_shape=jax.ShapeDtypeStruct((G, NB * T, OP), jnp.float32),
        grid_spec=pltpu.PrefetchScalarGridSpec(
            num_scalar_prefetch=0,
            grid=(G,),
            in_specs=[
                pl.BlockSpec((None, K, NB * T * S), lambda g: (g, 0, 0)),
                pl.BlockSpec((C, K), lambda g: (0, 0)),
                pl.BlockSpec((C, 1), lambda g: (0, 0)),
                pl.BlockSpec((S, C * OP), lambda g: (0, 0)),
                pl.BlockSpec((T * C, C * OP), lambda g: (0, 0)),
                pl.BlockSpec((T, T * C), lambda g: (0, 0)),
                pl.BlockSpec((C * OP, OP), lambda g: (0, 0)),
                pl.BlockSpec((1, OP), lambda g: (0, 0)),
            ],
            out_specs=pl.BlockSpec((None, NB * T, OP), lambda g: (g, 0, 0)),
            scratch_shapes=[
                pltpu.VMEM((C, NB * T * S), jnp.float32),
                pltpu.VMEM((T * C, NB * S), jnp.float32),
            ],
        ),
        compiler_params=pltpu.CompilerParams(
            dimension_semantics=("parallel",),
            vmem_limit_bytes=32 * 1024 * 1024,
        ),
        cost_estimate=pl.CostEstimate(
            flops=int(flops), transcendentals=0, bytes_accessed=int(bytes_accessed)),
    )(patches, w_conv, b_conv, wcat, mask, lmat, rmat, b_fc)


# -------------------- JAX glue (layout / parameter prep only) --------------------
def im2col(x, kh, kw, pad):
    """x: (B, C, H, W) -> (B, C*kh*kw, OH*OW) with (C, kh, kw) flatten order (PyTorch)."""
    xp = jnp.pad(x, ((0, 0), (0, 0), (pad, pad), (pad, pad)))
    B, C, Hp, Wp = xp.shape
    OH, OW = Hp - kh + 1, Wp - kw + 1
    cols = [xp[:, :, i:i + OH, j:j + OW] for i in range(kh) for j in range(kw)]
    patches = jnp.stack(cols, axis=2)                      # (B, C, kh*kw, OH, OW)
    patches = patches.reshape(B, C * kh * kw, OH * OW)     # (B, K, S)
    return patches, OH, OW


def _pick_block_batch(n):
    """Samples per grid step (NB): keep per-t LIF state ~ (8, NB*256) small."""
    if n >= 8:
        return 4
    if n >= 4:
        return 2
    return 1


def init_params(key, input_shape):
    """Deterministic synthetic parameter init (shapes follow the layer configs)."""
    C_in, H, W = input_shape
    ccfg = LAYERS_CONFIG["conv1"]
    lcfg = LAYERS_CONFIG["fc1"]
    kh = ccfg["kernel_size"]
    Cout = ccfg["out_channels"]
    PH = H // LAYERS_CONFIG["pool1"]["kernel_size"]
    PW = W // LAYERS_CONFIG["pool1"]["kernel_size"]
    fc_in = Cout * PH * PW

    kc, kcb, kl, klb = jax.random.split(key, 4)
    fan_c = float(C_in * kh * kh)
    fan_l = float(fc_in)
    params = {
        "conv1_w": jax.random.uniform(kc, (Cout, C_in, kh, kh), jnp.float32, -1.0, 1.0)
                   / jnp.sqrt(fan_c),
        "conv1_b": jax.random.uniform(kcb, (Cout,), jnp.float32, -1.0, 1.0) / jnp.sqrt(fan_c),
        "fc1_w": jax.random.uniform(kl, (lcfg["out_features"], fc_in), jnp.float32, -1.0, 1.0)
                 / jnp.sqrt(fan_l),
        "fc1_b": jax.random.uniform(klb, (lcfg["out_features"],), jnp.float32, -1.0, 1.0)
                 / jnp.sqrt(fan_l),
    }
    return params


def network_forward(spike_input, params):
    """spike_input: (N, C, H, W, T) float32 spike trains -> (N, out_features, T)."""
    N, C, H, W, T = spike_input.shape
    cfg = NETWORK_CONFIG
    assert cfg["model"] == "LIF" and cfg["rule"] == "TSSLBP"
    theta_m = 1.0 / cfg["tau_m"]
    theta_s = 1.0 / cfg["tau_s"]

    ccfg = LAYERS_CONFIG["conv1"]
    pcfg = LAYERS_CONFIG["pool1"]
    lcfg = LAYERS_CONFIG["fc1"]
    kh = kw = ccfg["kernel_size"]
    pad = ccfg["padding"]
    Cout = ccfg["out_channels"]
    k = pcfg["kernel_size"]
    O = lcfg["out_features"]
    OP = O_PAD

    NB = _pick_block_batch(N)
    G = pl.cdiv(N, NB)
    N_pad = G * NB
    spike_pad = jnp.pad(spike_input, ((0, N_pad - N), (0, 0), (0, 0), (0, 0), (0, 0)))

    # im2col on the RAW spike trains.  f.psp is an elementwise linear time filter,
    # so psp(conv(x)) == conv(psp(x)); the kernel applies the filter to the conv
    # currents instead (bias is added after the filter, as in the reference).
    x_tn = jnp.transpose(spike_pad, (4, 0, 1, 2, 3)).reshape(T * N_pad, C, H, W)
    patches, OH, OW = im2col(x_tn, kh, kw, pad)                     # (T*N_pad, K, S)
    K = C * kh * kw
    S = OH * OW
    # Per-grid-block column order (t, n_local, s); bf16 is exact for 0/1 spikes.
    patches = (patches.reshape(T, G, NB, K, S)
               .transpose(1, 3, 0, 2, 4)
               .reshape(G, K, T * NB * S)
               .astype(jnp.bfloat16))

    w_conv = params["conv1_w"].reshape(Cout, K)                     # (Cout, K)
    b_conv = params["conv1_b"].reshape(Cout, 1)

    # Fold the (linear) 2x2 average pool and the PyTorch (C, PH, PW) flatten into the
    # fc weight, padded to OP output columns (zero weight/bias -> padded lanes never
    # spike):  wcat[s, c*OP + o] = 0.25 * W_fc[o, c*PH*PW + (oh//2)*PW + (ow//2)].
    PH, PW = OH // k, OW // k
    w_fc = params["fc1_w"].reshape(O, Cout, PH, PW)
    w_up = jnp.repeat(jnp.repeat(w_fc, k, axis=2), k, axis=3) / float(k * k)
    w_up = jnp.pad(w_up.reshape(O, Cout, S), ((0, OP - O), (0, 0), (0, 0)))  # (OP,Cout,S)
    wcat = jnp.transpose(w_up, (2, 1, 0)).reshape(S, Cout * OP)
    b_fc = jnp.pad(params["fc1_b"], (0, OP - O)).reshape(1, OP)

    # Host-built constant selector matrices (previously rebuilt in-kernel every step).
    idx_row = jnp.arange(T * Cout)
    idx_col = jnp.arange(Cout * OP)
    mask = ((idx_row[:, None] % Cout) == (idx_col[None, :] // OP)).astype(jnp.float32)
    lmat = (jnp.arange(T)[:, None] == (idx_row[None, :] // Cout)).astype(jnp.float32)
    rmat = ((idx_col[:, None] % OP) == jnp.arange(OP)[None, :]).astype(jnp.float32)

    out = snn_forward_fused(
        patches, w_conv, b_conv, wcat, mask, lmat, rmat, b_fc,
        n_steps=T, s_conv=S, nb=NB, o_pad=OP, theta_m=theta_m, theta_s=theta_s,
        thr_conv=ccfg["threshold"], thr_fc=lcfg["threshold"])       # (G, NB*T, OP)

    out = out.reshape(G * NB, T, OP)[:N, :, :O]                     # (N, T, O)
    return jnp.transpose(out, (0, 2, 1))                            # (N, O, T)


if __name__ == "__main__":
    key = jax.random.PRNGKey(0)
    kp, kx = jax.random.split(key)

    N, C, H, W = 8, 4, 16, 16
    T = NETWORK_CONFIG["n_steps"]

    params = init_params(kp, input_shape=(C, H, W))
    spike_input = jax.random.bernoulli(kx, 0.3, (N, C, H, W, T)).astype(jnp.float32)

    out = jax.jit(network_forward)(spike_input, params)
    jax.block_until_ready(out)

    assert out.shape == (N, LAYERS_CONFIG["fc1"]["out_features"], T), out.shape
    assert out.dtype == jnp.float32
    print("KERNEL_OK")
</pallas_src>

<mosaic_0001>
module attributes {stable_mosaic.version = 11 : i64} {
  func.func @_snn_fused_kernel(%arg0: i32, %arg1: memref<1x36x8192xbf16, #tpu.memory_space<vmem>>, %arg2: memref<8x36xf32, #tpu.memory_space<vmem>>, %arg3: memref<8x1xf32, #tpu.memory_space<vmem>>, %arg4: memref<256x128xf32, #tpu.memory_space<vmem>>, %arg5: memref<64x128xf32, #tpu.memory_space<vmem>>, %arg6: memref<8x64xf32, #tpu.memory_space<vmem>>, %arg7: memref<128x16xf32, #tpu.memory_space<vmem>>, %arg8: memref<1x16xf32, #tpu.memory_space<vmem>>, %arg9: memref<1x32x16xf32, #tpu.memory_space<vmem>>, %arg10: memref<8x8192xf32, #tpu.memory_space<vmem>>, %arg11: memref<64x1024xf32, #tpu.memory_space<vmem>>) attributes {dimension_semantics = [#tpu.dimension_semantics<parallel>], iteration_bounds = array<i64: 2>, scalar_prefetch = 0 : i64, scratch_operands = 2 : i64, tpu.core_type = #tpu.core_type<tc>, window_params = [{transform_indices = @transform_0, window_bounds = array<i64: 1, 36, 8192>}, {pipeline_mode = #tpu.pipeline_mode<synchronous>, transform_indices = @transform_1, window_bounds = array<i64: 8, 36>}, {pipeline_mode = #tpu.pipeline_mode<synchronous>, transform_indices = @transform_2, window_bounds = array<i64: 8, 1>}, {pipeline_mode = #tpu.pipeline_mode<synchronous>, transform_indices = @transform_3, window_bounds = array<i64: 256, 128>}, {pipeline_mode = #tpu.pipeline_mode<synchronous>, transform_indices = @transform_4, window_bounds = array<i64: 64, 128>}, {pipeline_mode = #tpu.pipeline_mode<synchronous>, transform_indices = @transform_5, window_bounds = array<i64: 8, 64>}, {pipeline_mode = #tpu.pipeline_mode<synchronous>, transform_indices = @transform_6, window_bounds = array<i64: 128, 16>}, {pipeline_mode = #tpu.pipeline_mode<synchronous>, transform_indices = @transform_7, window_bounds = array<i64: 1, 16>}, {transform_indices = @transform_8, window_bounds = array<i64: 1, 32, 16>}]} {
    %c0 = arith.constant 0 : index
    %c0_0 = arith.constant 0 : index
    %c0_1 = arith.constant 0 : index
    %0 = vector.load %arg1[%c0, %c0_0, %c0_1] : memref<1x36x8192xbf16, #tpu.memory_space<vmem>>, vector<1x36x8192xbf16>
    %1 = vector.shape_cast %0 : vector<1x36x8192xbf16> to vector<36x8192xbf16>
    %2 = arith.extf %1 : vector<36x8192xbf16> to vector<36x8192xf32>
    %c0_2 = arith.constant 0 : index
    %c0_3 = arith.constant 0 : index
    %3 = vector.load %arg2[%c0_2, %c0_3] : memref<8x36xf32, #tpu.memory_space<vmem>>, vector<8x36xf32>
    %cst = arith.constant dense<0.000000e+00> : vector<8x8192xf32>
    %4 = tpu.matmul %3, %2, %cst {dimension_numbers = #tpu.dot_dimension_numbers<[1], [0], [0], [1], [0, 0, 1, 1], [], []>} : vector<8x36xf32>, vector<36x8192xf32>, vector<8x8192xf32> -> vector<8x8192xf32>
    %c0_4 = arith.constant 0 : index
    %c0_5 = arith.constant 0 : index
    %5 = vector.load %arg10[%c0_4, %c0_5] : memref<8x8192xf32, #tpu.memory_space<vmem>>, vector<8x8192xf32>
    tpu.vector_store %arg10[%c0_4, %c0_5], %4 {strides = array<i32>} : memref<8x8192xf32, #tpu.memory_space<vmem>>, vector<8x8192xf32>,
    %c0_6 = arith.constant 0 : index
    %c0_7 = arith.constant 0 : index
    %6 = vector.load %arg3[%c0_6, %c0_7] : memref<8x1xf32, #tpu.memory_space<vmem>>, vector<8x1xf32>
    %7 = vector.shape_cast %6 : vector<8x1xf32> to vector<8x1xf32>
    %8 = vector.broadcast %7 : vector<8x1xf32> to vector<8x1024xf32>
    %cst_8 = arith.constant 0.000000e+00 : f32
    %9 = vector.broadcast %cst_8 : f32 to vector<8x1024xf32>
    %cst_9 = arith.constant 0.000000e+00 : f32
    %10 = vector.broadcast %cst_9 : f32 to vector<8x1024xf32>
    %cst_10 = arith.constant 0.000000e+00 : f32
    %11 = vector.broadcast %cst_10 : f32 to vector<8x1024xf32>
    %c0_11 = arith.constant 0 : index
    %c0_12 = arith.constant 0 : index
    %12 = vector.load %arg10[%c0_11, %c0_12] : memref<8x8192xf32, #tpu.memory_space<vmem>>, vector<8x1024xf32>
    %cst_13 = arith.constant 0.666666686 : f32
    %13 = vector.broadcast %cst_13 : f32 to vector<8x1024xf32>
    %14 = arith.mulf %9, %13 : vector<8x1024xf32>
    %15 = arith.addf %14, %12 : vector<8x1024xf32>
    %cst_14 = arith.constant 0.333333343 : f32
    %16 = vector.broadcast %cst_14 : f32 to vector<8x1024xf32>
    %17 = arith.mulf %15, %16 : vector<8x1024xf32>
    %18 = arith.addf %17, %8 : vector<8x1024xf32>
    %cst_15 = arith.constant 8.000000e-01 : f32
    %19 = vector.broadcast %cst_15 : f32 to vector<8x1024xf32>
    %20 = arith.mulf %10, %19 : vector<8x1024xf32>
    %21 = arith.addf %20, %18 : vector<8x1024xf32>
    %cst_16 = arith.constant 1.000000e+00 : f32
    %22 = vector.broadcast %cst_16 : f32 to vector<8x1024xf32>
    %23 = arith.cmpf ogt, %21, %22 : vector<8x1024xf32>
    %24 = arith.extui %23 : vector<8x1024xi1> to vector<8x1024xi32>
    %25 = arith.sitofp %24 : vector<8x1024xi32> to vector<8x1024xf32>
    %cst_17 = arith.constant 1.000000e+00 : f32
    %26 = vector.broadcast %cst_17 : f32 to vector<8x1024xf32>
    %27 = arith.subf %26, %25 : vector<8x1024xf32>
    %28 = arith.mulf %21, %27 : vector<8x1024xf32>
    %29 = arith.subf %25, %11 : vector<8x1024xf32>
    %cst_18 = arith.constant 0.333333343 : f32
    %30 = vector.broadcast %cst_18 : f32 to vector<8x1024xf32>
    %31 = arith.mulf %29, %30 : vector<8x1024xf32>
    %32 = arith.addf %11, %31 : vector<8x1024xf32>
    %c0_19 = arith.constant 0 : index
    %c0_20 = arith.constant 0 : index
    %33 = vector.load %arg11[%c0_19, %c0_20] : memref<64x1024xf32, #tpu.memory_space<vmem>>, vector<8x1024xf32>
    tpu.vector_store %arg11[%c0_19, %c0_20], %32 {strides = array<i32>} : memref<64x1024xf32, #tpu.memory_space<vmem>>, vector<8x1024xf32>,
    %c0_21 = arith.constant 0 : index
    %c1024 = arith.constant 1024 : index
    %34 = vector.load %arg10[%c0_21, %c1024] : memref<8x8192xf32, #tpu.memory_space<vmem>>, vector<8x1024xf32>
    %cst_22 = arith.constant 0.666666686 : f32
    %35 = vector.broadcast %cst_22 : f32 to vector<8x1024xf32>
    %36 = arith.mulf %15, %35 : vector<8x1024xf32>
    %37 = arith.addf %36, %34 : vector<8x1024xf32>
    %cst_23 = arith.constant 0.333333343 : f32
    %38 = vector.broadcast %cst_23 : f32 to vector<8x1024xf32>
    %39 = arith.mulf %37, %38 : vector<8x1024xf32>
    %40 = arith.addf %39, %8 : vector<8x1024xf32>
    %cst_24 = arith.constant 8.000000e-01 : f32
    %41 = vector.broadcast %cst_24 : f32 to vector<8x1024xf32>
    %42 = arith.mulf %28, %41 : vector<8x1024xf32>
    %43 = arith.addf %42, %40 : vector<8x1024xf32>
    %cst_25 = arith.constant 1.000000e+00 : f32
    %44 = vector.broadcast %cst_25 : f32 to vector<8x1024xf32>
    %45 = arith.cmpf ogt, %43, %44 : vector<8x1024xf32>
    %46 = arith.extui %45 : vector<8x1024xi1> to vector<8x1024xi32>
    %47 = arith.sitofp %46 : vector<8x1024xi32> to vector<8x1024xf32>
    %cst_26 = arith.constant 1.000000e+00 : f32
    %48 = vector.broadcast %cst_26 : f32 to vector<8x1024xf32>
    %49 = arith.subf %48, %47 : vector<8x1024xf32>
    %50 = arith.mulf %43, %49 : vector<8x1024xf32>
    %51 = arith.subf %47, %32 : vector<8x1024xf32>
    %cst_27 = arith.constant 0.333333343 : f32
    %52 = vector.broadcast %cst_27 : f32 to vector<8x1024xf32>
    %53 = arith.mulf %51, %52 : vector<8x1024xf32>
    %54 = arith.addf %32, %53 : vector<8x1024xf32>
    %c8 = arith.constant 8 : index
    %c0_28 = arith.constant 0 : index
    %55 = vector.load %arg11[%c8, %c0_28] : memref<64x1024xf32, #tpu.memory_space<vmem>>, vector<8x1024xf32>
    tpu.vector_store %arg11[%c8, %c0_28], %54 {strides = array<i32>} : memref<64x1024xf32, #tpu.memory_space<vmem>>, vector<8x1024xf32>,
    %c0_29 = arith.constant 0 : index
    %c2048 = arith.constant 2048 : index
    %56 = vector.load %arg10[%c0_29, %c2048] : memref<8x8192xf32, #tpu.memory_space<vmem>>, vector<8x1024xf32>
    %cst_30 = arith.constant 0.666666686 : f32
    %57 = vector.broadcast %cst_30 : f32 to vector<8x1024xf32>
    %58 = arith.mulf %37, %57 : vector<8x1024xf32>
    %59 = arith.addf %58, %56 : vector<8x1024xf32>
    %cst_31 = arith.constant 0.333333343 : f32
    %60 = vector.broadcast %cst_31 : f32 to vector<8x1024xf32>
    %61 = arith.mulf %59, %60 : vector<8x1024xf32>
    %62 = arith.addf %61, %8 : vector<8x1024xf32>
    %cst_32 = arith.constant 8.000000e-01 : f32
    %63 = vector.broadcast %cst_32 : f32 to vector<8x1024xf32>
    %64 = arith.mulf %50, %63 : vector<8x1024xf32>
    %65 = arith.addf %64, %62 : vector<8x1024xf32>
    %cst_33 = arith.constant 1.000000e+00 : f32
    %66 = vector.broadcast %cst_33 : f32 to vector<8x1024xf32>
    %67 = arith.cmpf ogt, %65, %66 : vector<8x1024xf32>
    %68 = arith.extui %67 : vector<8x1024xi1> to vector<8x1024xi32>
    %69 = arith.sitofp %68 : vector<8x1024xi32> to vector<8x1024xf32>
    %cst_34 = arith.constant 1.000000e+00 : f32
    %70 = vector.broadcast %cst_34 : f32 to vector<8x1024xf32>
    %71 = arith.subf %70, %69 : vector<8x1024xf32>
    %72 = arith.mulf %65, %71 : vector<8x1024xf32>
    %73 = arith.subf %69, %54 : vector<8x1024xf32>
    %cst_35 = arith.constant 0.333333343 : f32
    %74 = vector.broadcast %cst_35 : f32 to vector<8x1024xf32>
    %75 = arith.mulf %73, %74 : vector<8x1024xf32>
    %76 = arith.addf %54, %75 : vector<8x1024xf32>
    %c16 = arith.constant 16 : index
    %c0_36 = arith.constant 0 : index
    %77 = vector.load %arg11[%c16, %c0_36] : memref<64x1024xf32, #tpu.memory_space<vmem>>, vector<8x1024xf32>
    tpu.vector_store %arg11[%c16, %c0_36], %76 {strides = array<i32>} : memref<64x1024xf32, #tpu.memory_space<vmem>>, vector<8x1024xf32>,
    %c0_37 = arith.constant 0 : index
    %c3072 = arith.constant 3072 : index
    %78 = vector.load %arg10[%c0_37, %c3072] : memref<8x8192xf32, #tpu.memory_space<vmem>>, vector<8x1024xf32>
    %cst_38 = arith.constant 0.666666686 : f32
    %79 = vector.broadcast %cst_38 : f32 to vector<8x1024xf32>
    %80 = arith.mulf %59, %79 : vector<8x1024xf32>
    %81 = arith.addf %80, %78 : vector<8x1024xf32>
    %cst_39 = arith.constant 0.333333343 : f32
    %82 = vector.broadcast %cst_39 : f32 to vector<8x1024xf32>
    %83 = arith.mulf %81, %82 : vector<8x1024xf32>
    %84 = arith.addf %83, %8 : vector<8x1024xf32>
    %cst_40 = arith.constant 8.000000e-01 : f32
    %85 = vector.broadcast %cst_40 : f32 to vector<8x1024xf32>
    %86 = arith.mulf %72, %85 : vector<8x1024xf32>
    %87 = arith.addf %86, %84 : vector<8x1024xf32>
    %cst_41 = arith.constant 1.000000e+00 : f32
    %88 = vector.broadcast %cst_41 : f32 to vector<8x1024xf32>
    %89 = arith.cmpf ogt, %87, %88 : vector<8x1024xf32>
    %90 = arith.extui %89 : vector<8x1024xi1> to vector<8x1024xi32>
    %91 = arith.sitofp %90 : vector<8x1024xi32> to vector<8x1024xf32>
    %cst_42 = arith.constant 1.000000e+00 : f32
    %92 = vector.broadcast %cst_42 : f32 to vector<8x1024xf32>
    %93 = arith.subf %92, %91 : vector<8x1024xf32>
    %94 = arith.mulf %87, %93 : vector<8x1024xf32>
    %95 = arith.subf %91, %76 : vector<8x1024xf32>
    %cst_43 = arith.constant 0.333333343 : f32
    %96 = vector.broadcast %cst_43 : f32 to vector<8x1024xf32>
    %97 = arith.mulf %95, %96 : vector<8x1024xf32>
    %98 = arith.addf %76, %97 : vector<8x1024xf32>
    %c24 = arith.constant 24 : index
    %c0_44 = arith.constant 0 : index
    %99 = vector.load %arg11[%c24, %c0_44] : memref<64x1024xf32, #tpu.memory_space<vmem>>, vector<8x1024xf32>
    tpu.vector_store %arg11[%c24, %c0_44], %98 {strides = array<i32>} : memref<64x1024xf32, #tpu.memory_space<vmem>>, vector<8x1024xf32>,
    %c0_45 = arith.constant 0 : index
    %c4096 = arith.constant 4096 : index
    %100 = vector.load %arg10[%c0_45, %c4096] : memref<8x8192xf32, #tpu.memory_space<vmem>>, vector<8x1024xf32>
    %cst_46 = arith.constant 0.666666686 : f32
    %101 = vector.broadcast %cst_46 : f32 to vector<8x1024xf32>
    %102 = arith.mulf %81, %101 : vector<8x1024xf32>
    %103 = arith.addf %102, %100 : vector<8x1024xf32>
    %cst_47 = arith.constant 0.333333343 : f32
    %104 = vector.broadcast %cst_47 : f32 to vector<8x1024xf32>
    %105 = arith.mulf %103, %104 : vector<8x1024xf32>
    %106 = arith.addf %105, %8 : vector<8x1024xf32>
    %cst_48 = arith.constant 8.000000e-01 : f32
    %107 = vector.broadcast %cst_48 : f32 to vector<8x1024xf32>
    %108 = arith.mulf %94, %107 : vector<8x1024xf32>
    %109 = arith.addf %108, %106 : vector<8x1024xf32>
    %cst_49 = arith.constant 1.000000e+00 : f32
    %110 = vector.broadcast %cst_49 : f32 to vector<8x1024xf32>
    %111 = arith.cmpf ogt, %109, %110 : vector<8x1024xf32>
    %112 = arith.extui %111 : vector<8x1024xi1> to vector<8x1024xi32>
    %113 = arith.sitofp %112 : vector<8x1024xi32> to vector<8x1024xf32>
    %cst_50 = arith.constant 1.000000e+00 : f32
    %114 = vector.broadcast %cst_50 : f32 to vector<8x1024xf32>
    %115 = arith.subf %114, %113 : vector<8x1024xf32>
    %116 = arith.mulf %109, %115 : vector<8x1024xf32>
    %117 = arith.subf %113, %98 : vector<8x1024xf32>
    %cst_51 = arith.constant 0.333333343 : f32
    %118 = vector.broadcast %cst_51 : f32 to vector<8x1024xf32>
    %119 = arith.mulf %117, %118 : vector<8x1024xf32>
    %120 = arith.addf %98, %119 : vector<8x1024xf32>
    %c32 = arith.constant 32 : index
    %c0_52 = arith.constant 0 : index
    %121 = vector.load %arg11[%c32, %c0_52] : memref<64x1024xf32, #tpu.memory_space<vmem>>, vector<8x1024xf32>
    tpu.vector_store %arg11[%c32, %c0_52], %120 {strides = array<i32>} : memref<64x1024xf32, #tpu.memory_space<vmem>>, vector<8x1024xf32>,
    %c0_53 = arith.constant 0 : index
    %c5120 = arith.constant 5120 : index
    %122 = vector.load %arg10[%c0_53, %c5120] : memref<8x8192xf32, #tpu.memory_space<vmem>>, vector<8x1024xf32>
    %cst_54 = arith.constant 0.666666686 : f32
    %123 = vector.broadcast %cst_54 : f32 to vector<8x1024xf32>
    %124 = arith.mulf %103, %123 : vector<8x1024xf32>
    %125 = arith.addf %124, %122 : vector<8x1024xf32>
    %cst_55 = arith.constant 0.333333343 : f32
    %126 = vector.broadcast %cst_55 : f32 to vector<8x1024xf32>
    %127 = arith.mulf %125, %126 : vector<8x1024xf32>
    %128 = arith.addf %127, %8 : vector<8x1024xf32>
    %cst_56 = arith.constant 8.000000e-01 : f32
    %129 = vector.broadcast %cst_56 : f32 to vector<8x1024xf32>
    %130 = arith.mulf %116, %129 : vector<8x1024xf32>
    %131 = arith.addf %130, %128 : vector<8x1024xf32>
    %cst_57 = arith.constant 1.000000e+00 : f32
    %132 = vector.broadcast %cst_57 : f32 to vector<8x1024xf32>
    %133 = arith.cmpf ogt, %131, %132 : vector<8x1024xf32>
    %134 = arith.extui %133 : vector<8x1024xi1> to vector<8x1024xi32>
    %135 = arith.sitofp %134 : vector<8x1024xi32> to vector<8x1024xf32>
    %cst_58 = arith.constant 1.000000e+00 : f32
    %136 = vector.broadcast %cst_58 : f32 to vector<8x1024xf32>
    %137 = arith.subf %136, %135 : vector<8x1024xf32>
    %138 = arith.mulf %131, %137 : vector<8x1024xf32>
    %139 = arith.subf %135, %120 : vector<8x1024xf32>
    %cst_59 = arith.constant 0.333333343 : f32
    %140 = vector.broadcast %cst_59 : f32 to vector<8x1024xf32>
    %141 = arith.mulf %139, %140 : vector<8x1024xf32>
    %142 = arith.addf %120, %141 : vector<8x1024xf32>
    %c40 = arith.constant 40 : index
    %c0_60 = arith.constant 0 : index
    %143 = vector.load %arg11[%c40, %c0_60] : memref<64x1024xf32, #tpu.memory_space<vmem>>, vector<8x1024xf32>
    tpu.vector_store %arg11[%c40, %c0_60], %142 {strides = array<i32>} : memref<64x1024xf32, #tpu.memory_space<vmem>>, vector<8x1024xf32>,
    %c0_61 = arith.constant 0 : index
    %c6144 = arith.constant 6144 : index
    %144 = vector.load %arg10[%c0_61, %c6144] : memref<8x8192xf32, #tpu.memory_space<vmem>>, vector<8x1024xf32>
    %cst_62 = arith.constant 0.666666686 : f32
    %145 = vector.broadcast %cst_62 : f32 to vector<8x1024xf32>
    %146 = arith.mulf %125, %145 : vector<8x1024xf32>
    %147 = arith.addf %146, %144 : vector<8x1024xf32>
    %cst_63 = arith.constant 0.333333343 : f32
    %148 = vector.broadcast %cst_63 : f32 to vector<8x1024xf32>
    %149 = arith.mulf %147, %148 : vector<8x1024xf32>
    %150 = arith.addf %149, %8 : vector<8x1024xf32>
    %cst_64 = arith.constant 8.000000e-01 : f32
    %151 = vector.broadcast %cst_64 : f32 to vector<8x1024xf32>
    %152 = arith.mulf %138, %151 : vector<8x1024xf32>
    %153 = arith.addf %152, %150 : vector<8x1024xf32>
    %cst_65 = arith.constant 1.000000e+00 : f32
    %154 = vector.broadcast %cst_65 : f32 to vector<8x1024xf32>
    %155 = arith.cmpf ogt, %153, %154 : vector<8x1024xf32>
    %156 = arith.extui %155 : vector<8x1024xi1> to vector<8x1024xi32>
    %157 = arith.sitofp %156 : vector<8x1024xi32> to vector<8x1024xf32>
    %cst_66 = arith.constant 1.000000e+00 : f32
    %158 = vector.broadcast %cst_66 : f32 to vector<8x1024xf32>
    %159 = arith.subf %158, %157 : vector<8x1024xf32>
    %160 = arith.mulf %153, %159 : vector<8x1024xf32>
    %161 = arith.subf %157, %142 : vector<8x1024xf32>
    %cst_67 = arith.constant 0.333333343 : f32
    %162 = vector.broadcast %cst_67 : f32 to vector<8x1024xf32>
    %163 = arith.mulf %161, %162 : vector<8x1024xf32>
    %164 = arith.addf %142, %163 : vector<8x1024xf32>
    %c48 = arith.constant 48 : index
    %c0_68 = arith.constant 0 : index
    %165 = vector.load %arg11[%c48, %c0_68] : memref<64x1024xf32, #tpu.memory_space<vmem>>, vector<8x1024xf32>
    tpu.vector_store %arg11[%c48, %c0_68], %164 {strides = array<i32>} : memref<64x1024xf32, #tpu.memory_space<vmem>>, vector<8x1024xf32>,
    %c0_69 = arith.constant 0 : index
    %c7168 = arith.constant 7168 : index
    %166 = vector.load %arg10[%c0_69, %c7168] : memref<8x8192xf32, #tpu.memory_space<vmem>>, vector<8x1024xf32>
    %cst_70 = arith.constant 0.666666686 : f32
    %167 = vector.broadcast %cst_70 : f32 to vector<8x1024xf32>
    %168 = arith.mulf %147, %167 : vector<8x1024xf32>
    %169 = arith.addf %168, %166 : vector<8x1024xf32>
    %cst_71 = arith.constant 0.333333343 : f32
    %170 = vector.broadcast %cst_71 : f32 to vector<8x1024xf32>
    %171 = arith.mulf %169, %170 : vector<8x1024xf32>
    %172 = arith.addf %171, %8 : vector<8x1024xf32>
    %cst_72 = arith.constant 8.000000e-01 : f32
    %173 = vector.broadcast %cst_72 : f32 to vector<8x1024xf32>
    %174 = arith.mulf %160, %173 : vector<8x1024xf32>
    %175 = arith.addf %174, %172 : vector<8x1024xf32>
    %cst_73 = arith.constant 1.000000e+00 : f32
    %176 = vector.broadcast %cst_73 : f32 to vector<8x1024xf32>
    %177 = arith.cmpf ogt, %175, %176 : vector<8x1024xf32>
    %178 = arith.extui %177 : vector<8x1024xi1> to vector<8x1024xi32>
    %179 = arith.sitofp %178 : vector<8x1024xi32> to vector<8x1024xf32>
    %180 = arith.subf %179, %164 : vector<8x1024xf32>
    %cst_74 = arith.constant 0.333333343 : f32
    %181 = vector.broadcast %cst_74 : f32 to vector<8x1024xf32>
    %182 = arith.mulf %180, %181 : vector<8x1024xf32>
    %183 = arith.addf %164, %182 : vector<8x1024xf32>
    %c56 = arith.constant 56 : index
    %c0_75 = arith.constant 0 : index
    %184 = vector.load %arg11[%c56, %c0_75] : memref<64x1024xf32, #tpu.memory_space<vmem>>, vector<8x1024xf32>
    tpu.vector_store %arg11[%c56, %c0_75], %183 {strides = array<i32>} : memref<64x1024xf32, #tpu.memory_space<vmem>>, vector<8x1024xf32>,
    %c0_76 = arith.constant 0 : index
    %c0_77 = arith.constant 0 : index
    %185 = vector.load %arg4[%c0_76, %c0_77] : memref<256x128xf32, #tpu.memory_space<vmem>>, vector<256x128xf32>
    %c0_78 = arith.constant 0 : index
    %c0_79 = arith.constant 0 : index
    %186 = vector.load %arg5[%c0_78, %c0_79] : memref<64x128xf32, #tpu.memory_space<vmem>>, vector<64x128xf32>
    %c0_80 = arith.constant 0 : index
    %c0_81 = arith.constant 0 : index
    %187 = vector.load %arg6[%c0_80, %c0_81] : memref<8x64xf32, #tpu.memory_space<vmem>>, vector<8x64xf32>
    %c0_82 = arith.constant 0 : index
    %c0_83 = arith.constant 0 : index
    %188 = vector.load %arg7[%c0_82, %c0_83] : memref<128x16xf32, #tpu.memory_space<vmem>>, vector<128x16xf32>
    %c0_84 = arith.constant 0 : index
    %c0_85 = arith.constant 0 : index
    %189 = vector.load %arg8[%c0_84, %c0_85] : memref<1x16xf32, #tpu.memory_space<vmem>>, vector<1x16xf32>
    %c0_86 = arith.constant 0 : index
    %c0_87 = arith.constant 0 : index
    %190 = vector.load %arg11[%c0_86, %c0_87] : memref<64x1024xf32, #tpu.memory_space<vmem>>, vector<64x256xf32>
    %cst_88 = arith.constant dense<0.000000e+00> : vector<64x128xf32>
    %191 = tpu.matmul %190, %185, %cst_88 {dimension_numbers = #tpu.dot_dimension_numbers<[1], [0], [0], [1], [0, 0, 1, 1], [], []>} : vector<64x256xf32>, vector<256x128xf32>, vector<64x128xf32> -> vector<64x128xf32>
    %192 = arith.mulf %191, %186 : vector<64x128xf32>
    %cst_89 = arith.constant dense<0.000000e+00> : vector<8x128xf32>
    %193 = tpu.matmul %187, %192, %cst_89 {dimension_numbers = #tpu.dot_dimension_numbers<[1], [0], [0], [1], [0, 0, 1, 1], [], []>} : vector<8x64xf32>, vector<64x128xf32>, vector<8x128xf32> -> vector<8x128xf32>
    %cst_90 = arith.constant dense<0.000000e+00> : vector<8x16xf32>
    %194 = tpu.matmul %193, %188, %cst_90 {dimension_numbers = #tpu.dot_dimension_numbers<[1], [0], [0], [1], [0, 0, 1, 1], [], []>} : vector<8x128xf32>, vector<128x16xf32>, vector<8x16xf32> -> vector<8x16xf32>
    %195 = vector.broadcast %189 : vector<1x16xf32> to vector<8x16xf32>
    %196 = arith.addf %194, %195 : vector<8x16xf32>
    %cst_91 = arith.constant 0.000000e+00 : f32
    %197 = vector.broadcast %cst_91 : f32 to vector<1x16xf32>
    %cst_92 = arith.constant 0.000000e+00 : f32
    %198 = vector.broadcast %cst_92 : f32 to vector<1x16xf32>
    %199 = vector.extract_strided_slice %196 {offsets = [0, 0], sizes = [1, 16], strides = [1, 1]} : vector<8x16xf32> to vector<1x16xf32>
    %cst_93 = arith.constant 8.000000e-01 : f32
    %200 = vector.broadcast %cst_93 : f32 to vector<1x16xf32>
    %201 = arith.mulf %197, %200 : vector<1x16xf32>
    %202 = arith.addf %201, %199 : vector<1x16xf32>
    %cst_94 = arith.constant 1.000000e+00 : f32
    %203 = vector.broadcast %cst_94 : f32 to vector<1x16xf32>
    %204 = arith.cmpf ogt, %202, %203 : vector<1x16xf32>
    %205 = arith.extui %204 : vector<1x16xi1> to vector<1x16xi32>
    %206 = arith.sitofp %205 : vector<1x16xi32> to vector<1x16xf32>
    %cst_95 = arith.constant 1.000000e+00 : f32
    %207 = vector.broadcast %cst_95 : f32 to vector<1x16xf32>
    %208 = arith.subf %207, %206 : vector<1x16xf32>
    %209 = arith.mulf %202, %208 : vector<1x16xf32>
    %210 = arith.subf %206, %198 : vector<1x16xf32>
    %cst_96 = arith.constant 0.333333343 : f32
    %211 = vector.broadcast %cst_96 : f32 to vector<1x16xf32>
    %212 = arith.mulf %210, %211 : vector<1x16xf32>
    %213 = arith.addf %198, %212 : vector<1x16xf32>
    %c0_97 = arith.constant 0 : index
    %c0_98 = arith.constant 0 : index
    %c0_99 = arith.constant 0 : index
    %214 = vector.load %arg9[%c0_97, %c0_98, %c0_99] : memref<1x32x16xf32, #tpu.memory_space<vmem>>, vector<1x1x16xf32>
    %215 = vector.shape_cast %214 : vector<1x1x16xf32> to vector<1x16xf32>
    %216 = vector.shape_cast %213 : vector<1x16xf32> to vector<1x1x16xf32>
    tpu.vector_store %arg9[%c0_97, %c0_98, %c0_99], %216 {strides = array<i32>} : memref<1x32x16xf32, #tpu.memory_space<vmem>>, vector<1x1x16xf32>,
    %217 = vector.extract_strided_slice %196 {offsets = [1, 0], sizes = [1, 16], strides = [1, 1]} : vector<8x16xf32> to vector<1x16xf32>
    %cst_100 = arith.constant 8.000000e-01 : f32
    %218 = vector.broadcast %cst_100 : f32 to vector<1x16xf32>
    %219 = arith.mulf %209, %218 : vector<1x16xf32>
    %220 = arith.addf %219, %217 : vector<1x16xf32>
    %cst_101 = arith.constant 1.000000e+00 : f32
    %221 = vector.broadcast %cst_101 : f32 to vector<1x16xf32>
    %222 = arith.cmpf ogt, %220, %221 : vector<1x16xf32>
    %223 = arith.extui %222 : vector<1x16xi1> to vector<1x16xi32>
    %224 = arith.sitofp %223 : vector<1x16xi32> to vector<1x16xf32>
    %cst_102 = arith.constant 1.000000e+00 : f32
    %225 = vector.broadcast %cst_102 : f32 to vector<1x16xf32>
    %226 = arith.subf %225, %224 : vector<1x16xf32>
    %227 = arith.mulf %220, %226 : vector<1x16xf32>
    %228 = arith.subf %224, %213 : vector<1x16xf32>
    %cst_103 = arith.constant 0.333333343 : f32
    %229 = vector.broadcast %cst_103 : f32 to vector<1x16xf32>
    %230 = arith.mulf %228, %229 : vector<1x16xf32>
    %231 = arith.addf %213, %230 : vector<1x16xf32>
    %c0_104 = arith.constant 0 : index
    %c1 = arith.constant 1 : index
    %c0_105 = arith.constant 0 : index
    %232 = vector.load %arg9[%c0_104, %c1, %c0_105] : memref<1x32x16xf32, #tpu.memory_space<vmem>>, vector<1x1x16xf32>
    %233 = vector.shape_cast %232 : vector<1x1x16xf32> to vector<1x16xf32>
    %234 = vector.shape_cast %231 : vector<1x16xf32> to vector<1x1x16xf32>
    tpu.vector_store %arg9[%c0_104, %c1, %c0_105], %234 {strides = array<i32>} : memref<1x32x16xf32, #tpu.memory_space<vmem>>, vector<1x1x16xf32>,
    %235 = vector.extract_strided_slice %196 {offsets = [2, 0], sizes = [1, 16], strides = [1, 1]} : vector<8x16xf32> to vector<1x16xf32>
    %cst_106 = arith.constant 8.000000e-01 : f32
    %236 = vector.broadcast %cst_106 : f32 to vector<1x16xf32>
    %237 = arith.mulf %227, %236 : vector<1x16xf32>
    %238 = arith.addf %237, %235 : vector<1x16xf32>
    %cst_107 = arith.constant 1.000000e+00 : f32
    %239 = vector.broadcast %cst_107 : f32 to vector<1x16xf32>
    %240 = arith.cmpf ogt, %238, %239 : vector<1x16xf32>
    %241 = arith.extui %240 : vector<1x16xi1> to vector<1x16xi32>
    %242 = arith.sitofp %241 : vector<1x16xi32> to vector<1x16xf32>
    %cst_108 = arith.constant 1.000000e+00 : f32
    %243 = vector.broadcast %cst_108 : f32 to vector<1x16xf32>
    %244 = arith.subf %243, %242 : vector<1x16xf32>
    %245 = arith.mulf %238, %244 : vector<1x16xf32>
    %246 = arith.subf %242, %231 : vector<1x16xf32>
    %cst_109 = arith.constant 0.333333343 : f32
    %247 = vector.broadcast %cst_109 : f32 to vector<1x16xf32>
    %248 = arith.mulf %246, %247 : vector<1x16xf32>
    %249 = arith.addf %231, %248 : vector<1x16xf32>
    %c0_110 = arith.constant 0 : index
    %c2 = arith.constant 2 : index
    %c0_111 = arith.constant 0 : index
    %250 = vector.load %arg9[%c0_110, %c2, %c0_111] : memref<1x32x16xf32, #tpu.memory_space<vmem>>, vector<1x1x16xf32>
    %251 = vector.shape_cast %250 : vector<1x1x16xf32> to vector<1x16xf32>
    %252 = vector.shape_cast %249 : vector<1x16xf32> to vector<1x1x16xf32>
    tpu.vector_store %arg9[%c0_110, %c2, %c0_111], %252 {strides = array<i32>} : memref<1x32x16xf32, #tpu.memory_space<vmem>>, vector<1x1x16xf32>,
    %253 = vector.extract_strided_slice %196 {offsets = [3, 0], sizes = [1, 16], strides = [1, 1]} : vector<8x16xf32> to vector<1x16xf32>
    %cst_112 = arith.constant 8.000000e-01 : f32
    %254 = vector.broadcast %cst_112 : f32 to vector<1x16xf32>
    %255 = arith.mulf %245, %254 : vector<1x16xf32>
    %256 = arith.addf %255, %253 : vector<1x16xf32>
    %cst_113 = arith.constant 1.000000e+00 : f32
    %257 = vector.broadcast %cst_113 : f32 to vector<1x16xf32>
    %258 = arith.cmpf ogt, %256, %257 : vector<1x16xf32>
    %259 = arith.extui %258 : vector<1x16xi1> to vector<1x16xi32>
    %260 = arith.sitofp %259 : vector<1x16xi32> to vector<1x16xf32>
    %cst_114 = arith.constant 1.000000e+00 : f32
    %261 = vector.broadcast %cst_114 : f32 to vector<1x16xf32>
    %262 = arith.subf %261, %260 : vector<1x16xf32>
    %263 = arith.mulf %256, %262 : vector<1x16xf32>
    %264 = arith.subf %260, %249 : vector<1x16xf32>
    %cst_115 = arith.constant 0.333333343 : f32
    %265 = vector.broadcast %cst_115 : f32 to vector<1x16xf32>
    %266 = arith.mulf %264, %265 : vector<1x16xf32>
    %267 = arith.addf %249, %266 : vector<1x16xf32>
    %c0_116 = arith.constant 0 : index
    %c3 = arith.constant 3 : index
    %c0_117 = arith.constant 0 : index
    %268 = vector.load %arg9[%c0_116, %c3, %c0_117] : memref<1x32x16xf32, #tpu.memory_space<vmem>>, vector<1x1x16xf32>
    %269 = vector.shape_cast %268 : vector<1x1x16xf32> to vector<1x16xf32>
    %270 = vector.shape_cast %267 : vector<1x16xf32> to vector<1x1x16xf32>
    tpu.vector_store %arg9[%c0_116, %c3, %c0_117], %270 {strides = array<i32>} : memref<1x32x16xf32, #tpu.memory_space<vmem>>, vector<1x1x16xf32>,
    %271 = vector.extract_strided_slice %196 {offsets = [4, 0], sizes = [1, 16], strides = [1, 1]} : vector<8x16xf32> to vector<1x16xf32>
    %cst_118 = arith.constant 8.000000e-01 : f32
    %272 = vector.broadcast %cst_118 : f32 to vector<1x16xf32>
    %273 = arith.mulf %263, %272 : vector<1x16xf32>
    %274 = arith.addf %273, %271 : vector<1x16xf32>
    %cst_119 = arith.constant 1.000000e+00 : f32
    %275 = vector.broadcast %cst_119 : f32 to vector<1x16xf32>
    %276 = arith.cmpf ogt, %274, %275 : vector<1x16xf32>
    %277 = arith.extui %276 : vector<1x16xi1> to vector<1x16xi32>
    %278 = arith.sitofp %277 : vector<1x16xi32> to vector<1x16xf32>
    %cst_120 = arith.constant 1.000000e+00 : f32
    %279 = vector.broadcast %cst_120 : f32 to vector<1x16xf32>
    %280 = arith.subf %279, %278 : vector<1x16xf32>
    %281 = arith.mulf %274, %280 : vector<1x16xf32>
    %282 = arith.subf %278, %267 : vector<1x16xf32>
    %cst_121 = arith.constant 0.333333343 : f32
    %283 = vector.broadcast %cst_121 : f32 to vector<1x16xf32>
    %284 = arith.mulf %282, %283 : vector<1x16xf32>
    %285 = arith.addf %267, %284 : vector<1x16xf32>
    %c0_122 = arith.constant 0 : index
    %c4 = arith.constant 4 : index
    %c0_123 = arith.constant 0 : index
    %286 = vector.load %arg9[%c0_122, %c4, %c0_123] : memref<1x32x16xf32, #tpu.memory_space<vmem>>, vector<1x1x16xf32>
    %287 = vector.shape_cast %286 : vector<1x1x16xf32> to vector<1x16xf32>
    %288 = vector.shape_cast %285 : vector<1x16xf32> to vector<1x1x16xf32>
    tpu.vector_store %arg9[%c0_122, %c4, %c0_123], %288 {strides = array<i32>} : memref<1x32x16xf32, #tpu.memory_space<vmem>>, vector<1x1x16xf32>,
    %289 = vector.extract_strided_slice %196 {offsets = [5, 0], sizes = [1, 16], strides = [1, 1]} : vector<8x16xf32> to vector<1x16xf32>
    %cst_124 = arith.constant 8.000000e-01 : f32
    %290 = vector.broadcast %cst_124 : f32 to vector<1x16xf32>
    %291 = arith.mulf %281, %290 : vector<1x16xf32>
    %292 = arith.addf %291, %289 : vector<1x16xf32>
    %cst_125 = arith.constant 1.000000e+00 : f32
    %293 = vector.broadcast %cst_125 : f32 to vector<1x16xf32>
    %294 = arith.cmpf ogt, %292, %293 : vector<1x16xf32>
    %295 = arith.extui %294 : vector<1x16xi1> to vector<1x16xi32>
    %296 = arith.sitofp %295 : vector<1x16xi32> to vector<1x16xf32>
    %cst_126 = arith.constant 1.000000e+00 : f32
    %297 = vector.broadcast %cst_126 : f32 to vector<1x16xf32>
    %298 = arith.subf %297, %296 : vector<1x16xf32>
    %299 = arith.mulf %292, %298 : vector<1x16xf32>
    %300 = arith.subf %296, %285 : vector<1x16xf32>
    %cst_127 = arith.constant 0.333333343 : f32
    %301 = vector.broadcast %cst_127 : f32 to vector<1x16xf32>
    %302 = arith.mulf %300, %301 : vector<1x16xf32>
    %303 = arith.addf %285, %302 : vector<1x16xf32>
    %c0_128 = arith.constant 0 : index
    %c5 = arith.constant 5 : index
    %c0_129 = arith.constant 0 : index
    %304 = vector.load %arg9[%c0_128, %c5, %c0_129] : memref<1x32x16xf32, #tpu.memory_space<vmem>>, vector<1x1x16xf32>
    %305 = vector.shape_cast %304 : vector<1x1x16xf32> to vector<1x16xf32>
    %306 = vector.shape_cast %303 : vector<1x16xf32> to vector<1x1x16xf32>
    tpu.vector_store %arg9[%c0_128, %c5, %c0_129], %306 {strides = array<i32>} : memref<1x32x16xf32, #tpu.memory_space<vmem>>, vector<1x1x16xf32>,
    %307 = vector.extract_strided_slice %196 {offsets = [6, 0], sizes = [1, 16], strides = [1, 1]} : vector<8x16xf32> to vector<1x16xf32>
    %cst_130 = arith.constant 8.000000e-01 : f32
    %308 = vector.broadcast %cst_130 : f32 to vector<1x16xf32>
    %309 = arith.mulf %299, %308 : vector<1x16xf32>
    %310 = arith.addf %309, %307 : vector<1x16xf32>
    %cst_131 = arith.constant 1.000000e+00 : f32
    %311 = vector.broadcast %cst_131 : f32 to vector<1x16xf32>
    %312 = arith.cmpf ogt, %310, %311 : vector<1x16xf32>
    %313 = arith.extui %312 : vector<1x16xi1> to vector<1x16xi32>
    %314 = arith.sitofp %313 : vector<1x16xi32> to vector<1x16xf32>
    %cst_132 = arith.constant 1.000000e+00 : f32
    %315 = vector.broadcast %cst_132 : f32 to vector<1x16xf32>
    %316 = arith.subf %315, %314 : vector<1x16xf32>
    %317 = arith.mulf %310, %316 : vector<1x16xf32>
    %318 = arith.subf %314, %303 : vector<1x16xf32>
    %cst_133 = arith.constant 0.333333343 : f32
    %319 = vector.broadcast %cst_133 : f32 to vector<1x16xf32>
    %320 = arith.mulf %318, %319 : vector<1x16xf32>
    %321 = arith.addf %303, %320 : vector<1x16xf32>
    %c0_134 = arith.constant 0 : index
    %c6 = arith.constant 6 : index
    %c0_135 = arith.constant 0 : index
    %322 = vector.load %arg9[%c0_134, %c6, %c0_135] : memref<1x32x16xf32, #tpu.memory_space<vmem>>, vector<1x1x16xf32>
    %323 = vector.shape_cast %322 : vector<1x1x16xf32> to vector<1x16xf32>
    %324 = vector.shape_cast %321 : vector<1x16xf32> to vector<1x1x16xf32>
    tpu.vector_store %arg9[%c0_134, %c6, %c0_135], %324 {strides = array<i32>} : memref<1x32x16xf32, #tpu.memory_space<vmem>>, vector<1x1x16xf32>,
    %325 = vector.extract_strided_slice %196 {offsets = [7, 0], sizes = [1, 16], strides = [1, 1]} : vector<8x16xf32> to vector<1x16xf32>
    %cst_136 = arith.constant 8.000000e-01 : f32
    %326 = vector.broadcast %cst_136 : f32 to vector<1x16xf32>
    %327 = arith.mulf %317, %326 : vector<1x16xf32>
    %328 = arith.addf %327, %325 : vector<1x16xf32>
    %cst_137 = arith.constant 1.000000e+00 : f32
    %329 = vector.broadcast %cst_137 : f32 to vector<1x16xf32>
    %330 = arith.cmpf ogt, %328, %329 : vector<1x16xf32>
    %331 = arith.extui %330 : vector<1x16xi1> to vector<1x16xi32>
    %332 = arith.sitofp %331 : vector<1x16xi32> to vector<1x16xf32>
    %333 = arith.subf %332, %321 : vector<1x16xf32>
    %cst_138 = arith.constant 0.333333343 : f32
    %334 = vector.broadcast %cst_138 : f32 to vector<1x16xf32>
    %335 = arith.mulf %333, %334 : vector<1x16xf32>
    %336 = arith.addf %321, %335 : vector<1x16xf32>
    %c0_139 = arith.constant 0 : index
    %c7 = arith.constant 7 : index
    %c0_140 = arith.constant 0 : index
    %337 = vector.load %arg9[%c0_139, %c7, %c0_140] : memref<1x32x16xf32, #tpu.memory_space<vmem>>, vector<1x1x16xf32>
    %338 = vector.shape_cast %337 : vector<1x1x16xf32> to vector<1x16xf32>
    %339 = vector.shape_cast %336 : vector<1x16xf32> to vector<1x1x16xf32>
    tpu.vector_store %arg9[%c0_139, %c7, %c0_140], %339 {strides = array<i32>} : memref<1x32x16xf32, #tpu.memory_space<vmem>>, vector<1x1x16xf32>,
    %c0_141 = arith.constant 0 : index
    %c256 = arith.constant 256 : index
    %340 = vector.load %arg11[%c0_141, %c256] : memref<64x1024xf32, #tpu.memory_space<vmem>>, vector<64x256xf32>
    %cst_142 = arith.constant dense<0.000000e+00> : vector<64x128xf32>
    %341 = tpu.matmul %340, %185, %cst_142 {dimension_numbers = #tpu.dot_dimension_numbers<[1], [0], [0], [1], [0, 0, 1, 1], [], []>} : vector<64x256xf32>, vector<256x128xf32>, vector<64x128xf32> -> vector<64x128xf32>
    %342 = arith.mulf %341, %186 : vector<64x128xf32>
    %cst_143 = arith.constant dense<0.000000e+00> : vector<8x128xf32>
    %343 = tpu.matmul %187, %342, %cst_143 {dimension_numbers = #tpu.dot_dimension_numbers<[1], [0], [0], [1], [0, 0, 1, 1], [], []>} : vector<8x64xf32>, vector<64x128xf32>, vector<8x128xf32> -> vector<8x128xf32>
    %cst_144 = arith.constant dense<0.000000e+00> : vector<8x16xf32>
    %344 = tpu.matmul %343, %188, %cst_144 {dimension_numbers = #tpu.dot_dimension_numbers<[1], [0], [0], [1], [0, 0, 1, 1], [], []>} : vector<8x128xf32>, vector<128x16xf32>, vector<8x16xf32> -> vector<8x16xf32>
    %345 = vector.broadcast %189 : vector<1x16xf32> to vector<8x16xf32>
    %346 = arith.addf %344, %345 : vector<8x16xf32>
    %cst_145 = arith.constant 0.000000e+00 : f32
    %347 = vector.broadcast %cst_145 : f32 to vector<1x16xf32>
    %cst_146 = arith.constant 0.000000e+00 : f32
    %348 = vector.broadcast %cst_146 : f32 to vector<1x16xf32>
    %349 = vector.extract_strided_slice %346 {offsets = [0, 0], sizes = [1, 16], strides = [1, 1]} : vector<8x16xf32> to vector<1x16xf32>
    %cst_147 = arith.constant 8.000000e-01 : f32
    %350 = vector.broadcast %cst_147 : f32 to vector<1x16xf32>
    %351 = arith.mulf %347, %350 : vector<1x16xf32>
    %352 = arith.addf %351, %349 : vector<1x16xf32>
    %cst_148 = arith.constant 1.000000e+00 : f32
    %353 = vector.broadcast %cst_148 : f32 to vector<1x16xf32>
    %354 = arith.cmpf ogt, %352, %353 : vector<1x16xf32>
    %355 = arith.extui %354 : vector<1x16xi1> to vector<1x16xi32>
    %356 = arith.sitofp %355 : vector<1x16xi32> to vector<1x16xf32>
    %cst_149 = arith.constant 1.000000e+00 : f32
    %357 = vector.broadcast %cst_149 : f32 to vector<1x16xf32>
    %358 = arith.subf %357, %356 : vector<1x16xf32>
    %359 = arith.mulf %352, %358 : vector<1x16xf32>
    %360 = arith.subf %356, %348 : vector<1x16xf32>
    %cst_150 = arith.constant 0.333333343 : f32
    %361 = vector.broadcast %cst_150 : f32 to vector<1x16xf32>
    %362 = arith.mulf %360, %361 : vector<1x16xf32>
    %363 = arith.addf %348, %362 : vector<1x16xf32>
    %c0_151 = arith.constant 0 : index
    %c8_152 = arith.constant 8 : index
    %c0_153 = arith.constant 0 : index
    %364 = vector.load %arg9[%c0_151, %c8_152, %c0_153] : memref<1x32x16xf32, #tpu.memory_space<vmem>>, vector<1x1x16xf32>
    %365 = vector.shape_cast %364 : vector<1x1x16xf32> to vector<1x16xf32>
    %366 = vector.shape_cast %363 : vector<1x16xf32> to vector<1x1x16xf32>
    tpu.vector_store %arg9[%c0_151, %c8_152, %c0_153], %366 {strides = array<i32>} : memref<1x32x16xf32, #tpu.memory_space<vmem>>, vector<1x1x16xf32>,
    %367 = vector.extract_strided_slice %346 {offsets = [1, 0], sizes = [1, 16], strides = [1, 1]} : vector<8x16xf32> to vector<1x16xf32>
    %cst_154 = arith.constant 8.000000e-01 : f32
    %368 = vector.broadcast %cst_154 : f32 to vector<1x16xf32>
    %369 = arith.mulf %359, %368 : vector<1x16xf32>
    %370 = arith.addf %369, %367 : vector<1x16xf32>
    %cst_155 = arith.constant 1.000000e+00 : f32
    %371 = vector.broadcast %cst_155 : f32 to vector<1x16xf32>
    %372 = arith.cmpf ogt, %370, %371 : vector<1x16xf32>
    %373 = arith.extui %372 : vector<1x16xi1> to vector<1x16xi32>
    %374 = arith.sitofp %373 : vector<1x16xi32> to vector<1x16xf32>
    %cst_156 = arith.constant 1.000000e+00 : f32
    %375 = vector.broadcast %cst_156 : f32 to vector<1x16xf32>
    %376 = arith.subf %375, %374 : vector<1x16xf32>
    %377 = arith.mulf %370, %376 : vector<1x16xf32>
    %378 = arith.subf %374, %363 : vector<1x16xf32>
    %cst_157 = arith.constant 0.333333343 : f32
    %379 = vector.broadcast %cst_157 : f32 to vector<1x16xf32>
    %380 = arith.mulf %378, %379 : vector<1x16xf32>
    %381 = arith.addf %363, %380 : vector<1x16xf32>
    %c0_158 = arith.constant 0 : index
    %c9 = arith.constant 9 : index
    %c0_159 = arith.constant 0 : index
    %382 = vector.load %arg9[%c0_158, %c9, %c0_159] : memref<1x32x16xf32, #tpu.memory_space<vmem>>, vector<1x1x16xf32>
    %383 = vector.shape_cast %382 : vector<1x1x16xf32> to vector<1x16xf32>
    %384 = vector.shape_cast %381 : vector<1x16xf32> to vector<1x1x16xf32>
    tpu.vector_store %arg9[%c0_158, %c9, %c0_159], %384 {strides = array<i32>} : memref<1x32x16xf32, #tpu.memory_space<vmem>>, vector<1x1x16xf32>,
    %385 = vector.extract_strided_slice %346 {offsets = [2, 0], sizes = [1, 16], strides = [1, 1]} : vector<8x16xf32> to vector<1x16xf32>
    %cst_160 = arith.constant 8.000000e-01 : f32
    %386 = vector.broadcast %cst_160 : f32 to vector<1x16xf32>
    %387 = arith.mulf %377, %386 : vector<1x16xf32>
    %388 = arith.addf %387, %385 : vector<1x16xf32>
    %cst_161 = arith.constant 1.000000e+00 : f32
    %389 = vector.broadcast %cst_161 : f32 to vector<1x16xf32>
    %390 = arith.cmpf ogt, %388, %389 : vector<1x16xf32>
    %391 = arith.extui %390 : vector<1x16xi1> to vector<1x16xi32>
    %392 = arith.sitofp %391 : vector<1x16xi32> to vector<1x16xf32>
    %cst_162 = arith.constant 1.000000e+00 : f32
    %393 = vector.broadcast %cst_162 : f32 to vector<1x16xf32>
    %394 = arith.subf %393, %392 : vector<1x16xf32>
    %395 = arith.mulf %388, %394 : vector<1x16xf32>
    %396 = arith.subf %392, %381 : vector<1x16xf32>
    %cst_163 = arith.constant 0.333333343 : f32
    %397 = vector.broadcast %cst_163 : f32 to vector<1x16xf32>
    %398 = arith.mulf %396, %397 : vector<1x16xf32>
    %399 = arith.addf %381, %398 : vector<1x16xf32>
    %c0_164 = arith.constant 0 : index
    %c10 = arith.constant 10 : index
    %c0_165 = arith.constant 0 : index
    %400 = vector.load %arg9[%c0_164, %c10, %c0_165] : memref<1x32x16xf32, #tpu.memory_space<vmem>>, vector<1x1x16xf32>
    %401 = vector.shape_cast %400 : vector<1x1x16xf32> to vector<1x16xf32>
    %402 = vector.shape_cast %399 : vector<1x16xf32> to vector<1x1x16xf32>
    tpu.vector_store %arg9[%c0_164, %c10, %c0_165], %402 {strides = array<i32>} : memref<1x32x16xf32, #tpu.memory_space<vmem>>, vector<1x1x16xf32>,
    %403 = vector.extract_strided_slice %346 {offsets = [3, 0], sizes = [1, 16], strides = [1, 1]} : vector<8x16xf32> to vector<1x16xf32>
    %cst_166 = arith.constant 8.000000e-01 : f32
    %404 = vector.broadcast %cst_166 : f32 to vector<1x16xf32>
    %405 = arith.mulf %395, %404 : vector<1x16xf32>
    %406 = arith.addf %405, %403 : vector<1x16xf32>
    %cst_167 = arith.constant 1.000000e+00 : f32
    %407 = vector.broadcast %cst_167 : f32 to vector<1x16xf32>
    %408 = arith.cmpf ogt, %406, %407 : vector<1x16xf32>
    %409 = arith.extui %408 : vector<1x16xi1> to vector<1x16xi32>
    %410 = arith.sitofp %409 : vector<1x16xi32> to vector<1x16xf32>
    %cst_168 = arith.constant 1.000000e+00 : f32
    %411 = vector.broadcast %cst_168 : f32 to vector<1x16xf32>
    %412 = arith.subf %411, %410 : vector<1x16xf32>
    %413 = arith.mulf %406, %412 : vector<1x16xf32>
    %414 = arith.subf %410, %399 : vector<1x16xf32>
    %cst_169 = arith.constant 0.333333343 : f32
    %415 = vector.broadcast %cst_169 : f32 to vector<1x16xf32>
    %416 = arith.mulf %414, %415 : vector<1x16xf32>
    %417 = arith.addf %399, %416 : vector<1x16xf32>
    %c0_170 = arith.constant 0 : index
    %c11 = arith.constant 11 : index
    %c0_171 = arith.constant 0 : index
    %418 = vector.load %arg9[%c0_170, %c11, %c0_171] : memref<1x32x16xf32, #tpu.memory_space<vmem>>, vector<1x1x16xf32>
    %419 = vector.shape_cast %418 : vector<1x1x16xf32> to vector<1x16xf32>
    %420 = vector.shape_cast %417 : vector<1x16xf32> to vector<1x1x16xf32>
    tpu.vector_store %arg9[%c0_170, %c11, %c0_171], %420 {strides = array<i32>} : memref<1x32x16xf32, #tpu.memory_space<vmem>>, vector<1x1x16xf32>,
    %421 = vector.extract_strided_slice %346 {offsets = [4, 0], sizes = [1, 16], strides = [1, 1]} : vector<8x16xf32> to vector<1x16xf32>
    %cst_172 = arith.constant 8.000000e-01 : f32
    %422 = vector.broadcast %cst_172 : f32 to vector<1x16xf32>
    %423 = arith.mulf %413, %422 : vector<1x16xf32>
    %424 = arith.addf %423, %421 : vector<1x16xf32>
    %cst_173 = arith.constant 1.000000e+00 : f32
    %425 = vector.broadcast %cst_173 : f32 to vector<1x16xf32>
    %426 = arith.cmpf ogt, %424, %425 : vector<1x16xf32>
    %427 = arith.extui %426 : vector<1x16xi1> to vector<1x16xi32>
    %428 = arith.sitofp %427 : vector<1x16xi32> to vector<1x16xf32>
    %cst_174 = arith.constant 1.000000e+00 : f32
    %429 = vector.broadcast %cst_174 : f32 to vector<1x16xf32>
    %430 = arith.subf %429, %428 : vector<1x16xf32>
    %431 = arith.mulf %424, %430 : vector<1x16xf32>
    %432 = arith.subf %428, %417 : vector<1x16xf32>
    %cst_175 = arith.constant 0.333333343 : f32
    %433 = vector.broadcast %cst_175 : f32 to vector<1x16xf32>
    %434 = arith.mulf %432, %433 : vector<1x16xf32>
    %435 = arith.addf %417, %434 : vector<1x16xf32>
    %c0_176 = arith.constant 0 : index
    %c12 = arith.constant 12 : index
    %c0_177 = arith.constant 0 : index
    %436 = vector.load %arg9[%c0_176, %c12, %c0_177] : memref<1x32x16xf32, #tpu.memory_space<vmem>>, vector<1x1x16xf32>
    %437 = vector.shape_cast %436 : vector<1x1x16xf32> to vector<1x16xf32>
    %438 = vector.shape_cast %435 : vector<1x16xf32> to vector<1x1x16xf32>
    tpu.vector_store %arg9[%c0_176, %c12, %c0_177], %438 {strides = array<i32>} : memref<1x32x16xf32, #tpu.memory_space<vmem>>, vector<1x1x16xf32>,
    %439 = vector.extract_strided_slice %346 {offsets = [5, 0], sizes = [1, 16], strides = [1, 1]} : vector<8x16xf32> to vector<1x16xf32>
    %cst_178 = arith.constant 8.000000e-01 : f32
    %440 = vector.broadcast %cst_178 : f32 to vector<1x16xf32>
    %441 = arith.mulf %431, %440 : vector<1x16xf32>
    %442 = arith.addf %441, %439 : vector<1x16xf32>
    %cst_179 = arith.constant 1.000000e+00 : f32
    %443 = vector.broadcast %cst_179 : f32 to vector<1x16xf32>
    %444 = arith.cmpf ogt, %442, %443 : vector<1x16xf32>
    %445 = arith.extui %444 : vector<1x16xi1> to vector<1x16xi32>
    %446 = arith.sitofp %445 : vector<1x16xi32> to vector<1x16xf32>
    %cst_180 = arith.constant 1.000000e+00 : f32
    %447 = vector.broadcast %cst_180 : f32 to vector<1x16xf32>
    %448 = arith.subf %447, %446 : vector<1x16xf32>
    %449 = arith.mulf %442, %448 : vector<1x16xf32>
    %450 = arith.subf %446, %435 : vector<1x16xf32>
    %cst_181 = arith.constant 0.333333343 : f32
    %451 = vector.broadcast %cst_181 : f32 to vector<1x16xf32>
    %452 = arith.mulf %450, %451 : vector<1x16xf32>
    %453 = arith.addf %435, %452 : vector<1x16xf32>
    %c0_182 = arith.constant 0 : index
    %c13 = arith.constant 13 : index
    %c0_183 = arith.constant 0 : index
    %454 = vector.load %arg9[%c0_182, %c13, %c0_183] : memref<1x32x16xf32, #tpu.memory_space<vmem>>, vector<1x1x16xf32>
    %455 = vector.shape_cast %454 : vector<1x1x16xf32> to vector<1x16xf32>
    %456 = vector.shape_cast %453 : vector<1x16xf32> to vector<1x1x16xf32>
    tpu.vector_store %arg9[%c0_182, %c13, %c0_183], %456 {strides = array<i32>} : memref<1x32x16xf32, #tpu.memory_space<vmem>>, vector<1x1x16xf32>,
    %457 = vector.extract_strided_slice %346 {offsets = [6, 0], sizes = [1, 16], strides = [1, 1]} : vector<8x16xf32> to vector<1x16xf32>
    %cst_184 = arith.constant 8.000000e-01 : f32
    %458 = vector.broadcast %cst_184 : f32 to vector<1x16xf32>
    %459 = arith.mulf %449, %458 : vector<1x16xf32>
    %460 = arith.addf %459, %457 : vector<1x16xf32>
    %cst_185 = arith.constant 1.000000e+00 : f32
    %461 = vector.broadcast %cst_185 : f32 to vector<1x16xf32>
    %462 = arith.cmpf ogt, %460, %461 : vector<1x16xf32>
    %463 = arith.extui %462 : vector<1x16xi1> to vector<1x16xi32>
    %464 = arith.sitofp %463 : vector<1x16xi32> to vector<1x16xf32>
    %cst_186 = arith.constant 1.000000e+00 : f32
    %465 = vector.broadcast %cst_186 : f32 to vector<1x16xf32>
    %466 = arith.subf %465, %464 : vector<1x16xf32>
    %467 = arith.mulf %460, %466 : vector<1x16xf32>
    %468 = arith.subf %464, %453 : vector<1x16xf32>
    %cst_187 = arith.constant 0.333333343 : f32
    %469 = vector.broadcast %cst_187 : f32 to vector<1x16xf32>
    %470 = arith.mulf %468, %469 : vector<1x16xf32>
    %471 = arith.addf %453, %470 : vector<1x16xf32>
    %c0_188 = arith.constant 0 : index
    %c14 = arith.constant 14 : index
    %c0_189 = arith.constant 0 : index
    %472 = vector.load %arg9[%c0_188, %c14, %c0_189] : memref<1x32x16xf32, #tpu.memory_space<vmem>>, vector<1x1x16xf32>
    %473 = vector.shape_cast %472 : vector<1x1x16xf32> to vector<1x16xf32>
    %474 = vector.shape_cast %471 : vector<1x16xf32> to vector<1x1x16xf32>
    tpu.vector_store %arg9[%c0_188, %c14, %c0_189], %474 {strides = array<i32>} : memref<1x32x16xf32, #tpu.memory_space<vmem>>, vector<1x1x16xf32>,
    %475 = vector.extract_strided_slice %346 {offsets = [7, 0], sizes = [1, 16], strides = [1, 1]} : vector<8x16xf32> to vector<1x16xf32>
    %cst_190 = arith.constant 8.000000e-01 : f32
    %476 = vector.broadcast %cst_190 : f32 to vector<1x16xf32>
    %477 = arith.mulf %467, %476 : vector<1x16xf32>
    %478 = arith.addf %477, %475 : vector<1x16xf32>
    %cst_191 = arith.constant 1.000000e+00 : f32
    %479 = vector.broadcast %cst_191 : f32 to vector<1x16xf32>
    %480 = arith.cmpf ogt, %478, %479 : vector<1x16xf32>
    %481 = arith.extui %480 : vector<1x16xi1> to vector<1x16xi32>
    %482 = arith.sitofp %481 : vector<1x16xi32> to vector<1x16xf32>
    %483 = arith.subf %482, %471 : vector<1x16xf32>
    %cst_192 = arith.constant 0.333333343 : f32
    %484 = vector.broadcast %cst_192 : f32 to vector<1x16xf32>
    %485 = arith.mulf %483, %484 : vector<1x16xf32>
    %486 = arith.addf %471, %485 : vector<1x16xf32>
    %c0_193 = arith.constant 0 : index
    %c15 = arith.constant 15 : index
    %c0_194 = arith.constant 0 : index
    %487 = vector.load %arg9[%c0_193, %c15, %c0_194] : memref<1x32x16xf32, #tpu.memory_space<vmem>>, vector<1x1x16xf32>
    %488 = vector.shape_cast %487 : vector<1x1x16xf32> to vector<1x16xf32>
    %489 = vector.shape_cast %486 : vector<1x16xf32> to vector<1x1x16xf32>
    tpu.vector_store %arg9[%c0_193, %c15, %c0_194], %489 {strides = array<i32>} : memref<1x32x16xf32, #tpu.memory_space<vmem>>, vector<1x1x16xf32>,
    %c0_195 = arith.constant 0 : index
    %c512 = arith.constant 512 : index
    %490 = vector.load %arg11[%c0_195, %c512] : memref<64x1024xf32, #tpu.memory_space<vmem>>, vector<64x256xf32>
    %cst_196 = arith.constant dense<0.000000e+00> : vector<64x128xf32>
    %491 = tpu.matmul %490, %185, %cst_196 {dimension_numbers = #tpu.dot_dimension_numbers<[1], [0], [0], [1], [0, 0, 1, 1], [], []>} : vector<64x256xf32>, vector<256x128xf32>, vector<64x128xf32> -> vector<64x128xf32>
    %492 = arith.mulf %491, %186 : vector<64x128xf32>
    %cst_197 = arith.constant dense<0.000000e+00> : vector<8x128xf32>
    %493 = tpu.matmul %187, %492, %cst_197 {dimension_numbers = #tpu.dot_dimension_numbers<[1], [0], [0], [1], [0, 0, 1, 1], [], []>} : vector<8x64xf32>, vector<64x128xf32>, vector<8x128xf32> -> vector<8x128xf32>
    %cst_198 = arith.constant dense<0.000000e+00> : vector<8x16xf32>
    %494 = tpu.matmul %493, %188, %cst_198 {dimension_numbers = #tpu.dot_dimension_numbers<[1], [0], [0], [1], [0, 0, 1, 1], [], []>} : vector<8x128xf32>, vector<128x16xf32>, vector<8x16xf32> -> vector<8x16xf32>
    %495 = vector.broadcast %189 : vector<1x16xf32> to vector<8x16xf32>
    %496 = arith.addf %494, %495 : vector<8x16xf32>
    %cst_199 = arith.constant 0.000000e+00 : f32
    %497 = vector.broadcast %cst_199 : f32 to vector<1x16xf32>
    %cst_200 = arith.constant 0.000000e+00 : f32
    %498 = vector.broadcast %cst_200 : f32 to vector<1x16xf32>
    %499 = vector.extract_strided_slice %496 {offsets = [0, 0], sizes = [1, 16], strides = [1, 1]} : vector<8x16xf32> to vector<1x16xf32>
    %cst_201 = arith.constant 8.000000e-01 : f32
    %500 = vector.broadcast %cst_201 : f32 to vector<1x16xf32>
    %501 = arith.mulf %497, %500 : vector<1x16xf32>
    %502 = arith.addf %501, %499 : vector<1x16xf32>
    %cst_202 = arith.constant 1.000000e+00 : f32
    %503 = vector.broadcast %cst_202 : f32 to vector<1x16xf32>
    %504 = arith.cmpf ogt, %502, %503 : vector<1x16xf32>
    %505 = arith.extui %504 : vector<1x16xi1> to vector<1x16xi32>
    %506 = arith.sitofp %505 : vector<1x16xi32> to vector<1x16xf32>
    %cst_203 = arith.constant 1.000000e+00 : f32
    %507 = vector.broadcast %cst_203 : f32 to vector<1x16xf32>
    %508 = arith.subf %507, %506 : vector<1x16xf32>
    %509 = arith.mulf %502, %508 : vector<1x16xf32>
    %510 = arith.subf %506, %498 : vector<1x16xf32>
    %cst_204 = arith.constant 0.333333343 : f32
    %511 = vector.broadcast %cst_204 : f32 to vector<1x16xf32>
    %512 = arith.mulf %510, %511 : vector<1x16xf32>
    %513 = arith.addf %498, %512 : vector<1x16xf32>
    %c0_205 = arith.constant 0 : index
    %c16_206 = arith.constant 16 : index
    %c0_207 = arith.constant 0 : index
    %514 = vector.load %arg9[%c0_205, %c16_206, %c0_207] : memref<1x32x16xf32, #tpu.memory_space<vmem>>, vector<1x1x16xf32>
    %515 = vector.shape_cast %514 : vector<1x1x16xf32> to vector<1x16xf32>
    %516 = vector.shape_cast %513 : vector<1x16xf32> to vector<1x1x16xf32>
    tpu.vector_store %arg9[%c0_205, %c16_206, %c0_207], %516 {strides = array<i32>} : memref<1x32x16xf32, #tpu.memory_space<vmem>>, vector<1x1x16xf32>,
    %517 = vector.extract_strided_slice %496 {offsets = [1, 0], sizes = [1, 16], strides = [1, 1]} : vector<8x16xf32> to vector<1x16xf32>
    %cst_208 = arith.constant 8.000000e-01 : f32
    %518 = vector.broadcast %cst_208 : f32 to vector<1x16xf32>
    %519 = arith.mulf %509, %518 : vector<1x16xf32>
    %520 = arith.addf %519, %517 : vector<1x16xf32>
    %cst_209 = arith.constant 1.000000e+00 : f32
    %521 = vector.broadcast %cst_209 : f32 to vector<1x16xf32>
    %522 = arith.cmpf ogt, %520, %521 : vector<1x16xf32>
    %523 = arith.extui %522 : vector<1x16xi1> to vector<1x16xi32>
    %524 = arith.sitofp %523 : vector<1x16xi32> to vector<1x16xf32>
    %cst_210 = arith.constant 1.000000e+00 : f32
    %525 = vector.broadcast %cst_210 : f32 to vector<1x16xf32>
    %526 = arith.subf %525, %524 : vector<1x16xf32>
    %527 = arith.mulf %520, %526 : vector<1x16xf32>
    %528 = arith.subf %524, %513 : vector<1x16xf32>
    %cst_211 = arith.constant 0.333333343 : f32
    %529 = vector.broadcast %cst_211 : f32 to vector<1x16xf32>
    %530 = arith.mulf %528, %529 : vector<1x16xf32>
    %531 = arith.addf %513, %530 : vector<1x16xf32>
    %c0_212 = arith.constant 0 : index
    %c17 = arith.constant 17 : index
    %c0_213 = arith.constant 0 : index
    %532 = vector.load %arg9[%c0_212, %c17, %c0_213] : memref<1x32x16xf32, #tpu.memory_space<vmem>>, vector<1x1x16xf32>
    %533 = vector.shape_cast %532 : vector<1x1x16xf32> to vector<1x16xf32>
    %534 = vector.shape_cast %531 : vector<1x16xf32> to vector<1x1x16xf32>
    tpu.vector_store %arg9[%c0_212, %c17, %c0_213], %534 {strides = array<i32>} : memref<1x32x16xf32, #tpu.memory_space<vmem>>, vector<1x1x16xf32>,
    %535 = vector.extract_strided_slice %496 {offsets = [2, 0], sizes = [1, 16], strides = [1, 1]} : vector<8x16xf32> to vector<1x16xf32>
    %cst_214 = arith.constant 8.000000e-01 : f32
    %536 = vector.broadcast %cst_214 : f32 to vector<1x16xf32>
    %537 = arith.mulf %527, %536 : vector<1x16xf32>
    %538 = arith.addf %537, %535 : vector<1x16xf32>
    %cst_215 = arith.constant 1.000000e+00 : f32
    %539 = vector.broadcast %cst_215 : f32 to vector<1x16xf32>
    %540 = arith.cmpf ogt, %538, %539 : vector<1x16xf32>
    %541 = arith.extui %540 : vector<1x16xi1> to vector<1x16xi32>
    %542 = arith.sitofp %541 : vector<1x16xi32> to vector<1x16xf32>
    %cst_216 = arith.constant 1.000000e+00 : f32
    %543 = vector.broadcast %cst_216 : f32 to vector<1x16xf32>
    %544 = arith.subf %543, %542 : vector<1x16xf32>
    %545 = arith.mulf %538, %544 : vector<1x16xf32>
    %546 = arith.subf %542, %531 : vector<1x16xf32>
    %cst_217 = arith.constant 0.333333343 : f32
    %547 = vector.broadcast %cst_217 : f32 to vector<1x16xf32>
    %548 = arith.mulf %546, %547 : vector<1x16xf32>
    %549 = arith.addf %531, %548 : vector<1x16xf32>
    %c0_218 = arith.constant 0 : index
    %c18 = arith.constant 18 : index
    %c0_219 = arith.constant 0 : index
    %550 = vector.load %arg9[%c0_218, %c18, %c0_219] : memref<1x32x16xf32, #tpu.memory_space<vmem>>, vector<1x1x16xf32>
    %551 = vector.shape_cast %550 : vector<1x1x16xf32> to vector<1x16xf32>
    %552 = vector.shape_cast %549 : vector<1x16xf32> to vector<1x1x16xf32>
    tpu.vector_store %arg9[%c0_218, %c18, %c0_219], %552 {strides = array<i32>} : memref<1x32x16xf32, #tpu.memory_space<vmem>>, vector<1x1x16xf32>,
    %553 = vector.extract_strided_slice %496 {offsets = [3, 0], sizes = [1, 16], strides = [1, 1]} : vector<8x16xf32> to vector<1x16xf32>
    %cst_220 = arith.constant 8.000000e-01 : f32
    %554 = vector.broadcast %cst_220 : f32 to vector<1x16xf32>
    %555 = arith.mulf %545, %554 : vector<1x16xf32>
    %556 = arith.addf %555, %553 : vector<1x16xf32>
    %cst_221 = arith.constant 1.000000e+00 : f32
    %557 = vector.broadcast %cst_221 : f32 to vector<1x16xf32>
    %558 = arith.cmpf ogt, %556, %557 : vector<1x16xf32>
    %559 = arith.extui %558 : vector<1x16xi1> to vector<1x16xi32>
    %560 = arith.sitofp %559 : vector<1x16xi32> to vector<1x16xf32>
    %cst_222 = arith.constant 1.000000e+00 : f32
    %561 = vector.broadcast %cst_222 : f32 to vector<1x16xf32>
    %562 = arith.subf %561, %560 : vector<1x16xf32>
    %563 = arith.mulf %556, %562 : vector<1x16xf32>
    %564 = arith.subf %560, %549 : vector<1x16xf32>
    %cst_223 = arith.constant 0.333333343 : f32
    %565 = vector.broadcast %cst_223 : f32 to vector<1x16xf32>
    %566 = arith.mulf %564, %565 : vector<1x16xf32>
    %567 = arith.addf %549, %566 : vector<1x16xf32>
    %c0_224 = arith.constant 0 : index
    %c19 = arith.constant 19 : index
    %c0_225 = arith.constant 0 : index
    %568 = vector.load %arg9[%c0_224, %c19, %c0_225] : memref<1x32x16xf32, #tpu.memory_space<vmem>>, vector<1x1x16xf32>
    %569 = vector.shape_cast %568 : vector<1x1x16xf32> to vector<1x16xf32>
    %570 = vector.shape_cast %567 : vector<1x16xf32> to vector<1x1x16xf32>
    tpu.vector_store %arg9[%c0_224, %c19, %c0_225], %570 {strides = array<i32>} : memref<1x32x16xf32, #tpu.memory_space<vmem>>, vector<1x1x16xf32>,
    %571 = vector.extract_strided_slice %496 {offsets = [4, 0], sizes = [1, 16], strides = [1, 1]} : vector<8x16xf32> to vector<1x16xf32>
    %cst_226 = arith.constant 8.000000e-01 : f32
    %572 = vector.broadcast %cst_226 : f32 to vector<1x16xf32>
    %573 = arith.mulf %563, %572 : vector<1x16xf32>
    %574 = arith.addf %573, %571 : vector<1x16xf32>
    %cst_227 = arith.constant 1.000000e+00 : f32
    %575 = vector.broadcast %cst_227 : f32 to vector<1x16xf32>
    %576 = arith.cmpf ogt, %574, %575 : vector<1x16xf32>
    %577 = arith.extui %576 : vector<1x16xi1> to vector<1x16xi32>
    %578 = arith.sitofp %577 : vector<1x16xi32> to vector<1x16xf32>
    %cst_228 = arith.constant 1.000000e+00 : f32
    %579 = vector.broadcast %cst_228 : f32 to vector<1x16xf32>
    %580 = arith.subf %579, %578 : vector<1x16xf32>
    %581 = arith.mulf %574, %580 : vector<1x16xf32>
    %582 = arith.subf %578, %567 : vector<1x16xf32>
    %cst_229 = arith.constant 0.333333343 : f32
    %583 = vector.broadcast %cst_229 : f32 to vector<1x16xf32>
    %584 = arith.mulf %582, %583 : vector<1x16xf32>
    %585 = arith.addf %567, %584 : vector<1x16xf32>
    %c0_230 = arith.constant 0 : index
    %c20 = arith.constant 20 : index
    %c0_231 = arith.constant 0 : index
    %586 = vector.load %arg9[%c0_230, %c20, %c0_231] : memref<1x32x16xf32, #tpu.memory_space<vmem>>, vector<1x1x16xf32>
    %587 = vector.shape_cast %586 : vector<1x1x16xf32> to vector<1x16xf32>
    %588 = vector.shape_cast %585 : vector<1x16xf32> to vector<1x1x16xf32>
    tpu.vector_store %arg9[%c0_230, %c20, %c0_231], %588 {strides = array<i32>} : memref<1x32x16xf32, #tpu.memory_space<vmem>>, vector<1x1x16xf32>,
    %589 = vector.extract_strided_slice %496 {offsets = [5, 0], sizes = [1, 16], strides = [1, 1]} : vector<8x16xf32> to vector<1x16xf32>
    %cst_232 = arith.constant 8.000000e-01 : f32
    %590 = vector.broadcast %cst_232 : f32 to vector<1x16xf32>
    %591 = arith.mulf %581, %590 : vector<1x16xf32>
    %592 = arith.addf %591, %589 : vector<1x16xf32>
    %cst_233 = arith.constant 1.000000e+00 : f32
    %593 = vector.broadcast %cst_233 : f32 to vector<1x16xf32>
    %594 = arith.cmpf ogt, %592, %593 : vector<1x16xf32>
    %595 = arith.extui %594 : vector<1x16xi1> to vector<1x16xi32>
    %596 = arith.sitofp %595 : vector<1x16xi32> to vector<1x16xf32>
    %cst_234 = arith.constant 1.000000e+00 : f32
    %597 = vector.broadcast %cst_234 : f32 to vector<1x16xf32>
    %598 = arith.subf %597, %596 : vector<1x16xf32>
    %599 = arith.mulf %592, %598 : vector<1x16xf32>
    %600 = arith.subf %596, %585 : vector<1x16xf32>
    %cst_235 = arith.constant 0.333333343 : f32
    %601 = vector.broadcast %cst_235 : f32 to vector<1x16xf32>
    %602 = arith.mulf %600, %601 : vector<1x16xf32>
    %603 = arith.addf %585, %602 : vector<1x16xf32>
    %c0_236 = arith.constant 0 : index
    %c21 = arith.constant 21 : index
    %c0_237 = arith.constant 0 : index
    %604 = vector.load %arg9[%c0_236, %c21, %c0_237] : memref<1x32x16xf32, #tpu.memory_space<vmem>>, vector<1x1x16xf32>
    %605 = vector.shape_cast %604 : vector<1x1x16xf32> to vector<1x16xf32>
    %606 = vector.shape_cast %603 : vector<1x16xf32> to vector<1x1x16xf32>
    tpu.vector_store %arg9[%c0_236, %c21, %c0_237], %606 {strides = array<i32>} : memref<1x32x16xf32, #tpu.memory_space<vmem>>, vector<1x1x16xf32>,
    %607 = vector.extract_strided_slice %496 {offsets = [6, 0], sizes = [1, 16], strides = [1, 1]} : vector<8x16xf32> to vector<1x16xf32>
    %cst_238 = arith.constant 8.000000e-01 : f32
    %608 = vector.broadcast %cst_238 : f32 to vector<1x16xf32>
    %609 = arith.mulf %599, %608 : vector<1x16xf32>
    %610 = arith.addf %609, %607 : vector<1x16xf32>
    %cst_239 = arith.constant 1.000000e+00 : f32
    %611 = vector.broadcast %cst_239 : f32 to vector<1x16xf32>
    %612 = arith.cmpf ogt, %610, %611 : vector<1x16xf32>
    %613 = arith.extui %612 : vector<1x16xi1> to vector<1x16xi32>
    %614 = arith.sitofp %613 : vector<1x16xi32> to vector<1x16xf32>
    %cst_240 = arith.constant 1.000000e+00 : f32
    %615 = vector.broadcast %cst_240 : f32 to vector<1x16xf32>
    %616 = arith.subf %615, %614 : vector<1x16xf32>
    %617 = arith.mulf %610, %616 : vector<1x16xf32>
    %618 = arith.subf %614, %603 : vector<1x16xf32>
    %cst_241 = arith.constant 0.333333343 : f32
    %619 = vector.broadcast %cst_241 : f32 to vector<1x16xf32>
    %620 = arith.mulf %618, %619 : vector<1x16xf32>
    %621 = arith.addf %603, %620 : vector<1x16xf32>
    %c0_242 = arith.constant 0 : index
    %c22 = arith.constant 22 : index
    %c0_243 = arith.constant 0 : index
    %622 = vector.load %arg9[%c0_242, %c22, %c0_243] : memref<1x32x16xf32, #tpu.memory_space<vmem>>, vector<1x1x16xf32>
    %623 = vector.shape_cast %622 : vector<1x1x16xf32> to vector<1x16xf32>
    %624 = vector.shape_cast %621 : vector<1x16xf32> to vector<1x1x16xf32>
    tpu.vector_store %arg9[%c0_242, %c22, %c0_243], %624 {strides = array<i32>} : memref<1x32x16xf32, #tpu.memory_space<vmem>>, vector<1x1x16xf32>,
    %625 = vector.extract_strided_slice %496 {offsets = [7, 0], sizes = [1, 16], strides = [1, 1]} : vector<8x16xf32> to vector<1x16xf32>
    %cst_244 = arith.constant 8.000000e-01 : f32
    %626 = vector.broadcast %cst_244 : f32 to vector<1x16xf32>
    %627 = arith.mulf %617, %626 : vector<1x16xf32>
    %628 = arith.addf %627, %625 : vector<1x16xf32>
    %cst_245 = arith.constant 1.000000e+00 : f32
    %629 = vector.broadcast %cst_245 : f32 to vector<1x16xf32>
    %630 = arith.cmpf ogt, %628, %629 : vector<1x16xf32>
    %631 = arith.extui %630 : vector<1x16xi1> to vector<1x16xi32>
    %632 = arith.sitofp %631 : vector<1x16xi32> to vector<1x16xf32>
    %633 = arith.subf %632, %621 : vector<1x16xf32>
    %cst_246 = arith.constant 0.333333343 : f32
    %634 = vector.broadcast %cst_246 : f32 to vector<1x16xf32>
    %635 = arith.mulf %633, %634 : vector<1x16xf32>
    %636 = arith.addf %621, %635 : vector<1x16xf32>
    %c0_247 = arith.constant 0 : index
    %c23 = arith.constant 23 : index
    %c0_248 = arith.constant 0 : index
    %637 = vector.load %arg9[%c0_247, %c23, %c0_248] : memref<1x32x16xf32, #tpu.memory_space<vmem>>, vector<1x1x16xf32>
    %638 = vector.shape_cast %637 : vector<1x1x16xf32> to vector<1x16xf32>
    %639 = vector.shape_cast %636 : vector<1x16xf32> to vector<1x1x16xf32>
    tpu.vector_store %arg9[%c0_247, %c23, %c0_248], %639 {strides = array<i32>} : memref<1x32x16xf32, #tpu.memory_space<vmem>>, vector<1x1x16xf32>,
    %c0_249 = arith.constant 0 : index
    %c768 = arith.constant 768 : index
    %640 = vector.load %arg11[%c0_249, %c768] : memref<64x1024xf32, #tpu.memory_space<vmem>>, vector<64x256xf32>
    %cst_250 = arith.constant dense<0.000000e+00> : vector<64x128xf32>
    %641 = tpu.matmul %640, %185, %cst_250 {dimension_numbers = #tpu.dot_dimension_numbers<[1], [0], [0], [1], [0, 0, 1, 1], [], []>} : vector<64x256xf32>, vector<256x128xf32>, vector<64x128xf32> -> vector<64x128xf32>
    %642 = arith.mulf %641, %186 : vector<64x128xf32>
    %cst_251 = arith.constant dense<0.000000e+00> : vector<8x128xf32>
    %643 = tpu.matmul %187, %642, %cst_251 {dimension_numbers = #tpu.dot_dimension_numbers<[1], [0], [0], [1], [0, 0, 1, 1], [], []>} : vector<8x64xf32>, vector<64x128xf32>, vector<8x128xf32> -> vector<8x128xf32>
    %cst_252 = arith.constant dense<0.000000e+00> : vector<8x16xf32>
    %644 = tpu.matmul %643, %188, %cst_252 {dimension_numbers = #tpu.dot_dimension_numbers<[1], [0], [0], [1], [0, 0, 1, 1], [], []>} : vector<8x128xf32>, vector<128x16xf32>, vector<8x16xf32> -> vector<8x16xf32>
    %645 = vector.broadcast %189 : vector<1x16xf32> to vector<8x16xf32>
    %646 = arith.addf %644, %645 : vector<8x16xf32>
    %cst_253 = arith.constant 0.000000e+00 : f32
    %647 = vector.broadcast %cst_253 : f32 to vector<1x16xf32>
    %cst_254 = arith.constant 0.000000e+00 : f32
    %648 = vector.broadcast %cst_254 : f32 to vector<1x16xf32>
    %649 = vector.extract_strided_slice %646 {offsets = [0, 0], sizes = [1, 16], strides = [1, 1]} : vector<8x16xf32> to vector<1x16xf32>
    %cst_255 = arith.constant 8.000000e-01 : f32
    %650 = vector.broadcast %cst_255 : f32 to vector<1x16xf32>
    %651 = arith.mulf %647, %650 : vector<1x16xf32>
    %652 = arith.addf %651, %649 : vector<1x16xf32>
    %cst_256 = arith.constant 1.000000e+00 : f32
    %653 = vector.broadcast %cst_256 : f32 to vector<1x16xf32>
    %654 = arith.cmpf ogt, %652, %653 : vector<1x16xf32>
    %655 = arith.extui %654 : vector<1x16xi1> to vector<1x16xi32>
    %656 = arith.sitofp %655 : vector<1x16xi32> to vector<1x16xf32>
    %cst_257 = arith.constant 1.000000e+00 : f32
    %657 = vector.broadcast %cst_257 : f32 to vector<1x16xf32>
    %658 = arith.subf %657, %656 : vector<1x16xf32>
    %659 = arith.mulf %652, %658 : vector<1x16xf32>
    %660 = arith.subf %656, %648 : vector<1x16xf32>
    %cst_258 = arith.constant 0.333333343 : f32
    %661 = vector.broadcast %cst_258 : f32 to vector<1x16xf32>
    %662 = arith.mulf %660, %661 : vector<1x16xf32>
    %663 = arith.addf %648, %662 : vector<1x16xf32>
    %c0_259 = arith.constant 0 : index
    %c24_260 = arith.constant 24 : index
    %c0_261 = arith.constant 0 : index
    %664 = vector.load %arg9[%c0_259, %c24_260, %c0_261] : memref<1x32x16xf32, #tpu.memory_space<vmem>>, vector<1x1x16xf32>
    %665 = vector.shape_cast %664 : vector<1x1x16xf32> to vector<1x16xf32>
    %666 = vector.shape_cast %663 : vector<1x16xf32> to vector<1x1x16xf32>
    tpu.vector_store %arg9[%c0_259, %c24_260, %c0_261], %666 {strides = array<i32>} : memref<1x32x16xf32, #tpu.memory_space<vmem>>, vector<1x1x16xf32>,
    %667 = vector.extract_strided_slice %646 {offsets = [1, 0], sizes = [1, 16], strides = [1, 1]} : vector<8x16xf32> to vector<1x16xf32>
    %cst_262 = arith.constant 8.000000e-01 : f32
    %668 = vector.broadcast %cst_262 : f32 to vector<1x16xf32>
    %669 = arith.mulf %659, %668 : vector<1x16xf32>
    %670 = arith.addf %669, %667 : vector<1x16xf32>
    %cst_263 = arith.constant 1.000000e+00 : f32
    %671 = vector.broadcast %cst_263 : f32 to vector<1x16xf32>
    %672 = arith.cmpf ogt, %670, %671 : vector<1x16xf32>
    %673 = arith.extui %672 : vector<1x16xi1> to vector<1x16xi32>
    %674 = arith.sitofp %673 : vector<1x16xi32> to vector<1x16xf32>
    %cst_264 = arith.constant 1.000000e+00 : f32
    %675 = vector.broadcast %cst_264 : f32 to vector<1x16xf32>
    %676 = arith.subf %675, %674 : vector<1x16xf32>
    %677 = arith.mulf %670, %676 : vector<1x16xf32>
    %678 = arith.subf %674, %663 : vector<1x16xf32>
    %cst_265 = arith.constant 0.333333343 : f32
    %679 = vector.broadcast %cst_265 : f32 to vector<1x16xf32>
    %680 = arith.mulf %678, %679 : vector<1x16xf32>
    %681 = arith.addf %663, %680 : vector<1x16xf32>
    %c0_266 = arith.constant 0 : index
    %c25 = arith.constant 25 : index
    %c0_267 = arith.constant 0 : index
    %682 = vector.load %arg9[%c0_266, %c25, %c0_267] : memref<1x32x16xf32, #tpu.memory_space<vmem>>, vector<1x1x16xf32>
    %683 = vector.shape_cast %682 : vector<1x1x16xf32> to vector<1x16xf32>
    %684 = vector.shape_cast %681 : vector<1x16xf32> to vector<1x1x16xf32>
    tpu.vector_store %arg9[%c0_266, %c25, %c0_267], %684 {strides = array<i32>} : memref<1x32x16xf32, #tpu.memory_space<vmem>>, vector<1x1x16xf32>,
    %685 = vector.extract_strided_slice %646 {offsets = [2, 0], sizes = [1, 16], strides = [1, 1]} : vector<8x16xf32> to vector<1x16xf32>
    %cst_268 = arith.constant 8.000000e-01 : f32
    %686 = vector.broadcast %cst_268 : f32 to vector<1x16xf32>
    %687 = arith.mulf %677, %686 : vector<1x16xf32>
    %688 = arith.addf %687, %685 : vector<1x16xf32>
    %cst_269 = arith.constant 1.000000e+00 : f32
    %689 = vector.broadcast %cst_269 : f32 to vector<1x16xf32>
    %690 = arith.cmpf ogt, %688, %689 : vector<1x16xf32>
    %691 = arith.extui %690 : vector<1x16xi1> to vector<1x16xi32>
    %692 = arith.sitofp %691 : vector<1x16xi32> to vector<1x16xf32>
    %cst_270 = arith.constant 1.000000e+00 : f32
    %693 = vector.broadcast %cst_270 : f32 to vector<1x16xf32>
    %694 = arith.subf %693, %692 : vector<1x16xf32>
    %695 = arith.mulf %688, %694 : vector<1x16xf32>
    %696 = arith.subf %692, %681 : vector<1x16xf32>
    %cst_271 = arith.constant 0.333333343 : f32
    %697 = vector.broadcast %cst_271 : f32 to vector<1x16xf32>
    %698 = arith.mulf %696, %697 : vector<1x16xf32>
    %699 = arith.addf %681, %698 : vector<1x16xf32>
    %c0_272 = arith.constant 0 : index
    %c26 = arith.constant 26 : index
    %c0_273 = arith.constant 0 : index
    %700 = vector.load %arg9[%c0_272, %c26, %c0_273] : memref<1x32x16xf32, #tpu.memory_space<vmem>>, vector<1x1x16xf32>
    %701 = vector.shape_cast %700 : vector<1x1x16xf32> to vector<1x16xf32>
    %702 = vector.shape_cast %699 : vector<1x16xf32> to vector<1x1x16xf32>
    tpu.vector_store %arg9[%c0_272, %c26, %c0_273], %702 {strides = array<i32>} : memref<1x32x16xf32, #tpu.memory_space<vmem>>, vector<1x1x16xf32>,
    %703 = vector.extract_strided_slice %646 {offsets = [3, 0], sizes = [1, 16], strides = [1, 1]} : vector<8x16xf32> to vector<1x16xf32>
    %cst_274 = arith.constant 8.000000e-01 : f32
    %704 = vector.broadcast %cst_274 : f32 to vector<1x16xf32>
    %705 = arith.mulf %695, %704 : vector<1x16xf32>
    %706 = arith.addf %705, %703 : vector<1x16xf32>
    %cst_275 = arith.constant 1.000000e+00 : f32
    %707 = vector.broadcast %cst_275 : f32 to vector<1x16xf32>
    %708 = arith.cmpf ogt, %706, %707 : vector<1x16xf32>
    %709 = arith.extui %708 : vector<1x16xi1> to vector<1x16xi32>
    %710 = arith.sitofp %709 : vector<1x16xi32> to vector<1x16xf32>
    %cst_276 = arith.constant 1.000000e+00 : f32
    %711 = vector.broadcast %cst_276 : f32 to vector<1x16xf32>
    %712 = arith.subf %711, %710 : vector<1x16xf32>
    %713 = arith.mulf %706, %712 : vector<1x16xf32>
    %714 = arith.subf %710, %699 : vector<1x16xf32>
    %cst_277 = arith.constant 0.333333343 : f32
    %715 = vector.broadcast %cst_277 : f32 to vector<1x16xf32>
    %716 = arith.mulf %714, %715 : vector<1x16xf32>
    %717 = arith.addf %699, %716 : vector<1x16xf32>
    %c0_278 = arith.constant 0 : index
    %c27 = arith.constant 27 : index
    %c0_279 = arith.constant 0 : index
    %718 = vector.load %arg9[%c0_278, %c27, %c0_279] : memref<1x32x16xf32, #tpu.memory_space<vmem>>, vector<1x1x16xf32>
    %719 = vector.shape_cast %718 : vector<1x1x16xf32> to vector<1x16xf32>
    %720 = vector.shape_cast %717 : vector<1x16xf32> to vector<1x1x16xf32>
    tpu.vector_store %arg9[%c0_278, %c27, %c0_279], %720 {strides = array<i32>} : memref<1x32x16xf32, #tpu.memory_space<vmem>>, vector<1x1x16xf32>,
    %721 = vector.extract_strided_slice %646 {offsets = [4, 0], sizes = [1, 16], strides = [1, 1]} : vector<8x16xf32> to vector<1x16xf32>
    %cst_280 = arith.constant 8.000000e-01 : f32
    %722 = vector.broadcast %cst_280 : f32 to vector<1x16xf32>
    %723 = arith.mulf %713, %722 : vector<1x16xf32>
    %724 = arith.addf %723, %721 : vector<1x16xf32>
    %cst_281 = arith.constant 1.000000e+00 : f32
    %725 = vector.broadcast %cst_281 : f32 to vector<1x16xf32>
    %726 = arith.cmpf ogt, %724, %725 : vector<1x16xf32>
    %727 = arith.extui %726 : vector<1x16xi1> to vector<1x16xi32>
    %728 = arith.sitofp %727 : vector<1x16xi32> to vector<1x16xf32>
    %cst_282 = arith.constant 1.000000e+00 : f32
    %729 = vector.broadcast %cst_282 : f32 to vector<1x16xf32>
    %730 = arith.subf %729, %728 : vector<1x16xf32>
    %731 = arith.mulf %724, %730 : vector<1x16xf32>
    %732 = arith.subf %728, %717 : vector<1x16xf32>
    %cst_283 = arith.constant 0.333333343 : f32
    %733 = vector.broadcast %cst_283 : f32 to vector<1x16xf32>
    %734 = arith.mulf %732, %733 : vector<1x16xf32>
    %735 = arith.addf %717, %734 : vector<1x16xf32>
    %c0_284 = arith.constant 0 : index
    %c28 = arith.constant 28 : index
    %c0_285 = arith.constant 0 : index
    %736 = vector.load %arg9[%c0_284, %c28, %c0_285] : memref<1x32x16xf32, #tpu.memory_space<vmem>>, vector<1x1x16xf32>
    %737 = vector.shape_cast %736 : vector<1x1x16xf32> to vector<1x16xf32>
    %738 = vector.shape_cast %735 : vector<1x16xf32> to vector<1x1x16xf32>
    tpu.vector_store %arg9[%c0_284, %c28, %c0_285], %738 {strides = array<i32>} : memref<1x32x16xf32, #tpu.memory_space<vmem>>, vector<1x1x16xf32>,
    %739 = vector.extract_strided_slice %646 {offsets = [5, 0], sizes = [1, 16], strides = [1, 1]} : vector<8x16xf32> to vector<1x16xf32>
    %cst_286 = arith.constant 8.000000e-01 : f32
    %740 = vector.broadcast %cst_286 : f32 to vector<1x16xf32>
    %741 = arith.mulf %731, %740 : vector<1x16xf32>
    %742 = arith.addf %741, %739 : vector<1x16xf32>
    %cst_287 = arith.constant 1.000000e+00 : f32
    %743 = vector.broadcast %cst_287 : f32 to vector<1x16xf32>
    %744 = arith.cmpf ogt, %742, %743 : vector<1x16xf32>
    %745 = arith.extui %744 : vector<1x16xi1> to vector<1x16xi32>
    %746 = arith.sitofp %745 : vector<1x16xi32> to vector<1x16xf32>
    %cst_288 = arith.constant 1.000000e+00 : f32
    %747 = vector.broadcast %cst_288 : f32 to vector<1x16xf32>
    %748 = arith.subf %747, %746 : vector<1x16xf32>
    %749 = arith.mulf %742, %748 : vector<1x16xf32>
    %750 = arith.subf %746, %735 : vector<1x16xf32>
    %cst_289 = arith.constant 0.333333343 : f32
    %751 = vector.broadcast %cst_289 : f32 to vector<1x16xf32>
    %752 = arith.mulf %750, %751 : vector<1x16xf32>
    %753 = arith.addf %735, %752 : vector<1x16xf32>
    %c0_290 = arith.constant 0 : index
    %c29 = arith.constant 29 : index
    %c0_291 = arith.constant 0 : index
    %754 = vector.load %arg9[%c0_290, %c29, %c0_291] : memref<1x32x16xf32, #tpu.memory_space<vmem>>, vector<1x1x16xf32>
    %755 = vector.shape_cast %754 : vector<1x1x16xf32> to vector<1x16xf32>
    %756 = vector.shape_cast %753 : vector<1x16xf32> to vector<1x1x16xf32>
    tpu.vector_store %arg9[%c0_290, %c29, %c0_291], %756 {strides = array<i32>} : memref<1x32x16xf32, #tpu.memory_space<vmem>>, vector<1x1x16xf32>,
    %757 = vector.extract_strided_slice %646 {offsets = [6, 0], sizes = [1, 16], strides = [1, 1]} : vector<8x16xf32> to vector<1x16xf32>
    %cst_292 = arith.constant 8.000000e-01 : f32
    %758 = vector.broadcast %cst_292 : f32 to vector<1x16xf32>
    %759 = arith.mulf %749, %758 : vector<1x16xf32>
    %760 = arith.addf %759, %757 : vector<1x16xf32>
    %cst_293 = arith.constant 1.000000e+00 : f32
    %761 = vector.broadcast %cst_293 : f32 to vector<1x16xf32>
    %762 = arith.cmpf ogt, %760, %761 : vector<1x16xf32>
    %763 = arith.extui %762 : vector<1x16xi1> to vector<1x16xi32>
    %764 = arith.sitofp %763 : vector<1x16xi32> to vector<1x16xf32>
    %cst_294 = arith.constant 1.000000e+00 : f32
    %765 = vector.broadcast %cst_294 : f32 to vector<1x16xf32>
    %766 = arith.subf %765, %764 : vector<1x16xf32>
    %767 = arith.mulf %760, %766 : vector<1x16xf32>
    %768 = arith.subf %764, %753 : vector<1x16xf32>
    %cst_295 = arith.constant 0.333333343 : f32
    %769 = vector.broadcast %cst_295 : f32 to vector<1x16xf32>
    %770 = arith.mulf %768, %769 : vector<1x16xf32>
    %771 = arith.addf %753, %770 : vector<1x16xf32>
    %c0_296 = arith.constant 0 : index
    %c30 = arith.constant 30 : index
    %c0_297 = arith.constant 0 : index
    %772 = vector.load %arg9[%c0_296, %c30, %c0_297] : memref<1x32x16xf32, #tpu.memory_space<vmem>>, vector<1x1x16xf32>
    %773 = vector.shape_cast %772 : vector<1x1x16xf32> to vector<1x16xf32>
    %774 = vector.shape_cast %771 : vector<1x16xf32> to vector<1x1x16xf32>
    tpu.vector_store %arg9[%c0_296, %c30, %c0_297], %774 {strides = array<i32>} : memref<1x32x16xf32, #tpu.memory_space<vmem>>, vector<1x1x16xf32>,
    %775 = vector.extract_strided_slice %646 {offsets = [7, 0], sizes = [1, 16], strides = [1, 1]} : vector<8x16xf32> to vector<1x16xf32>
    %cst_298 = arith.constant 8.000000e-01 : f32
    %776 = vector.broadcast %cst_298 : f32 to vector<1x16xf32>
    %777 = arith.mulf %767, %776 : vector<1x16xf32>
    %778 = arith.addf %777, %775 : vector<1x16xf32>
    %cst_299 = arith.constant 1.000000e+00 : f32
    %779 = vector.broadcast %cst_299 : f32 to vector<1x16xf32>
    %780 = arith.cmpf ogt, %778, %779 : vector<1x16xf32>
    %781 = arith.extui %780 : vector<1x16xi1> to vector<1x16xi32>
    %782 = arith.sitofp %781 : vector<1x16xi32> to vector<1x16xf32>
    %783 = arith.subf %782, %771 : vector<1x16xf32>
    %cst_300 = arith.constant 0.333333343 : f32
    %784 = vector.broadcast %cst_300 : f32 to vector<1x16xf32>
    %785 = arith.mulf %783, %784 : vector<1x16xf32>
    %786 = arith.addf %771, %785 : vector<1x16xf32>
    %c0_301 = arith.constant 0 : index
    %c31 = arith.constant 31 : index
    %c0_302 = arith.constant 0 : index
    %787 = vector.load %arg9[%c0_301, %c31, %c0_302] : memref<1x32x16xf32, #tpu.memory_space<vmem>>, vector<1x1x16xf32>
    %788 = vector.shape_cast %787 : vector<1x1x16xf32> to vector<1x16xf32>
    %789 = vector.shape_cast %786 : vector<1x16xf32> to vector<1x1x16xf32>
    tpu.vector_store %arg9[%c0_301, %c31, %c0_302], %789 {strides = array<i32>} : memref<1x32x16xf32, #tpu.memory_space<vmem>>, vector<1x1x16xf32>,
    return
  }
  func.func @transform_0(%arg0: i32) -> (i32, i32, i32) {
    %c0_i32 = arith.constant 0 : i32
    %c0_i32_0 = arith.constant 0 : i32
    %c0_i32_1 = arith.constant 0 : i32
    return %arg0, %c0_i32, %c0_i32_0 : i32, i32, i32
  }
  func.func @transform_1(%arg0: i32) -> (i32, i32) {
    %c0_i32 = arith.constant 0 : i32
    %c0_i32_0 = arith.constant 0 : i32
    %c0_i32_1 = arith.constant 0 : i32
    return %c0_i32, %c0_i32_0 : i32, i32
  }
  func.func @transform_2(%arg0: i32) -> (i32, i32) {
    %c0_i32 = arith.constant 0 : i32
    %c0_i32_0 = arith.constant 0 : i32
    %c0_i32_1 = arith.constant 0 : i32
    return %c0_i32, %c0_i32_0 : i32, i32
  }
  func.func @transform_3(%arg0: i32) -> (i32, i32) {
    %c0_i32 = arith.constant 0 : i32
    %c0_i32_0 = arith.constant 0 : i32
    %c0_i32_1 = arith.constant 0 : i32
    return %c0_i32, %c0_i32_0 : i32, i32
  }
  func.func @transform_4(%arg0: i32) -> (i32, i32) {
    %c0_i32 = arith.constant 0 : i32
    %c0_i32_0 = arith.constant 0 : i32
    %c0_i32_1 = arith.constant 0 : i32
    return %c0_i32, %c0_i32_0 : i32, i32
  }
  func.func @transform_5(%arg0: i32) -> (i32, i32) {
    %c0_i32 = arith.constant 0 : i32
    %c0_i32_0 = arith.constant 0 : i32
    %c0_i32_1 = arith.constant 0 : i32
    return %c0_i32, %c0_i32_0 : i32, i32
  }
  func.func @transform_6(%arg0: i32) -> (i32, i32) {
    %c0_i32 = arith.constant 0 : i32
    %c0_i32_0 = arith.constant 0 : i32
    %c0_i32_1 = arith.constant 0 : i32
    return %c0_i32, %c0_i32_0 : i32, i32
  }
  func.func @transform_7(%arg0: i32) -> (i32, i32) {
    %c0_i32 = arith.constant 0 : i32
    %c0_i32_0 = arith.constant 0 : i32
    %c0_i32_1 = arith.constant 0 : i32
    return %c0_i32, %c0_i32_0 : i32, i32
  }
  func.func @transform_8(%arg0: i32) -> (i32, i32, i32) {
    %c0_i32 = arith.constant 0 : i32
    %c0_i32_0 = arith.constant 0 : i32
    %c0_i32_1 = arith.constant 0 : i32
    return %arg0, %c0_i32, %c0_i32_0 : i32, i32, i32
  }
}

</mosaic_0001>

<bundles_post_ra>
// kernel: network_forward.1
= control target key start
LH: loop header
LB: loop body
LE: loop exit
PB: predicated region body
PF: predicated region fallthrough
CT: control target
= control target key end

     0   :  { %s4784_s27 = smov 0   ;;  %s7372_s0 = inlined_call_operand.vmem [shape: bf16[2,36,8192], index: 0, kind: input, shape index: {}]   ;;  %s7373_s1 = inlined_call_operand.vmem [shape: f32[8,36], index: 1, kind: input, shape index: {}]   ;;  %s7374_s2 = inlined_call_operand.vmem [shape: f32[8,1], index: 2, kind: input, shape index: {}]   ;;  %s7375_s3 = inlined_call_operand.vmem [shape: f32[256,128], index: 3, kind: input, shape index: {}]   ;;  %s7376_s4 = inlined_call_operand.vmem [shape: f32[64,128], index: 4, kind: input, shape index: {}]   ;;  %s7377_s5 = inlined_call_operand.vmem [shape: f32[8,64], index: 5, kind: input, shape index: {}]   ;;  %s7378_s6 = inlined_call_operand.vmem [shape: f32[128,16], index: 6, kind: input, shape index: {}]   ;;  %s7379_s7 = inlined_call_operand.vmem [shape: f32[1,16], index: 7, kind: input, shape index: {}]   ;;  %s7380_s8 = inlined_call_operand.vmem [shape: f32[2,32,16], index: 8, kind: output, shape index: {}]  }
   0x1 LB: > { %s4419_s28 = sadd.s32 4294967295, %s4735_s27   ;;  %p4423_p0 = scmp.ge.s32.totalorder %s4735_s27, 1  ;;  %s4735_s27 = sphi %s4784_s27, %s18_s27  }
   0x2   : > { %p262_p1 = scmp.lt.s32.totalorder %s4735_s27, 3 }
   0x4   : > { %p263_p2 = pnand %p4423_p0, %p262_p1 }
   0x6   : > { %266 = sbr.rel (%p263_p2) target bundleno = 1653 (0x675), region = 52 }
   0xb   : > { %p296_p3 = scmp.lt.s32.totalorder %s4419_s28, 1  ;;  %vm791_vm0 = vcmask 1043456   ;;  %v4869_v44 = vld [vmem:[%s7373_s1] sm:$0xff]  ;;  %vm787_vm1 = vcmask 293888  }
   0xd   : > { %s7484_s28 = smov (!%p296_p3, %s4419_s28), 1 }
   0xe   : > { %s4658_s29 = smul.u32 1280, %s7484_s28  ;;  %s4657_s17 = sshll.u32 %s7484_s28, 5 }
   0xf   : > { %s7050_s20 = scalar_lea.vmem %s7380_s8, %s4657_s17 }
  0x10   : > { %s4798_s10 = scalar_lea.vmem %s7372_s0, %s4658_s29 }
  0x11   : > { %v434_v0 = vld [vmem:[%s4798_s10 + $0x400] sm:$0x33]  ;;  %v4802_v1 = vld [vmem:[%s4798_s10 + $0x408] sm:$0x33]  ;;  %v4805_v2 = vld [vmem:[%s4798_s10 + $0x410] sm:$0x33] }
  0x12   : > { %v722_v3 = vunpack.c.l.bf16 %v434_v0  ;;  %v723_v4 = vunpack.c.h.bf16 %v434_v0  ;;  %v724_v5 = vunpack.c.l.bf16 %v4802_v1  ;;  %v402_v6 = vld [vmem:[%s4798_s10 + $0x300] sm:$0xff]  ;;  %v4810_v7 = vld [vmem:[%s4798_s10 + $0x308] sm:$0xff]  ;;  %v4813_v8 = vld [vmem:[%s4798_s10 + $0x310] sm:$0xff]  ;;  %v727_v9 = vunpack.c.h.bf16 %v4805_v2 }
  0x13   : > { %v658_v10 = vunpack.c.l.bf16 %v402_v6  ;;  %v659_v11 = vunpack.c.h.bf16 %v402_v6  ;;  %v370_v12 = vld [vmem:[%s4798_s10 + $0x200] sm:$0xff]  ;;  %v4818_v13 = vld [vmem:[%s4798_s10 + $0x208] sm:$0xff]  ;;  %v4821_v14 = vld [vmem:[%s4798_s10 + $0x210] sm:$0xff]  ;;  %v660_v15 = vunpack.c.l.bf16 %v4810_v7  ;;  %v663_v16 = vunpack.c.h.bf16 %v4813_v8 }
  0x14   : > { %4427 = vmatpush.msk.msra.mxu0 %vm791_vm0, %v722_v3  ;;  %4429 = vmatpush.msk.msra.mxu3 %vm791_vm0, %v723_v4  ;;  %v594_v17 = vunpack.c.l.bf16 %v370_v12  ;;  %v595_v18 = vunpack.c.h.bf16 %v370_v12  ;;  %v338_v19 = vld [vmem:[%s4798_s10 + $0x100] sm:$0xff]  ;;  %v4829_v20 = vld [vmem:[%s4798_s10 + $0x108] sm:$0xff]  ;;  %v4832_v21 = vld [vmem:[%s4798_s10 + $0x110] sm:$0xff]  ;;  %v596_v22 = vunpack.c.l.bf16 %v4818_v13  ;;  %v599_v23 = vunpack.c.h.bf16 %v4821_v14 }
  0x15   : > { %4431 = vmatpush.msk.msra.mxu2 %vm791_vm0, %v724_v5  ;;  %4437 = vmatpush.msk.msra.mxu1 %vm791_vm0, %v727_v9  ;;  %v306_v24 = vld [vmem:[%s4798_s10] sm:$0xff]  ;;  %v530_v25 = vunpack.c.l.bf16 %v338_v19  ;;  %v531_v26 = vunpack.c.h.bf16 %v338_v19  ;;  %v4840_v27 = vld [vmem:[%s4798_s10 + $0x8] sm:$0xff]  ;;  %v4843_v28 = vld [vmem:[%s4798_s10 + $0x10] sm:$0xff]  ;;  %v532_v29 = vunpack.c.l.bf16 %v4829_v20  ;;  %v535_v30 = vunpack.c.h.bf16 %v4832_v21 }
  0x16   : > { %996 = vmatpush.msra.mxu0 %v658_v10  ;;  %1016 = vmatpush.msra.mxu3 %v659_v11  ;;  %v466_v31 = vunpack.c.l.bf16 %v306_v24  ;;  %v467_v32 = vunpack.c.h.bf16 %v306_v24  ;;  %v4848_v33 = vld [vmem:[%s4798_s10 + $0x418] sm:$0x33]  ;;  %v4851_v34 = vld [vmem:[%s4798_s10 + $0x420] sm:$0x33]  ;;  %v468_v35 = vunpack.c.l.bf16 %v4840_v27  ;;  %v471_v36 = vunpack.c.h.bf16 %v4843_v28  ;;  %v4911_v0 = vld [vmem:[%s4798_s10 + $0x428] sm:$0x33] }
  0x17   : > { %1036 = vmatpush.msra.mxu2 %v660_v15  ;;  %1096 = vmatpush.msra.mxu1 %v663_v16  ;;  %v725_v37 = vunpack.c.h.bf16 %v4802_v1  ;;  %v726_v38 = vunpack.c.l.bf16 %v4805_v2  ;;  %v728_v39 = vunpack.c.l.bf16 %v4848_v33  ;;  %v731_v40 = vunpack.c.h.bf16 %v4851_v34  ;;  %v4860_v41 = vld [vmem:[%s4798_s10 + $0x318] sm:$0xff]  ;;  %v4863_v42 = vld [vmem:[%s4798_s10 + $0x320] sm:$0xff]  ;;  %v4914_v1 = vld [vmem:[%s4798_s10 + $0x430] sm:$0x33] }
  0x18   : > { %997 = vmatpush.msra.mxu0 %v594_v17  ;;  %1017 = vmatpush.msra.mxu3 %v595_v18  ;;  %v661_v43 = vunpack.c.h.bf16 %v4810_v7  ;;  %v662_v45 = vunpack.c.l.bf16 %v4813_v8  ;;  %v4873_v46 = vld [vmem:[%s4798_s10 + $0x218] sm:$0xff]  ;;  %v4876_v47 = vld [vmem:[%s4798_s10 + $0x220] sm:$0xff]  ;;  %v664_v48 = vunpack.c.l.bf16 %v4860_v41  ;;  %v667_v49 = vunpack.c.h.bf16 %v4863_v42  ;;  %v4927_v8 = vld [vmem:[%s4798_s10 + $0x328] sm:$0xff] }
  0x19   : > { %1037 = vmatpush.msra.mxu2 %v596_v22  ;;  %1097 = vmatpush.msra.mxu1 %v599_v23  ;;  %v597_v50 = vunpack.c.h.bf16 %v4818_v13  ;;  %v598_v51 = vunpack.c.l.bf16 %v4821_v14  ;;  %v600_v52 = vunpack.c.l.bf16 %v4873_v46  ;;  %v603_v53 = vunpack.c.h.bf16 %v4876_v47  ;;  %v4891_v54 = vld [vmem:[%s4798_s10 + $0x118] sm:$0xff]  ;;  %v4894_v55 = vld [vmem:[%s4798_s10 + $0x120] sm:$0xff]  ;;  %v4930_v9 = vld [vmem:[%s4798_s10 + $0x330] sm:$0xff] }
  0x1a   : > { %998 = vmatpush.msra.mxu0 %v530_v25  ;;  %1018 = vmatpush.msra.mxu3 %v531_v26  ;;  %v533_v56 = vunpack.c.h.bf16 %v4829_v20  ;;  %v534_v57 = vunpack.c.l.bf16 %v4832_v21  ;;  %v4901_v58 = vld [vmem:[%s4798_s10 + $0x18] sm:$0xff]  ;;  %v4904_v59 = vld [vmem:[%s4798_s10 + $0x20] sm:$0xff]  ;;  %v536_v60 = vunpack.c.l.bf16 %v4891_v54  ;;  %v539_v61 = vunpack.c.h.bf16 %v4894_v55  ;;  %v4935_v12 = vld [vmem:[%s4798_s10 + $0x228] sm:$0xff] }
  0x1b   : > { %1038 = vmatpush.msra.mxu2 %v532_v29  ;;  %1098 = vmatpush.msra.mxu1 %v535_v30  ;;  %v469_v62 = vunpack.c.h.bf16 %v4840_v27  ;;  %v470_v63 = vunpack.c.l.bf16 %v4843_v28  ;;  %v472_v2 = vunpack.c.l.bf16 %v4901_v58  ;;  %v475_v3 = vunpack.c.h.bf16 %v4904_v59  ;;  %v4938_v13 = vld [vmem:[%s4798_s10 + $0x230] sm:$0xff]  ;;  %v4955_v20 = vld [vmem:[%s4798_s10 + $0x128] sm:$0xff] }
  0x1c   : > { %999 = vmatpush.msra.mxu0 %v466_v31  ;;  %1019 = vmatpush.msra.mxu3 %v467_v32  ;;  %v729_v4 = vunpack.c.h.bf16 %v4848_v33  ;;  %v730_v5 = vunpack.c.l.bf16 %v4851_v34  ;;  %v732_v6 = vunpack.c.l.bf16 %v4911_v0  ;;  %v735_v7 = vunpack.c.h.bf16 %v4914_v1  ;;  %v4958_v21 = vld [vmem:[%s4798_s10 + $0x130] sm:$0xff]  ;;  %v4963_v24 = vld [vmem:[%s4798_s10 + $0x28] sm:$0xff]  ;;  %v4979_v32 = vld [vmem:[%s4798_s10 + $0x438] sm:$0x33] }
  0x1d   : > { %1039 = vmatpush.msra.mxu2 %v468_v35  ;;  %1099 = vmatpush.msra.mxu1 %v471_v36  ;;  %v665_v10 = vunpack.c.h.bf16 %v4860_v41  ;;  %v666_v11 = vunpack.c.l.bf16 %v4863_v42  ;;  %v668_v14 = vunpack.c.l.bf16 %v4927_v8  ;;  %v671_v15 = vunpack.c.h.bf16 %v4930_v9  ;;  %v4968_v27 = vld [vmem:[%s4798_s10 + $0x30] sm:$0xff]  ;;  %v4982_v33 = vld [vmem:[%s4798_s10 + $0x440] sm:$0x33] }
  0x1e   : > { %4433 = vmatpush.msk.msrb.mxu3 %vm791_vm0, %v725_v37  ;;  %4435 = vmatpush.msk.msrb.mxu0 %vm791_vm0, %v726_v38  ;;  %v601_v16 = vunpack.c.h.bf16 %v4873_v46  ;;  %v602_v17 = vunpack.c.l.bf16 %v4876_v47  ;;  %v604_v18 = vunpack.c.l.bf16 %v4935_v12  ;;  %v607_v19 = vunpack.c.h.bf16 %v4938_v13  ;;  %v2328_v34 = vld [vmem:[%s7374_s2] sm:$0xff]  ;;  %v4990_v38 = vld [vmem:[%s4798_s10 + $0x338] sm:$0xff] }
  0x1f   : > { %4439 = vmatpush.msk.msrb.mxu2 %vm791_vm0, %v728_v39  ;;  %4445 = vmatpush.msk.msrb.mxu1 %vm791_vm0, %v731_v40  ;;  %v537_v22 = vunpack.c.h.bf16 %v4891_v54  ;;  %v538_v23 = vunpack.c.l.bf16 %v4894_v55  ;;  %v540_v25 = vunpack.c.l.bf16 %v4955_v20  ;;  %v543_v26 = vunpack.c.h.bf16 %v4958_v21  ;;  %v4993_v39 = vld [vmem:[%s4798_s10 + $0x340] sm:$0xff]  ;;  %v5005_v47 = vld [vmem:[%s4798_s10 + $0x238] sm:$0xff] }
  0x20   : > { %4428 = vmatmul.msk.f32.vlgmr.msra.gmra.mxu0 %vm787_vm1, %v4869_v44  ;;  %1056 = vmatpush.msrb.mxu3 %v661_v43  ;;  %v473_v28 = vunpack.c.h.bf16 %v4901_v58  ;;  %v474_v29 = vunpack.c.l.bf16 %v4904_v59  ;;  %v476_v30 = vunpack.c.l.bf16 %v4963_v24  ;;  %v479_v31 = vunpack.c.h.bf16 %v4968_v27  ;;  %v5031_v58 = vld [vmem:[%s4798_s10 + $0x40] sm:$0xff] }
  0x21   : > { %1076 = vmatpush.msrb.mxu0 %v662_v45  ;;  %4438 = vmatmul.msk.f32.vlgmr.msra.gmra.mxu1 %vm787_vm1, %v4869_v44  ;;  %v733_v35 = vunpack.c.h.bf16 %v4911_v0  ;;  %v4737_v36 = vmov 0   ;;  %v734_v37 = vunpack.c.l.bf16 %v4914_v1  ;;  %v736_v40 = vunpack.c.l.bf16 %v4979_v32  ;;  %v5044_v1 = vld [vmem:[%s4798_s10 + $0x448] sm:$0x33] }
  0x22   : > { %1116 = vmatpush.msrb.mxu2 %v664_v48  ;;  %1176 = vmatpush.msrb.mxu1 %v667_v49  ;;  %v739_v41 = vunpack.c.h.bf16 %v4982_v33  ;;  %v669_v42 = vunpack.c.h.bf16 %v4927_v8  ;;  %v670_v43 = vunpack.c.l.bf16 %v4930_v9  ;;  %v672_v45 = vunpack.c.l.bf16 %v4990_v38  ;;  %v5008_v48 = vld [vmem:[%s4798_s10 + $0x240] sm:$0xff] }
  0x23   : > { %1057 = vmatpush.msrb.mxu3 %v597_v50  ;;  %1077 = vmatpush.msrb.mxu0 %v598_v51  ;;  %v675_v46 = vunpack.c.h.bf16 %v4993_v39  ;;  %v605_v49 = vunpack.c.h.bf16 %v4935_v12  ;;  %v606_v50 = vunpack.c.l.bf16 %v4938_v13  ;;  %v5018_v51 = vld [vmem:[%s4798_s10 + $0x138] sm:$0xff]  ;;  %v611_v54 = vunpack.c.h.bf16 %v5008_v48  ;;  %v5067_v13 = vld [vmem:[%s4798_s10 + $0x248] sm:$0xff] }
  0x24   : > { %1117 = vmatpush.msrb.mxu2 %v600_v52  ;;  %1177 = vmatpush.msrb.mxu1 %v603_v53  ;;  %v5021_v52 = vld [vmem:[%s4798_s10 + $0x140] sm:$0xff]  ;;  %v608_v53 = vunpack.c.l.bf16 %v5005_v47  ;;  %v541_v55 = vunpack.c.h.bf16 %v4955_v20  ;;  %v544_v59 = vunpack.c.l.bf16 %v5018_v51  ;;  %v483_v0 = vunpack.c.h.bf16 %v5031_v58 }
  0x25   : > { %4430 = vmatmul.msk.f32.vlgmr.msra.gmra.mxu3 %vm787_vm1, %v4869_v44  ;;  %4432 = vmatmul.msk.f32.vlgmr.msra.gmra.mxu2 %vm787_vm1, %v4869_v44  ;;  %v673_v9 = vunpack.c.h.bf16 %v4990_v38  ;;  %v5119_v38 = vld [vmem:[%s4798_s10 + $0x360] sm:$0xff] }
  0x26   : > { %1058 = vmatpush.msrb.mxu3 %v533_v56  ;;  %1078 = vmatpush.msrb.mxu0 %v534_v57  ;;  %v542_v56 = vunpack.c.l.bf16 %v4958_v21  ;;  %v5028_v57 = vld [vmem:[%s4798_s10 + $0x38] sm:$0xff]  ;;  %v545_v21 = vunpack.c.h.bf16 %v5018_v51 }
  0x27   : > { %1118 = vmatpush.msrb.mxu2 %v536_v60  ;;  %1178 = vmatpush.msrb.mxu1 %v539_v61  ;;  %v547_v60 = vunpack.c.h.bf16 %v5021_v52  ;;  %v477_v61 = vunpack.c.h.bf16 %v4963_v24  ;;  %v5093_v24 = vld [vmem:[%s4798_s10 + $0x50] sm:$0xff] }
  0x28   : > { %1059 = vmatpush.msrb.mxu3 %v469_v62  ;;  %1079 = vmatpush.msrb.mxu0 %v470_v63  ;;  %v478_v62 = vunpack.c.l.bf16 %v4968_v27  ;;  %v480_v63 = vunpack.c.l.bf16 %v5028_v57  ;;  %v481_v27 = vunpack.c.h.bf16 %v5028_v57 }
  0x29   : > { %1119 = vmatpush.msrb.mxu2 %v472_v2  ;;  %1179 = vmatpush.msrb.mxu1 %v475_v3  ;;  %v5047_v2 = vld [vmem:[%s4798_s10 + $0x450] sm:$0x33]  ;;  %v737_v3 = vunpack.c.h.bf16 %v4979_v32  ;;  %v5109_v32 = vld [vmem:[%s4798_s10 + $0x460] sm:$0x33] }
  0x2a   : > { %4441 = vmatpush.msk.msra.mxu3 %vm791_vm0, %v729_v4  ;;  %4443 = vmatpush.msk.msra.mxu0 %vm791_vm0, %v730_v5  ;;  %v738_v4 = vunpack.c.l.bf16 %v4982_v33  ;;  %v5052_v5 = vld [vmem:[%s4798_s10 + $0x348] sm:$0xff]  ;;  %v743_v8 = vunpack.c.h.bf16 %v5047_v2  ;;  %v741_v33 = vunpack.c.h.bf16 %v5044_v1 }
  0x2b   : > { %4447 = vmatpush.msk.msra.mxu2 %vm791_vm0, %v732_v6  ;;  %4453 = vmatpush.msk.msra.mxu1 %vm791_vm0, %v735_v7  ;;  %v5055_v6 = vld [vmem:[%s4798_s10 + $0x350] sm:$0xff]  ;;  %v740_v7 = vunpack.c.l.bf16 %v5044_v1  ;;  %v746_v1 = vunpack.c.l.bf16 %v5109_v32 }
  0x2c   : > { %4436 = vmatmul.msk.f32.vlgmr.msrb.gmra.mxu0 %vm787_vm1, %v4869_v44  ;;  %4446 = vmatmul.msk.f32.vlgmr.msrb.gmra.mxu1 %vm787_vm1, %v4869_v44  ;;  %v679_v12 = vunpack.c.h.bf16 %v5055_v6 }
  0x2d   : > { %1136 = vmatpush.msra.mxu3 %v665_v10  ;;  %1156 = vmatpush.msra.mxu0 %v666_v11  ;;  %v674_v10 = vunpack.c.l.bf16 %v4993_v39  ;;  %v676_v11 = vunpack.c.l.bf16 %v5052_v5  ;;  %v677_v39 = vunpack.c.h.bf16 %v5052_v5  ;;  %v5181_v5 = vld [vmem:[%s4798_s10 + $0x370] sm:$0xff] }
  0x2e   : > { %1196 = vmatpush.msra.mxu2 %v668_v14  ;;  %1256 = vmatpush.msra.mxu1 %v671_v15  ;;  %v5070_v14 = vld [vmem:[%s4798_s10 + $0x250] sm:$0xff]  ;;  %v609_v15 = vunpack.c.h.bf16 %v5005_v47 }
  0x2f   : > { %1137 = vmatpush.msra.mxu3 %v601_v16  ;;  %1157 = vmatpush.msra.mxu0 %v602_v17  ;;  %v610_v16 = vunpack.c.l.bf16 %v5008_v48  ;;  %v5080_v17 = vld [vmem:[%s4798_s10 + $0x148] sm:$0xff]  ;;  %v615_v20 = vunpack.c.h.bf16 %v5070_v14  ;;  %v614_v47 = vunpack.c.l.bf16 %v5070_v14  ;;  %v5142_v48 = vld [vmem:[%s4798_s10 + $0x158] sm:$0xff] }
  0x30   : > { %1197 = vmatpush.msra.mxu2 %v604_v18  ;;  %1257 = vmatpush.msra.mxu1 %v607_v19  ;;  %v5083_v18 = vld [vmem:[%s4798_s10 + $0x150] sm:$0xff]  ;;  %v612_v19 = vunpack.c.l.bf16 %v5067_v13  ;;  %v5204_v14 = vld [vmem:[%s4798_s10 + $0x168] sm:$0xff] }
  0x31   : > { %4434 = vmatmul.msk.f32.vlgmr.msrb.gmra.mxu3 %vm787_vm1, %v4869_v44  ;;  %4440 = vmatmul.msk.f32.vlgmr.msrb.gmra.mxu2 %vm787_vm1, %v4869_v44 }
  0x32   : > { %1138 = vmatpush.msra.mxu3 %v537_v22  ;;  %1158 = vmatpush.msra.mxu0 %v538_v23  ;;  %v546_v22 = vunpack.c.l.bf16 %v5021_v52  ;;  %v5090_v23 = vld [vmem:[%s4798_s10 + $0x48] sm:$0xff]  ;;  %v549_v52 = vunpack.c.h.bf16 %v5080_v17 }
  0x33   : > { %1198 = vmatpush.msra.mxu2 %v540_v25  ;;  %1258 = vmatpush.msra.mxu1 %v543_v26  ;;  %v548_v25 = vunpack.c.l.bf16 %v5080_v17  ;;  %v551_v26 = vunpack.c.h.bf16 %v5083_v18 }
  0x34   : > { %4669 = vset.pattern.permute.xlu0 %v4737_v36  ;;  %1139 = vmatpush.msra.mxu3 %v473_v28  ;;  %v482_v28 = vunpack.c.l.bf16 %v5031_v58  ;;  %v747_v36 = vunpack.c.h.bf16 %v5109_v32  ;;  %v485_v58 = vunpack.c.h.bf16 %v5090_v23  ;;  %v5238_v32 = vld [vmem:[%s4798_s10 + $0x378] sm:$0xff] }
  0x35   : > { %1159 = vmatpush.msra.mxu0 %v474_v29  ;;  %1199 = vmatpush.msra.mxu2 %v476_v30  ;;  %v484_v29 = vunpack.c.l.bf16 %v5090_v23  ;;  %v487_v30 = vunpack.c.h.bf16 %v5093_v24 }
  0x36   : > { %1259 = vmatpush.msra.mxu1 %v479_v31  ;;  %2331 = vperm.xlu0 %4669, %v2328_v34   ;;  %v5106_v31 = vld [vmem:[%s4798_s10 + $0x458] sm:$0x33]  ;;  %v742_v34 = vunpack.c.l.bf16 %v5047_v2 }
  0x37   : > { %4444 = vmatmul.msk.f32.vlgmr.msra.gmra.mxu0 %vm787_vm1, %v4869_v44  ;;  %4449 = vmatpush.msk.msrb.mxu3 %vm791_vm0, %v733_v35  ;;  %v744_v35 = vunpack.c.l.bf16 %v5106_v31 }
  0x38   : > { %4451 = vmatpush.msk.msrb.mxu0 %vm791_vm0, %v734_v37  ;;  %4454 = vmatmul.msk.f32.vlgmr.msra.gmra.mxu1 %vm787_vm1, %v4869_v44  ;;  %v5116_v37 = vld [vmem:[%s4798_s10 + $0x358] sm:$0xff] }
  0x39   : > { %4455 = vmatpush.msk.msrb.mxu2 %vm791_vm0, %v736_v40  ;;  %4461 = vmatpush.msk.msrb.mxu1 %vm791_vm0, %v739_v41  ;;  %v678_v40 = vunpack.c.l.bf16 %v5055_v6  ;;  %v5127_v41 = vld [vmem:[%s4798_s10 + $0x258] sm:$0xff]  ;;  %v681_v6 = vunpack.c.h.bf16 %v5116_v37 }
  0x3a   : > { %1216 = vmatpush.msrb.mxu3 %v669_v42  ;;  %1236 = vmatpush.msrb.mxu0 %v670_v43  ;;  %v5130_v42 = vld [vmem:[%s4798_s10 + $0x260] sm:$0xff]  ;;  %v680_v43 = vunpack.c.l.bf16 %v5116_v37  ;;  %v686_v37 = vunpack.c.l.bf16 %v5181_v5 }
  0x3b   : > { %1276 = vmatpush.msrb.mxu2 %v672_v45  ;;  %1336 = vmatpush.msrb.mxu1 %v675_v46  ;;  %v683_v45 = vunpack.c.h.bf16 %v5119_v38  ;;  %v613_v46 = vunpack.c.h.bf16 %v5067_v13  ;;  %v619_v51 = vunpack.c.h.bf16 %v5130_v42  ;;  %v618_v13 = vunpack.c.l.bf16 %v5130_v42 }
  0x3c   : > { %4442 = vmatmul.msk.f32.vlgmr.msra.gmra.mxu3 %vm787_vm1, %v4869_v44  ;;  %4448 = vmatmul.msk.f32.vlgmr.msra.gmra.mxu2 %vm787_vm1, %v4869_v44 }
  0x3d   : > { %1217 = vmatpush.msrb.mxu3 %v605_v49  ;;  %1237 = vmatpush.msrb.mxu0 %v606_v50  ;;  %v5145_v49 = vld [vmem:[%s4798_s10 + $0x160] sm:$0xff]  ;;  %v616_v50 = vunpack.c.l.bf16 %v5127_v41 }
  0x3e   : > { %1277 = vmatpush.msrb.mxu2 %v608_v53  ;;  %1337 = vmatpush.msrb.mxu1 %v611_v54  ;;  %v550_v53 = vunpack.c.l.bf16 %v5083_v18  ;;  %v5156_v54 = vld [vmem:[%s4798_s10 + $0x58] sm:$0xff]  ;;  %v555_v57 = vunpack.c.h.bf16 %v5145_v49  ;;  %v553_v18 = vunpack.c.h.bf16 %v5142_v48 }
  0x3f   : > { %1218 = vmatpush.msrb.mxu3 %v541_v55  ;;  %1238 = vmatpush.msrb.mxu0 %v542_v56  ;;  %v5159_v55 = vld [vmem:[%s4798_s10 + $0x60] sm:$0xff]  ;;  %v552_v56 = vunpack.c.l.bf16 %v5142_v48 }
  0x40   : > { %1278 = vmatpush.msrb.mxu2 %v544_v59  ;;  %1338 = vmatpush.msrb.mxu1 %v547_v60  ;;  %v486_v59 = vunpack.c.l.bf16 %v5093_v24  ;;  %v488_v60 = vunpack.c.l.bf16 %v5156_v54  ;;  %v489_v24 = vunpack.c.h.bf16 %v5156_v54 }
  0x41   : > { %1219 = vmatpush.msrb.mxu3 %v477_v61  ;;  %1239 = vmatpush.msrb.mxu0 %v478_v62  ;;  %v491_v61 = vunpack.c.h.bf16 %v5159_v55  ;;  %v5168_v62 = vld [vmem:[%s4798_s10 + $0x468] sm:$0x33] }
  0x42   : > { %1279 = vmatpush.msrb.mxu2 %v480_v63  ;;  %1339 = vmatpush.msrb.mxu1 %v483_v0  ;;  %v5171_v63 = vld [vmem:[%s4798_s10 + $0x470] sm:$0x33]  ;;  %v745_v0 = vunpack.c.h.bf16 %v5106_v31  ;;  %v748_v2 = vunpack.c.l.bf16 %v5168_v62 }
  0x43   : > { %4452 = vmatmul.msk.f32.vlgmr.msrb.gmra.mxu0 %vm787_vm1, %v4869_v44  ;;  %4457 = vmatpush.msk.msra.mxu3 %vm791_vm0, %v737_v3  ;;  %v751_v3 = vunpack.c.h.bf16 %v5171_v63  ;;  %v750_v31 = vunpack.c.l.bf16 %v5171_v63  ;;  %v5300_v63 = vld [vmem:[%s4798_s10 + $0x388] sm:$0xff] }
  0x44   : > { %4459 = vmatpush.msk.msra.mxu0 %vm791_vm0, %v738_v4  ;;  %4462 = vmatmul.msk.f32.vlgmr.msrb.gmra.mxu1 %vm787_vm1, %v4869_v44  ;;  %v5178_v4 = vld [vmem:[%s4798_s10 + $0x368] sm:$0xff] }
  0x45   : > { %4463 = vmatpush.msk.msra.mxu2 %vm791_vm0, %v740_v7  ;;  %4469 = vmatpush.msk.msra.mxu1 %vm791_vm0, %v743_v8  ;;  %v682_v7 = vunpack.c.l.bf16 %v5119_v38  ;;  %v5189_v8 = vld [vmem:[%s4798_s10 + $0x268] sm:$0xff]  ;;  %v5252_v38 = vld [vmem:[%s4798_s10 + $0x278] sm:$0xff] }
  0x46   : > { %1296 = vmatpush.msra.mxu3 %v673_v9  ;;  %1316 = vmatpush.msra.mxu0 %v674_v10  ;;  %v5192_v9 = vld [vmem:[%s4798_s10 + $0x270] sm:$0xff]  ;;  %v684_v10 = vunpack.c.l.bf16 %v5178_v4  ;;  %v621_v42 = vunpack.c.h.bf16 %v5189_v8 }
  0x47   : > { %1356 = vmatpush.msra.mxu2 %v676_v11  ;;  %1416 = vmatpush.msra.mxu1 %v679_v12  ;;  %v687_v11 = vunpack.c.h.bf16 %v5181_v5  ;;  %v617_v12 = vunpack.c.h.bf16 %v5127_v41  ;;  %v623_v17 = vunpack.c.h.bf16 %v5192_v9  ;;  %v5314_v5 = vld [vmem:[%s4798_s10 + $0x288] sm:$0xff] }
  0x48   : > { %4450 = vmatmul.msk.f32.vlgmr.msrb.gmra.mxu3 %vm787_vm1, %v4869_v44  ;;  %4456 = vmatmul.msk.f32.vlgmr.msrb.gmra.mxu2 %vm787_vm1, %v4869_v44 }
  0x49   : > { %1297 = vmatpush.msra.mxu3 %v609_v15  ;;  %1317 = vmatpush.msra.mxu0 %v610_v16  ;;  %v5207_v15 = vld [vmem:[%s4798_s10 + $0x170] sm:$0xff]  ;;  %v620_v16 = vunpack.c.l.bf16 %v5189_v8 }
  0x4a   : > { %1357 = vmatpush.msra.mxu2 %v612_v19  ;;  %1417 = vmatpush.msra.mxu1 %v615_v20  ;;  %v554_v19 = vunpack.c.l.bf16 %v5145_v49  ;;  %v5218_v20 = vld [vmem:[%s4798_s10 + $0x68] sm:$0xff]  ;;  %v559_v23 = vunpack.c.h.bf16 %v5207_v15  ;;  %v557_v49 = vunpack.c.h.bf16 %v5204_v14 }
  0x4b   : > { %1298 = vmatpush.msra.mxu3 %v545_v21  ;;  %1318 = vmatpush.msra.mxu0 %v546_v22  ;;  %v5221_v21 = vld [vmem:[%s4798_s10 + $0x70] sm:$0xff]  ;;  %v556_v22 = vunpack.c.l.bf16 %v5204_v14 }
  0x4c   : > { %1358 = vmatpush.msra.mxu2 %v548_v25  ;;  %1418 = vmatpush.msra.mxu1 %v551_v26  ;;  %v490_v25 = vunpack.c.l.bf16 %v5159_v55  ;;  %v492_v26 = vunpack.c.l.bf16 %v5218_v20  ;;  %v493_v55 = vunpack.c.h.bf16 %v5218_v20 }
  0x4d   : > { %1299 = vmatpush.msra.mxu3 %v481_v27  ;;  %1319 = vmatpush.msra.mxu0 %v482_v28  ;;  %v495_v27 = vunpack.c.h.bf16 %v5221_v21  ;;  %v5230_v28 = vld [vmem:[%s4798_s10 + $0x478] sm:$0x33] }
  0x4e   : > { %1359 = vmatpush.msra.mxu2 %v484_v29  ;;  %1419 = vmatpush.msra.mxu1 %v487_v30  ;;  %v5233_v29 = vld [vmem:[%s4798_s10 + $0x480] sm:$0x33]  ;;  %v749_v30 = vunpack.c.h.bf16 %v5168_v62 }
  0x4f   : > { %4460 = vmatmul.msk.f32.vlgmr.msra.gmra.mxu0 %vm787_vm1, %v4869_v44  ;;  %4465 = vmatpush.msk.msrb.mxu3 %vm791_vm0, %v741_v33  ;;  %v5241_v33 = vld [vmem:[%s4798_s10 + $0x380] sm:$0xff]  ;;  %v754_v62 = vunpack.c.l.bf16 %v5233_v29 }
  0x50   : > { %4467 = vmatpush.msk.msrb.mxu0 %vm791_vm0, %v742_v34  ;;  %4470 = vmatmul.msk.f32.vlgmr.msra.gmra.mxu1 %vm787_vm1, %v4869_v44  ;;  %v752_v34 = vunpack.c.l.bf16 %v5230_v28  ;;  %v691_v41 = vunpack.c.h.bf16 %v5241_v33 }
  0x51   : > { %4471 = vmatpush.msk.msrb.mxu2 %vm791_vm0, %v744_v35  ;;  %4477 = vmatpush.msk.msrb.mxu1 %vm791_vm0, %v747_v36  ;;  %v755_v35 = vunpack.c.h.bf16 %v5233_v29  ;;  %v685_v36 = vunpack.c.h.bf16 %v5178_v4  ;;  %v690_v4 = vunpack.c.l.bf16 %v5241_v33  ;;  %v5362_v29 = vld [vmem:[%s4798_s10 + $0x398] sm:$0xff]  ;;  %v693_v33 = vunpack.c.h.bf16 %v5300_v63 }
  0x52   : > { %4458 = vmatmul.msk.f32.vlgmr.msra.gmra.mxu3 %vm787_vm1, %v4869_v44  ;;  %4464 = vmatmul.msk.f32.vlgmr.msra.gmra.mxu2 %vm787_vm1, %v4869_v44 }
  0x53   : > { %1376 = vmatpush.msrb.mxu3 %v677_v39  ;;  %1396 = vmatpush.msrb.mxu0 %v678_v40  ;;  %v5255_v39 = vld [vmem:[%s4798_s10 + $0x280] sm:$0xff]  ;;  %v688_v40 = vunpack.c.l.bf16 %v5238_v32 }
  0x54   : > { %1436 = vmatpush.msrb.mxu2 %v680_v43  ;;  %1496 = vmatpush.msrb.mxu1 %v683_v45  ;;  %v622_v43 = vunpack.c.l.bf16 %v5192_v9  ;;  %v5268_v45 = vld [vmem:[%s4798_s10 + $0x178] sm:$0xff]  ;;  %v627_v48 = vunpack.c.h.bf16 %v5255_v39  ;;  %v625_v9 = vunpack.c.h.bf16 %v5252_v38 }
  0x55   : > { %1377 = vmatpush.msrb.mxu3 %v613_v46  ;;  %1397 = vmatpush.msrb.mxu0 %v614_v47  ;;  %v5271_v46 = vld [vmem:[%s4798_s10 + $0x180] sm:$0xff]  ;;  %v624_v47 = vunpack.c.l.bf16 %v5252_v38 }
  0x56   : > { %1437 = vmatpush.msrb.mxu2 %v616_v50  ;;  %1497 = vmatpush.msrb.mxu1 %v619_v51  ;;  %v558_v50 = vunpack.c.l.bf16 %v5207_v15  ;;  %v5280_v51 = vld [vmem:[%s4798_s10 + $0x78] sm:$0xff]  ;;  %v563_v54 = vunpack.c.h.bf16 %v5271_v46  ;;  %v561_v15 = vunpack.c.h.bf16 %v5268_v45 }
  0x57   : > { %1378 = vmatpush.msrb.mxu3 %v549_v52  ;;  %1398 = vmatpush.msrb.mxu0 %v550_v53  ;;  %v5283_v52 = vld [vmem:[%s4798_s10 + $0x80] sm:$0xff]  ;;  %v560_v53 = vunpack.c.l.bf16 %v5268_v45 }
  0x58   : > { %1438 = vmatpush.msrb.mxu2 %v552_v56  ;;  %1498 = vmatpush.msrb.mxu1 %v555_v57  ;;  %v494_v56 = vunpack.c.l.bf16 %v5221_v21  ;;  %v496_v57 = vunpack.c.l.bf16 %v5280_v51  ;;  %v497_v21 = vunpack.c.h.bf16 %v5280_v51 }
  0x59   : > { %1379 = vmatpush.msrb.mxu3 %v485_v58  ;;  %1399 = vmatpush.msrb.mxu0 %v486_v59  ;;  %v499_v58 = vunpack.c.h.bf16 %v5283_v52  ;;  %v5292_v59 = vld [vmem:[%s4798_s10 + $0x488] sm:$0x33] }
  0x5a   : > { %1439 = vmatpush.msrb.mxu2 %v488_v60  ;;  %1499 = vmatpush.msrb.mxu1 %v491_v61  ;;  %v5295_v60 = vld [vmem:[%s4798_s10 + $0x490] sm:$0x33]  ;;  %v753_v61 = vunpack.c.h.bf16 %v5230_v28 }
  0x5b   : > { %4468 = vmatmul.msk.f32.vlgmr.msrb.gmra.mxu0 %vm787_vm1, %v4869_v44  ;;  %4473 = vmatpush.msk.msra.mxu3 %vm791_vm0, %v745_v0  ;;  %v5303_v0 = vld [vmem:[%s4798_s10 + $0x390] sm:$0xff]  ;;  %v758_v28 = vunpack.c.l.bf16 %v5295_v60 }
  0x5c   : > { %4475 = vmatpush.msk.msra.mxu0 %vm791_vm0, %v746_v1  ;;  %4478 = vmatmul.msk.f32.vlgmr.msrb.gmra.mxu1 %vm787_vm1, %v4869_v44  ;;  %v756_v1 = vunpack.c.l.bf16 %v5292_v59  ;;  %v695_v8 = vunpack.c.h.bf16 %v5303_v0 }
  0x5d   : > { %4479 = vmatpush.msk.msra.mxu2 %vm791_vm0, %v748_v2  ;;  %4485 = vmatpush.msk.msra.mxu1 %vm791_vm0, %v751_v3  ;;  %v759_v2 = vunpack.c.h.bf16 %v5295_v60  ;;  %v689_v3 = vunpack.c.h.bf16 %v5238_v32  ;;  %v5424_v60 = vld [vmem:[%s4798_s10 + $0x3a8] sm:$0xff] }
  0x5e   : > { %4466 = vmatmul.msk.f32.vlgmr.msrb.gmra.mxu3 %vm787_vm1, %v4869_v44  ;;  %4472 = vmatmul.msk.f32.vlgmr.msrb.gmra.mxu2 %vm787_vm1, %v4869_v44 }
  0x5f   : > { %1456 = vmatpush.msra.mxu3 %v681_v6  ;;  %1476 = vmatpush.msra.mxu0 %v682_v7  ;;  %v5317_v6 = vld [vmem:[%s4798_s10 + $0x290] sm:$0xff]  ;;  %v692_v7 = vunpack.c.l.bf16 %v5300_v63 }
  0x60   : > { %1516 = vmatpush.msra.mxu2 %v684_v10  ;;  %1576 = vmatpush.msra.mxu1 %v687_v11  ;;  %v626_v10 = vunpack.c.l.bf16 %v5255_v39  ;;  %v5330_v11 = vld [vmem:[%s4798_s10 + $0x188] sm:$0xff]  ;;  %v631_v14 = vunpack.c.h.bf16 %v5317_v6  ;;  %v629_v39 = vunpack.c.h.bf16 %v5314_v5 }
  0x61   : > { %1457 = vmatpush.msra.mxu3 %v617_v12  ;;  %1477 = vmatpush.msra.mxu0 %v618_v13  ;;  %v5333_v12 = vld [vmem:[%s4798_s10 + $0x190] sm:$0xff]  ;;  %v628_v13 = vunpack.c.l.bf16 %v5314_v5 }
  0x62   : > { %1517 = vmatpush.msra.mxu2 %v620_v16  ;;  %1577 = vmatpush.msra.mxu1 %v623_v17  ;;  %v562_v16 = vunpack.c.l.bf16 %v5271_v46  ;;  %v5342_v17 = vld [vmem:[%s4798_s10 + $0x88] sm:$0xff]  ;;  %v567_v20 = vunpack.c.h.bf16 %v5333_v12  ;;  %v565_v46 = vunpack.c.h.bf16 %v5330_v11 }
  0x63   : > { %1458 = vmatpush.msra.mxu3 %v553_v18  ;;  %1478 = vmatpush.msra.mxu0 %v554_v19  ;;  %v5345_v18 = vld [vmem:[%s4798_s10 + $0x90] sm:$0xff]  ;;  %v564_v19 = vunpack.c.l.bf16 %v5330_v11 }
  0x64   : > { %1518 = vmatpush.msra.mxu2 %v556_v22  ;;  %1578 = vmatpush.msra.mxu1 %v559_v23  ;;  %v498_v22 = vunpack.c.l.bf16 %v5283_v52  ;;  %v500_v23 = vunpack.c.l.bf16 %v5342_v17  ;;  %v501_v52 = vunpack.c.h.bf16 %v5342_v17 }
  0x65   : > { %1459 = vmatpush.msra.mxu3 %v489_v24  ;;  %1479 = vmatpush.msra.mxu0 %v490_v25  ;;  %v503_v24 = vunpack.c.h.bf16 %v5345_v18  ;;  %v5354_v25 = vld [vmem:[%s4798_s10 + $0x498] sm:$0x33] }
  0x66   : > { %1519 = vmatpush.msra.mxu2 %v492_v26  ;;  %1579 = vmatpush.msra.mxu1 %v495_v27  ;;  %v5357_v26 = vld [vmem:[%s4798_s10 + $0x4a0] sm:$0x33]  ;;  %v757_v27 = vunpack.c.h.bf16 %v5292_v59 }
  0x67   : > { %4474 = vmatmul.msk.f32.vlgmr.msra.gmra.mxu3 %vm787_vm1, %v4869_v44  ;;  %4476 = vmatmul.msk.f32.vlgmr.msra.gmra.mxu0 %vm787_vm1, %v4869_v44  ;;  %v763_v32 = vunpack.c.h.bf16 %v5357_v26  ;;  %v762_v59 = vunpack.c.l.bf16 %v5357_v26  ;;  %v5489_v26 = vld [vmem:[%s4798_s10 + $0x3c0] sm:$0xff] }
  0x68   : > { %4480 = vmatmul.msk.f32.vlgmr.msra.gmra.mxu2 %vm787_vm1, %v4869_v44  ;;  %4481 = vmatpush.msk.msrb.mxu3 %vm791_vm0, %v749_v30  ;;  %v5365_v30 = vld [vmem:[%s4798_s10 + $0x3a0] sm:$0xff] }
  0x69   : > { %4483 = vmatpush.msk.msrb.mxu0 %vm791_vm0, %v750_v31  ;;  %4486 = vmatmul.msk.f32.vlgmr.msra.gmra.mxu1 %vm787_vm1, %v4869_v44  ;;  %v760_v31 = vunpack.c.l.bf16 %v5354_v25  ;;  %v699_v38 = vunpack.c.h.bf16 %v5365_v30 }
  0x6a   : > { %4487 = vmatpush.msk.msrb.mxu2 %vm791_vm0, %v752_v34  ;;  %4493 = vmatpush.msk.msrb.mxu1 %vm791_vm0, %v755_v35  ;;  %v694_v34 = vunpack.c.l.bf16 %v5303_v0  ;;  %v5376_v35 = vld [vmem:[%s4798_s10 + $0x298] sm:$0xff]  ;;  %v697_v0 = vunpack.c.h.bf16 %v5362_v29 }
  0x6b   : > { %1536 = vmatpush.msrb.mxu3 %v685_v36  ;;  %1556 = vmatpush.msrb.mxu0 %v686_v37  ;;  %v5379_v36 = vld [vmem:[%s4798_s10 + $0x2a0] sm:$0xff]  ;;  %v696_v37 = vunpack.c.l.bf16 %v5362_v29 }
  0x6c   : > { %1596 = vmatpush.msrb.mxu2 %v688_v40  ;;  %1656 = vmatpush.msrb.mxu1 %v691_v41  ;;  %v630_v40 = vunpack.c.l.bf16 %v5317_v6  ;;  %v5392_v41 = vld [vmem:[%s4798_s10 + $0x198] sm:$0xff]  ;;  %v635_v45 = vunpack.c.h.bf16 %v5379_v36  ;;  %v633_v6 = vunpack.c.h.bf16 %v5376_v35  ;;  %v5496_v29 = vld [vmem:[%s7373_s1] sm:$0xff] }
  0x6d   : > { %1537 = vmatpush.msrb.mxu3 %v621_v42  ;;  %1557 = vmatpush.msrb.mxu0 %v622_v43  ;;  %v5395_v42 = vld [vmem:[%s4798_s10 + $0x1a0] sm:$0xff]  ;;  %v632_v43 = vunpack.c.l.bf16 %v5376_v35  ;;  %v707_v35 = vunpack.c.h.bf16 %v5489_v26 }
  0x6e   : > { %1597 = vmatpush.msrb.mxu2 %v624_v47  ;;  %1657 = vmatpush.msrb.mxu1 %v627_v48  ;;  %v566_v47 = vunpack.c.l.bf16 %v5333_v12  ;;  %v5404_v48 = vld [vmem:[%s4798_s10 + $0x98] sm:$0xff]  ;;  %v571_v51 = vunpack.c.h.bf16 %v5395_v42  ;;  %v570_v12 = vunpack.c.l.bf16 %v5395_v42 }
  0x6f   : > { %1538 = vmatpush.msrb.mxu3 %v557_v49  ;;  %1558 = vmatpush.msrb.mxu0 %v558_v50  ;;  %v5407_v49 = vld [vmem:[%s4798_s10 + $0xa0] sm:$0xff]  ;;  %v568_v50 = vunpack.c.l.bf16 %v5392_v41  ;;  %v505_v17 = vunpack.c.h.bf16 %v5404_v48 }
  0x70   : > { %1598 = vmatpush.msrb.mxu2 %v560_v53  ;;  %1658 = vmatpush.msrb.mxu1 %v563_v54  ;;  %v502_v53 = vunpack.c.l.bf16 %v5345_v18  ;;  %v504_v54 = vunpack.c.l.bf16 %v5404_v48  ;;  %v506_v18 = vunpack.c.l.bf16 %v5407_v49 }
  0x71   : > { %1539 = vmatpush.msrb.mxu3 %v493_v55  ;;  %1559 = vmatpush.msrb.mxu0 %v494_v56  ;;  %v507_v55 = vunpack.c.h.bf16 %v5407_v49  ;;  %v5416_v56 = vld [vmem:[%s4798_s10 + $0x4a8] sm:$0x33] }
  0x72   : > { %1599 = vmatpush.msrb.mxu2 %v496_v57  ;;  %1659 = vmatpush.msrb.mxu1 %v499_v58  ;;  %v5419_v57 = vld [vmem:[%s4798_s10 + $0x4b0] sm:$0x33]  ;;  %v761_v58 = vunpack.c.h.bf16 %v5354_v25  ;;  %v5486_v25 = vld [vmem:[%s4798_s10 + $0x3b8] sm:$0xff] }
  0x73   : > { %4482 = vmatmul.msk.f32.vlgmr.msrb.gmra.mxu3 %vm787_vm1, %v4869_v44  ;;  %4484 = vmatmul.msk.f32.vlgmr.msrb.gmra.mxu0 %vm787_vm1, %v4869_v44  ;;  %v767_v63 = vunpack.c.h.bf16 %v5419_v57 }
  0x74   : > { %4488 = vmatmul.msk.f32.vlgmr.msrb.gmra.mxu2 %vm787_vm1, %v4869_v44  ;;  %4489 = vmatpush.msk.msra.mxu3 %vm791_vm0, %v753_v61  ;;  %v5427_v61 = vld [vmem:[%s4798_s10 + $0x3b0] sm:$0xff] }
  0x75   : > { %4491 = vmatpush.msk.msra.mxu0 %vm791_vm0, %v754_v62  ;;  %4494 = vmatmul.msk.f32.vlgmr.msrb.gmra.mxu1 %vm787_vm1, %v4869_v44  ;;  %v764_v62 = vunpack.c.l.bf16 %v5416_v56  ;;  %v703_v5 = vunpack.c.h.bf16 %v5427_v61 }
  0x76   : > { %4495 = vmatpush.msk.msra.mxu2 %vm791_vm0, %v756_v1  ;;  %4501 = vmatpush.msk.msra.mxu1 %vm791_vm0, %v759_v2  ;;  %v698_v1 = vunpack.c.l.bf16 %v5365_v30  ;;  %v5438_v2 = vld [vmem:[%s4798_s10 + $0x2a8] sm:$0xff]  ;;  %v701_v30 = vunpack.c.h.bf16 %v5424_v60 }
  0x77   : > { %1616 = vmatpush.msra.mxu3 %v689_v3  ;;  %1636 = vmatpush.msra.mxu0 %v690_v4  ;;  %v5441_v3 = vld [vmem:[%s4798_s10 + $0x2b0] sm:$0xff]  ;;  %v700_v4 = vunpack.c.l.bf16 %v5424_v60 }
  0x78   : > { %1676 = vmatpush.msra.mxu2 %v692_v7  ;;  %1736 = vmatpush.msra.mxu1 %v695_v8  ;;  %v634_v7 = vunpack.c.l.bf16 %v5379_v36  ;;  %v5454_v8 = vld [vmem:[%s4798_s10 + $0x1a8] sm:$0xff]  ;;  %v639_v11 = vunpack.c.h.bf16 %v5441_v3  ;;  %v637_v36 = vunpack.c.h.bf16 %v5438_v2 }
  0x79   : > { %1617 = vmatpush.msra.mxu3 %v625_v9  ;;  %1637 = vmatpush.msra.mxu0 %v626_v10  ;;  %v5457_v9 = vld [vmem:[%s4798_s10 + $0x1b0] sm:$0xff]  ;;  %v636_v10 = vunpack.c.l.bf16 %v5438_v2  ;;  %v573_v42 = vunpack.c.h.bf16 %v5454_v8 }
  0x7a   : > { %1677 = vmatpush.msra.mxu2 %v628_v13  ;;  %1737 = vmatpush.msra.mxu1 %v631_v14  ;;  %v5466_v13 = vld [vmem:[%s4798_s10 + $0xa8] sm:$0xff]  ;;  %v5469_v14 = vld [vmem:[%s4798_s10 + $0xb0] sm:$0xff] }
  0x7b   : > { %1618 = vmatpush.msra.mxu3 %v561_v15  ;;  %1638 = vmatpush.msra.mxu0 %v562_v16  ;;  %v572_v15 = vunpack.c.l.bf16 %v5454_v8  ;;  %v575_v16 = vunpack.c.h.bf16 %v5457_v9  ;;  %v509_v49 = vunpack.c.h.bf16 %v5466_v13 }
  0x7c   : > { %1678 = vmatpush.msra.mxu2 %v564_v19  ;;  %1738 = vmatpush.msra.mxu1 %v567_v20  ;;  %v508_v19 = vunpack.c.l.bf16 %v5466_v13  ;;  %v511_v20 = vunpack.c.h.bf16 %v5469_v14 }
  0x7d   : > { %1619 = vmatpush.msra.mxu3 %v497_v21  ;;  %1639 = vmatpush.msra.mxu0 %v498_v22  ;;  %v5478_v21 = vld [vmem:[%s4798_s10 + $0x4b8] sm:$0x33]  ;;  %v5481_v22 = vld [vmem:[%s4798_s10 + $0x4c0] sm:$0x33] }
  0x7e   : > { %1679 = vmatpush.msra.mxu2 %v500_v23  ;;  %1739 = vmatpush.msra.mxu1 %v503_v24  ;;  %v765_v23 = vunpack.c.h.bf16 %v5416_v56  ;;  %v766_v24 = vunpack.c.l.bf16 %v5419_v57  ;;  %v770_v56 = vunpack.c.l.bf16 %v5481_v22  ;;  %v5553_v57 = vld [vmem:[%s4798_s10 + $0x3c8] sm:$0xff] }
  0x7f   : > { %4490 = vmatmul.msk.f32.vlgmr.msra.gmra.mxu3 %vm787_vm1, %v4869_v44  ;;  %4492 = vmatmul.msk.f32.vlgmr.msra.gmra.mxu0 %vm787_vm1, %v4869_v44 }
  0x80   : > { %4496 = vmatmul.msk.f32.vlgmr.msra.gmra.mxu2 %vm787_vm1, %v4869_v44  ;;  %4497 = vmatpush.msk.msrb.mxu3 %vm791_vm0, %v757_v27  ;;  %v768_v27 = vunpack.c.l.bf16 %v5478_v21 }
  0x81   : > { %4499 = vmatpush.msk.msrb.mxu0 %vm791_vm0, %v758_v28  ;;  %4502 = vmatmul.msk.f32.vlgmr.msra.gmra.mxu1 %vm787_vm1, %v4869_v44  ;;  %v771_v28 = vunpack.c.h.bf16 %v5481_v22 }
  0x82   : > { %4503 = vmatpush.msk.msrb.mxu2 %vm791_vm0, %v760_v31  ;;  %4509 = vmatpush.msk.msrb.mxu1 %vm791_vm0, %v763_v32  ;;  %v702_v31 = vunpack.c.l.bf16 %v5427_v61  ;;  %v5505_v32 = vld [vmem:[%s4798_s10 + $0x2b8] sm:$0xff]  ;;  %v705_v61 = vunpack.c.h.bf16 %v5486_v25 }
  0x83   : > { %1696 = vmatpush.msrb.mxu3 %v693_v33  ;;  %1716 = vmatpush.msrb.mxu0 %v694_v34  ;;  %v5508_v33 = vld [vmem:[%s4798_s10 + $0x2c0] sm:$0xff]  ;;  %v704_v34 = vunpack.c.l.bf16 %v5486_v25 }
  0x84   : > { %1756 = vmatpush.msrb.mxu2 %v696_v37  ;;  %1816 = vmatpush.msrb.mxu1 %v699_v38  ;;  %v638_v37 = vunpack.c.l.bf16 %v5441_v3  ;;  %v5521_v38 = vld [vmem:[%s4798_s10 + $0x1b8] sm:$0xff]  ;;  %v641_v3 = vunpack.c.h.bf16 %v5505_v32  ;;  %v5622_v25 = vld [vmem:[%s4798_s10 + $0x3e0] sm:$0xff] }
  0x85   : > { %1697 = vmatpush.msrb.mxu3 %v629_v39  ;;  %1717 = vmatpush.msrb.mxu0 %v630_v40  ;;  %v5524_v39 = vld [vmem:[%s4798_s10 + $0x1c0] sm:$0xff]  ;;  %v640_v40 = vunpack.c.l.bf16 %v5505_v32 }
  0x86   : > { %1757 = vmatpush.msrb.mxu2 %v632_v43  ;;  %1817 = vmatpush.msrb.mxu1 %v635_v45  ;;  %v574_v43 = vunpack.c.l.bf16 %v5457_v9  ;;  %v5533_v45 = vld [vmem:[%s4798_s10 + $0xb8] sm:$0xff]  ;;  %v579_v48 = vunpack.c.h.bf16 %v5524_v39  ;;  %v577_v9 = vunpack.c.h.bf16 %v5521_v38  ;;  %v5636_v32 = vld [vmem:[%s4798_s10 + $0x2e0] sm:$0xff] }
  0x87   : > { %1698 = vmatpush.msrb.mxu3 %v565_v46  ;;  %1718 = vmatpush.msrb.mxu0 %v566_v47  ;;  %v5536_v46 = vld [vmem:[%s4798_s10 + $0xc0] sm:$0xff]  ;;  %v576_v47 = vunpack.c.l.bf16 %v5521_v38 }
  0x88   : > { %1758 = vmatpush.msrb.mxu2 %v568_v50  ;;  %1818 = vmatpush.msrb.mxu1 %v571_v51  ;;  %v510_v50 = vunpack.c.l.bf16 %v5469_v14  ;;  %v512_v51 = vunpack.c.l.bf16 %v5533_v45  ;;  %v513_v14 = vunpack.c.h.bf16 %v5533_v45  ;;  %v5652_v38 = vld [vmem:[%s4798_s10 + $0x1e0] sm:$0xff]  ;;  %v5661_v45 = vld [vmem:[%s4798_s10 + $0xd8] sm:$0xff] }
  0x89   : > { %1699 = vmatpush.msrb.mxu3 %v501_v52  ;;  %1719 = vmatpush.msrb.mxu0 %v502_v53  ;;  %v515_v52 = vunpack.c.h.bf16 %v5536_v46  ;;  %v5545_v53 = vld [vmem:[%s4798_s10 + $0x4c8] sm:$0x33] }
  0x8a   : > { %1759 = vmatpush.msrb.mxu2 %v504_v54  ;;  %1819 = vmatpush.msrb.mxu1 %v507_v55  ;;  %v5548_v54 = vld [vmem:[%s4798_s10 + $0x4d0] sm:$0x33]  ;;  %v769_v55 = vunpack.c.h.bf16 %v5478_v21  ;;  %v5614_v21 = vld [vmem:[%s4798_s10 + $0x4e0] sm:$0x33]  ;;  %v773_v22 = vunpack.c.h.bf16 %v5545_v53 }
  0x8b   : > { %4498 = vmatmul.msk.f32.vlgmr.msrb.gmra.mxu3 %vm787_vm1, %v4869_v44  ;;  %4500 = vmatmul.msk.f32.vlgmr.msrb.gmra.mxu0 %vm787_vm1, %v4869_v44  ;;  %v775_v60 = vunpack.c.h.bf16 %v5548_v54 }
  0x8c   : > { %4504 = vmatmul.msk.f32.vlgmr.msrb.gmra.mxu2 %vm787_vm1, %v4869_v44  ;;  %4505 = vmatpush.msk.msra.mxu3 %vm791_vm0, %v761_v58  ;;  %v5556_v58 = vld [vmem:[%s4798_s10 + $0x3d0] sm:$0xff] }
  0x8d   : > { %4507 = vmatpush.msk.msra.mxu0 %vm791_vm0, %v762_v59  ;;  %4510 = vmatmul.msk.f32.vlgmr.msrb.gmra.mxu1 %vm787_vm1, %v4869_v44  ;;  %v569_v44 = vunpack.c.h.bf16 %v5392_v41  ;;  %v643_v41 = vunpack.c.h.bf16 %v5508_v33  ;;  %v772_v59 = vunpack.c.l.bf16 %v5545_v53  ;;  %v711_v2 = vunpack.c.h.bf16 %v5556_v58 }
  0x8e   : > { %4511 = vmatpush.msk.msra.mxu2 %vm791_vm0, %v764_v62  ;;  %4517 = vmatpush.msk.msra.mxu1 %vm791_vm0, %v767_v63  ;;  %v706_v62 = vunpack.c.l.bf16 %v5489_v26  ;;  %v5567_v63 = vld [vmem:[%s4798_s10 + $0x2c8] sm:$0xff] }
  0x8f   : > { %1776 = vmatpush.msra.mxu3 %v697_v0  ;;  %1796 = vmatpush.msra.mxu0 %v698_v1  ;;  %v5570_v0 = vld [vmem:[%s4798_s10 + $0x2d0] sm:$0xff]  ;;  %v708_v1 = vunpack.c.l.bf16 %v5553_v57 }
  0x90   : > { %1836 = vmatpush.msra.mxu2 %v700_v4  ;;  %1896 = vmatpush.msra.mxu1 %v703_v5  ;;  %v642_v4 = vunpack.c.l.bf16 %v5508_v33  ;;  %v5583_v5 = vld [vmem:[%s4798_s10 + $0x1c8] sm:$0xff]  ;;  %v647_v8 = vunpack.c.h.bf16 %v5570_v0 }
  0x91   : > { %1777 = vmatpush.msra.mxu3 %v633_v6  ;;  %1797 = vmatpush.msra.mxu0 %v634_v7  ;;  %v5586_v6 = vld [vmem:[%s4798_s10 + $0x1d0] sm:$0xff]  ;;  %v644_v7 = vunpack.c.l.bf16 %v5567_v63 }
  0x92   : > { %1837 = vmatpush.msra.mxu2 %v636_v10  ;;  %1897 = vmatpush.msra.mxu1 %v639_v11  ;;  %v578_v10 = vunpack.c.l.bf16 %v5524_v39  ;;  %v5595_v11 = vld [vmem:[%s4798_s10 + $0xc8] sm:$0xff]  ;;  %v583_v13 = vunpack.c.h.bf16 %v5586_v6 }
  0x93   : > { %1778 = vmatpush.msra.mxu3 %v569_v44  ;;  %1798 = vmatpush.msra.mxu0 %v570_v12  ;;  %v5598_v44 = vld [vmem:[%s4798_s10 + $0xd0] sm:$0xff]  ;;  %v580_v12 = vunpack.c.l.bf16 %v5583_v5 }
  0x94   : > { %1838 = vmatpush.msra.mxu2 %v572_v15  ;;  %1898 = vmatpush.msra.mxu1 %v575_v16  ;;  %v514_v15 = vunpack.c.l.bf16 %v5536_v46  ;;  %v516_v16 = vunpack.c.l.bf16 %v5595_v11  ;;  %v5664_v46 = vld [vmem:[%s4798_s10 + $0xe0] sm:$0xff] }
  0x95   : > { %1779 = vmatpush.msra.mxu3 %v505_v17  ;;  %1799 = vmatpush.msra.mxu0 %v506_v18  ;;  %v519_v17 = vunpack.c.h.bf16 %v5598_v44 }
  0x96   : > { %1839 = vmatpush.msra.mxu2 %v508_v19  ;;  %1899 = vmatpush.msra.mxu1 %v511_v20  ;;  %v5611_v20 = vld [vmem:[%s4798_s10 + $0x4d8] sm:$0x33] }
  0x97   : > { %4506 = vmatmul.msk.f32.vlgmr.msra.gmra.mxu3 %vm787_vm1, %v5496_v29  ;;  %4508 = vmatmul.msk.f32.vlgmr.msra.gmra.mxu0 %vm787_vm1, %v5496_v29  ;;  %v776_v26 = vunpack.c.l.bf16 %v5611_v20 }
  0x98   : > { %4512 = vmatmul.msk.f32.vlgmr.msra.gmra.mxu2 %vm787_vm1, %v5496_v29  ;;  %4513 = vmatpush.msk.msrb.mxu3 %vm791_vm0, %v765_v23  ;;  %v774_v23 = vunpack.c.l.bf16 %v5548_v54 }
  0x99   : > { %4515 = vmatpush.msk.msrb.mxu0 %vm791_vm0, %v766_v24  ;;  %4518 = vmatmul.msk.f32.vlgmr.msra.gmra.mxu1 %vm787_vm1, %v5496_v29  ;;  %v5619_v24 = vld [vmem:[%s4798_s10 + $0x3d8] sm:$0xff] }
  0x9a   : > { %4519 = vmatpush.msk.msrb.mxu2 %vm791_vm0, %v768_v27  ;;  %4525 = vmatpush.msk.msrb.mxu1 %vm791_vm0, %v771_v28  ;;  %v779_v27 = vunpack.c.h.bf16 %v5614_v21  ;;  %v709_v28 = vunpack.c.h.bf16 %v5553_v57  ;;  %v712_v33 = vunpack.c.l.bf16 %v5619_v24  ;;  %v5680_v57 = vld [vmem:[%s4798_s10 + $0x4f0] sm:$0x33] }
  0x9b   : > { %1856 = vmatpush.msrb.mxu3 %v701_v30  ;;  %1876 = vmatpush.msrb.mxu0 %v702_v31  ;;  %v710_v30 = vunpack.c.l.bf16 %v5556_v58  ;;  %v5633_v31 = vld [vmem:[%s4798_s10 + $0x2d8] sm:$0xff] }
  0x9c   : > { %1916 = vmatpush.msrb.mxu2 %v704_v34  ;;  %1976 = vmatpush.msrb.mxu1 %v707_v35  ;;  %v715_v34 = vunpack.c.h.bf16 %v5622_v25  ;;  %v645_v35 = vunpack.c.h.bf16 %v5567_v63  ;;  %v648_v39 = vunpack.c.l.bf16 %v5633_v31  ;;  %v778_v63 = vunpack.c.l.bf16 %v5614_v21 }
  0x9d   : > { %1857 = vmatpush.msrb.mxu3 %v637_v36  ;;  %1877 = vmatpush.msrb.mxu0 %v638_v37  ;;  %v5606_v18 = vpop.f32.mrf.mxu0  ;;  %v646_v36 = vunpack.c.l.bf16 %v5570_v0  ;;  %v5649_v37 = vld [vmem:[%s4798_s10 + $0x1d8] sm:$0xff]  ;;  %v5688_v0 = vld [vmem:[%s4798_s10 + $0x3e8] sm:$0xff] }
  0x9e   : > { %1917 = vmatpush.msrb.mxu2 %v640_v40  ;;  %1977 = vmatpush.msrb.mxu1 %v643_v41  ;;  %v5608_v19 = vpop.f32.mrf.mxu1  ;;  %v651_v40 = vunpack.c.h.bf16 %v5636_v32 }
  0x9f   : > { %1858 = vmatpush.msrb.mxu3 %v573_v42  ;;  %1878 = vmatpush.msrb.mxu0 %v574_v43  ;;  %v581_v42 = vunpack.c.h.bf16 %v5583_v5  ;;  %v582_v43 = vunpack.c.l.bf16 %v5586_v6  ;;  %v2355_v58 = vmul.f32 0.33333334, %v5608_v19  ;;  %v714_v5 = vunpack.c.l.bf16 %v5622_v25  ;;  %v5696_v6 = vld [vmem:[%s4798_s10 + $0x3f0] sm:$0xff] }
  0xa0   : > { %1918 = vmatpush.msrb.mxu2 %v576_v47  ;;  %1978 = vmatpush.msrb.mxu1 %v579_v48  ;;  %v584_v48 = vunpack.c.l.bf16 %v5649_v37  ;;  %v5734_v25 = vld [vmem:[%s4798_s10 + $0x1f0] sm:$0xff] }
  0xa1   : > { %1859 = vmatpush.msrb.mxu3 %v509_v49  ;;  %1879 = vmatpush.msrb.mxu0 %v510_v50  ;;  %v587_v49 = vunpack.c.h.bf16 %v5652_v38  ;;  %v517_v50 = vunpack.c.h.bf16 %v5595_v11  ;;  %v716_v11 = vunpack.c.l.bf16 %v5688_v0 }
  0xa2   : > { %1919 = vmatpush.msrb.mxu2 %v512_v51  ;;  %1979 = vmatpush.msrb.mxu1 %v515_v52  ;;  %v518_v51 = vunpack.c.l.bf16 %v5598_v44  ;;  %v5673_v52 = vld [vmem:[%s4798_s10 + $0x4e8] sm:$0x33]  ;;  %v2350_v44 = vmul.f32 0.33333334, %v5606_v18 }
  0xa3   : > { %4514 = vmatmul.msk.f32.vlgmr.msrb.gmra.mxu3 %vm787_vm1, %v5496_v29  ;;  %4516 = vmatmul.msk.f32.vlgmr.msrb.gmra.mxu0 %vm787_vm1, %v5496_v29 }
  0xa4   : > { %4520 = vmatmul.msk.f32.vlgmr.msrb.gmra.mxu2 %vm787_vm1, %v5496_v29  ;;  %4521 = vmatpush.msk.msra.mxu3 %vm791_vm0, %v769_v55  ;;  %v520_v55 = vunpack.c.l.bf16 %v5661_v45 }
  0xa5   : > { %4523 = vmatpush.msk.msra.mxu0 %vm791_vm0, %v770_v56  ;;  %4526 = vmatmul.msk.f32.vlgmr.msrb.gmra.mxu1 %vm787_vm1, %v5496_v29  ;;  %v523_v56 = vunpack.c.h.bf16 %v5664_v46 }
  0xa6   : > { %4527 = vmatpush.msk.msra.mxu2 %vm791_vm0, %v772_v59  ;;  %4533 = vmatpush.msk.msra.mxu1 %vm791_vm0, %v775_v60 }
  0xa7   : > { %1936 = vmatpush.msra.mxu3 %v705_v61  ;;  %1956 = vmatpush.msra.mxu0 %v706_v62  ;;  %v777_v62 = vunpack.c.h.bf16 %v5611_v20 }
  0xa8   : > { %1996 = vmatpush.msra.mxu2 %v708_v1  ;;  %2056 = vmatpush.msra.mxu1 %v711_v2  ;;  %v1021_v53 = vpop.f32.mrf.mxu3  ;;  %v5675_v54 = vpop.f32.mrf.mxu2  ;;  %v780_v2 = vunpack.c.l.bf16 %v5673_v52 }
  0xa9   : > { %1937 = vmatpush.msra.mxu3 %v641_v3  ;;  %1957 = vmatpush.msra.mxu0 %v642_v4  ;;  %v1181_v41 = vpop.f32.mrf.mxu1  ;;  %v5666_v47 = vpop.f32.mrf.mxu0  ;;  %v2351_v59 = vmul.f32 0.33333334, %v1021_v53  ;;  %v2447_v61 = vmul.f32 0.6666667, %v1021_v53  ;;  %v783_v3 = vunpack.c.h.bf16 %v5680_v57  ;;  %v713_v4 = vunpack.c.h.bf16 %v5619_v24  ;;  %v5731_v24 = vld [vmem:[%s4798_s10 + $0x1e8] sm:$0xff] }
  0xaa   : > { %1997 = vmatpush.msra.mxu2 %v644_v7  ;;  %2057 = vmatpush.msra.mxu1 %v647_v8  ;;  %v5683_v60 = vpop.permute.xlu0 %2331  ;;  %v5699_v7 = vld [vmem:[%s4798_s10 + $0x2e8] sm:$0xff]  ;;  %v5702_v8 = vld [vmem:[%s4798_s10 + $0x2f0] sm:$0xff] }
  0xab   : > { %1938 = vmatpush.msra.mxu3 %v577_v9  ;;  %1958 = vmatpush.msra.mxu0 %v578_v10  ;;  %v2359_v1 = vadd.f32 %v2351_v59, %v5683_v60  ;;  %v2451_v9 = vmul.f32 0.6666667, %v5608_v19  ;;  %v2363_v10 = vadd.f32 %v2355_v58, %v5683_v60  ;;  %v650_v19 = vunpack.c.l.bf16 %v5636_v32  ;;  %v5780_v59 = vld [vmem:[%s4798_s10 + $0x3f8] sm:$0xff] }
  0xac   : > { %1998 = vmatpush.msra.mxu2 %v580_v12  ;;  %2058 = vmatpush.msra.mxu1 %v583_v13  ;;  %v7381_v12 = vmov 0.0   ;;  %v652_v21 = vunpack.c.l.bf16 %v5699_v7  ;;  %v781_v58 = vunpack.c.h.bf16 %v5673_v52 }
  0xad   : > { %1939 = vmatpush.msra.mxu3 %v513_v14  ;;  %1959 = vmatpush.msra.mxu0 %v514_v15  ;;  %vm2375_vm2 = vcmp.gt.f32.partialorder %v2359_v1, 1.0  ;;  %v5715_v14 = vadd.f32 %v2447_v61, %v1181_v41  ;;  %vm2379_vm3 = vcmp.gt.f32.partialorder %v2363_v10, 1.0  ;;  %v591_v41 = vunpack.c.h.bf16 %v5734_v25 }
  0xae   : > { %1999 = vmatpush.msra.mxu2 %v516_v16  ;;  %2059 = vmatpush.msra.mxu1 %v519_v17  ;;  %v5713_v13 = vsel %vm2375_vm2, 1.0, %v7381_v12  ;;  %v719_v16 = vunpack.c.h.bf16 %v5696_v6  ;;  %v649_v17 = vunpack.c.h.bf16 %v5633_v31  ;;  %v5746_v31 = vsel %vm2379_vm3, 1.0, %v7381_v12 }
  0xaf   : > { %4522 = vmatmul.msk.f32.vlgmr.msra.gmra.mxu3 %vm787_vm1, %v5496_v29  ;;  %4524 = vmatmul.msk.f32.vlgmr.msra.gmra.mxu0 %vm787_vm1, %v5496_v29  ;;  %v2399_v20 = vsub.f32 1.0, %v5713_v13 }
  0xb0   : > { %4528 = vmatmul.msk.f32.vlgmr.msra.gmra.mxu2 %vm787_vm1, %v5496_v29  ;;  %4529 = vmatpush.msk.msrb.mxu3 %vm791_vm0, %v773_v22  ;;  %v655_v22 = vunpack.c.h.bf16 %v5702_v8 }
  0xb1   : > { %4531 = vmatpush.msk.msrb.mxu0 %vm791_vm0, %v774_v23  ;;  %4534 = vmatmul.msk.f32.vlgmr.msra.gmra.mxu1 %vm787_vm1, %v5496_v29  ;;  %v585_v23 = vunpack.c.h.bf16 %v5649_v37  ;;  %v2463_v37 = vmul.f32 0.33333334, %v5715_v14 }
  0xb2   : > { %4535 = vmatpush.msk.msrb.mxu2 %vm791_vm0, %v776_v26  ;;  %4541 = vmatpush.msk.msrb.mxu1 %vm791_vm0, %v779_v27  ;;  %v586_v27 = vunpack.c.l.bf16 %v5652_v38  ;;  %v5759_v38 = vadd.f32 %v2350_v44, %v5683_v60 }
  0xb3   : > { %2016 = vmatpush.msrb.mxu3 %v709_v28  ;;  %2036 = vmatpush.msrb.mxu0 %v710_v30  ;;  %v5742_v28 = vld [vmem:[%s4798_s10 + $0xe8] sm:$0xff]  ;;  %v2354_v30 = vmul.f32 0.33333334, %v5666_v47 }
  0xb4   : > { %2076 = vmatpush.msrb.mxu2 %v712_v33  ;;  %2136 = vmatpush.msrb.mxu1 %v715_v34  ;;  %v5736_v26 = vpop.f32.mrf.mxu0  ;;  %v5750_v33 = vpop.f32.mrf.mxu3  ;;  %vm2374_vm4 = vcmp.gt.f32.partialorder %v5759_v38, 1.0 }
  0xb5   : > { %2017 = vmatpush.msrb.mxu3 %v645_v35  ;;  %2037 = vmatpush.msrb.mxu0 %v646_v36  ;;  %v1261_v15 = vpop.f32.mrf.mxu1  ;;  %v5752_v34 = vpop.f32.mrf.mxu2  ;;  %v5755_v35 = vld [vmem:[%s4798_s10 + $0xf0] sm:$0xff]  ;;  %v2407_v36 = vmul.f32 %v2399_v20, %v2359_v1  ;;  %v5773_v53 = vadd.f32 %v2354_v30, %v5683_v60  ;;  %v2446_v1 = vmul.f32 0.6666667, %v5606_v18  ;;  %v5796_v52 = vsel %vm2374_vm4, 1.0, %v7381_v12  ;;  %v5845_v30 = vld [vmem:[%s4798_s10 + $0xf8] sm:$0xff] }
  0xb6   : > { %2077 = vmatpush.msrb.mxu2 %v648_v39  ;;  %2137 = vmatpush.msrb.mxu1 %v651_v40  ;;  %v5748_v32 = vadd.f32 %v2451_v9, %v1261_v15  ;;  %v2403_v39 = vsub.f32 1.0, %v5746_v31  ;;  %v588_v40 = vunpack.c.l.bf16 %v5731_v24  ;;  %v718_v9 = vunpack.c.l.bf16 %v5696_v6  ;;  %v3348_v20 = vld [vmem:[%s7375_s3 + $0xf0] sm:$0xff] }
  0xb7   : > { %2018 = vmatpush.msrb.mxu3 %v581_v42  ;;  %2038 = vmatpush.msrb.mxu0 %v582_v43  ;;  %v521_v42 = vunpack.c.h.bf16 %v5661_v45  ;;  %v522_v43 = vunpack.c.l.bf16 %v5664_v46  ;;  %v2471_v45 = vadd.f32 %v2463_v37, %v5683_v60  ;;  %v2479_v46 = vmul.f32 0.8, %v2407_v36  ;;  %v3347_v37 = vld [vmem:[%s7375_s3 + $0xe8] sm:$0xff] }
  0xb8   : > { %2078 = vmatpush.msrb.mxu2 %v584_v48  ;;  %2138 = vmatpush.msrb.mxu1 %v587_v49  ;;  %v524_v48 = vunpack.c.l.bf16 %v5742_v28  ;;  %v2356_v49 = vmul.f32 0.33333334, %v5752_v34  ;;  %vm2378_vm5 = vcmp.gt.f32.partialorder %v5773_v53, 1.0 }
  0xb9   : > { %2019 = vmatpush.msrb.mxu3 %v517_v50  ;;  %2039 = vmatpush.msrb.mxu0 %v518_v51  ;;  %v527_v50 = vunpack.c.h.bf16 %v5755_v35  ;;  %v5770_v51 = vld [vmem:[%s4798_s10 + $0x4f8] sm:$0x33]  ;;  %v5813_v44 = vadd.f32 %v2479_v46, %v2471_v45 }
  0xba   : > { %2079 = vmatpush.msrb.mxu2 %v520_v55  ;;  %2139 = vmatpush.msrb.mxu1 %v523_v56  ;;  %v2411_v55 = vmul.f32 %v2403_v39, %v2363_v10  ;;  %v2467_v56 = vmul.f32 0.33333334, %v5748_v32  ;;  %v5783_v61 = vadd.f32 %v2356_v49, %v5683_v60  ;;  %v720_v10 = vunpack.c.l.bf16 %v5780_v59 }
  0xbb   : > { %4530 = vmatmul.msk.f32.vlgmr.msrb.gmra.mxu3 %vm787_vm1, %v5496_v29  ;;  %4532 = vmatmul.msk.f32.vlgmr.msrb.gmra.mxu0 %vm787_vm1, %v5496_v29  ;;  %vm2495_vm7 = vcmp.gt.f32.partialorder %v5813_v44, 1.0  ;;  %v528_v49 = vunpack.c.l.bf16 %v5845_v30 }
  0xbc   : > { %4536 = vmatmul.msk.f32.vlgmr.msrb.gmra.mxu2 %vm787_vm1, %v5496_v29  ;;  %4537 = vmatpush.msk.msra.mxu3 %vm791_vm0, %v777_v62  ;;  %v782_v62 = vunpack.c.l.bf16 %v5680_v57  ;;  %v2475_v57 = vadd.f32 %v2467_v56, %v5683_v60  ;;  %vm2380_vm6 = vcmp.gt.f32.partialorder %v5783_v61, 1.0 }
  0xbd   : > { %4539 = vmatpush.msk.msra.mxu0 %vm791_vm0, %v778_v63  ;;  %4542 = vmatmul.msk.f32.vlgmr.msrb.gmra.mxu1 %vm787_vm1, %v5496_v29  ;;  %v784_v63 = vunpack.c.l.bf16 %v5770_v51 }
  0xbe   : > { %4543 = vmatpush.msk.msra.mxu2 %vm791_vm0, %v780_v2  ;;  %4549 = vmatpush.msk.msra.mxu1 %vm791_vm0, %v783_v3  ;;  %v717_v2 = vunpack.c.h.bf16 %v5688_v0  ;;  %v5790_v3 = vld [vmem:[%s4798_s10 + $0x2f8] sm:$0xff] }
  0xbf   : > { %2096 = vmatpush.msra.mxu3 %v713_v4  ;;  %2116 = vmatpush.msra.mxu0 %v714_v5  ;;  %v2483_v4 = vmul.f32 0.8, %v2411_v55  ;;  %v5799_v5 = vpop.f32.mrf.mxu3  ;;  %v5801_v18 = vpop.f32.mrf.mxu2  ;;  %v3349_v0 = vld [vmem:[%s7375_s3 + $0xf8] sm:$0xff] }
  0xc0   : > { %2156 = vmatpush.msra.mxu2 %v716_v11  ;;  %2216 = vmatpush.msra.mxu1 %v719_v16  ;;  %v653_v11 = vunpack.c.h.bf16 %v5699_v7  ;;  %v1241_v15 = vpop.f32.mrf.mxu0  ;;  %v5819_v16 = vld [vmem:[%s4798_s10 + $0x1f8] sm:$0xff]  ;;  %v2357_v7 = vmul.f32 0.33333334, %v5799_v5 }
  0xc1   : > { %2097 = vmatpush.msra.mxu3 %v649_v17  ;;  %2117 = vmatpush.msra.mxu0 %v650_v19  ;;  %v2450_v17 = vmul.f32 0.6666667, %v5666_v47  ;;  %v5823_v19 = vadd.f32 %v2446_v1, %v5736_v26  ;;  %v1341_v6 = vpop.f32.mrf.mxu1  ;;  %v654_v47 = vunpack.c.l.bf16 %v5702_v8  ;;  %v589_v26 = vunpack.c.h.bf16 %v5731_v24 }
  0xc2   : > { %2157 = vmatpush.msra.mxu2 %v652_v21  ;;  %2217 = vmatpush.msra.mxu1 %v655_v22  ;;  %v656_v21 = vunpack.c.l.bf16 %v5790_v3  ;;  %v5838_v22 = vsel %vm2378_vm5, 1.0, %v7381_v12  ;;  %v5847_v36 = vadd.f32 %v2483_v4, %v2475_v57  ;;  %v592_v39 = vunpack.c.l.bf16 %v5819_v16 }
  0xc3   : > { %2098 = vmatpush.msra.mxu3 %v585_v23  ;;  %2118 = vmatpush.msra.mxu0 %v586_v27  ;;  %v2398_v23 = vsub.f32 1.0, %v5796_v52  ;;  %v590_v27 = vunpack.c.l.bf16 %v5734_v25  ;;  %v5849_v8 = vadd.f32 %v2450_v17, %v1241_v15  ;;  %v5858_v24 = vsel %vm2380_vm6, 1.0, %v7381_v12 }
  0xc4   : > { %2158 = vmatpush.msra.mxu2 %v588_v40  ;;  %2218 = vmatpush.msra.mxu1 %v591_v41  ;;  %v2452_v25 = vmul.f32 0.6666667, %v5752_v34  ;;  %v525_v40 = vunpack.c.h.bf16 %v5742_v28  ;;  %v2402_v41 = vsub.f32 1.0, %v5838_v22  ;;  %v526_v34 = vunpack.c.l.bf16 %v5755_v35 }
  0xc5   : > { %2099 = vmatpush.msra.mxu3 %v521_v42  ;;  %2119 = vmatpush.msra.mxu0 %v522_v43  ;;  %v2462_v42 = vmul.f32 0.33333334, %v5823_v19  ;;  %v5866_v43 = vadd.f32 %v2357_v7, %v5683_v60  ;;  %v2575_v28 = vmul.f32 0.6666667, %v5715_v14  ;;  %vm2499_vm8 = vcmp.gt.f32.partialorder %v5847_v36, 1.0  ;;  %v3345_v14 = vld [vmem:[%s7375_s3 + $0xd8] sm:$0xff] }
  0xc6   : > { %2159 = vmatpush.msra.mxu2 %v524_v48  ;;  %2219 = vmatpush.msra.mxu1 %v527_v50  ;;  %v3346_v48 = vld [vmem:[%s7375_s3 + $0xe0] sm:$0xff]  ;;  %v2406_v50 = vmul.f32 %v2398_v23, %v5759_v38  ;;  %v2404_v55 = vsub.f32 1.0, %v5858_v24  ;;  %v2466_v56 = vmul.f32 0.33333334, %v5849_v8  ;;  %v5883_v35 = vsel %vm2495_vm7, 1.0, %v7381_v12 }
  0xc7   : > { %4538 = vmatmul.msk.f32.vlgmr.msra.gmra.mxu3 %vm787_vm1, %v5496_v29  ;;  %4540 = vmatmul.msk.f32.vlgmr.msra.gmra.mxu0 %vm787_vm1, %v5496_v29  ;;  %vm2381_vm9 = vcmp.gt.f32.partialorder %v5866_v43, 1.0  ;;  %v721_v1 = vunpack.c.h.bf16 %v5780_v59  ;;  %v5900_v57 = vadd.f32 %v2575_v28, %v1341_v6  ;;  %v3344_v59 = vld [vmem:[%s7375_s3 + $0xd0] sm:$0xff]  ;;  %v657_v17 = vunpack.c.h.bf16 %v5790_v3  ;;  %v3343_v3 = vld [vmem:[%s7375_s3 + $0xc8] sm:$0xff] }
  0xc8   : > { %4544 = vmatmul.msk.f32.vlgmr.msra.gmra.mxu2 %vm787_vm1, %v5496_v29  ;;  %4545 = vmatpush.msk.msrb.mxu3 %vm791_vm0, %v781_v58  ;;  %v2410_v58 = vmul.f32 %v2402_v41, %v5773_v53  ;;  %v2519_v53 = vsub.f32 1.0, %v5883_v35  ;;  %v5920_v6 = vsel %vm2381_vm9, 1.0, %v7381_v12  ;;  %v2579_v7 = vmul.f32 0.6666667, %v5748_v32 }
  0xc9   : > { %4547 = vmatpush.msk.msrb.mxu0 %vm791_vm0, %v782_v62  ;;  %4550 = vmatmul.msk.f32.vlgmr.msra.gmra.mxu1 %vm787_vm1, %v5496_v29  ;;  %v785_v62 = vunpack.c.h.bf16 %v5770_v51  ;;  %v3333_v51 = vld [vmem:[%s7375_s3 + $0x78] sm:$0xff]  ;;  %v2405_v41 = vsub.f32 1.0, %v5920_v6 }
  0xca   : > { %4551 = vmatpush.msk.msrb.mxu2 %vm791_vm0, %v784_v63  ;;  %3433 = vmatpush.msrb.mxu1 %v3349_v0  ;;  %v2470_v63 = vadd.f32 %v2462_v42, %v5683_v60  ;;  %v2478_v0 = vmul.f32 0.8, %v2406_v50  ;;  %v529_v50 = vunpack.c.h.bf16 %v5845_v30 }
  0xcb   : > { %2176 = vmatpush.msrb.mxu3 %v717_v2  ;;  %2196 = vmatpush.msrb.mxu0 %v718_v9  ;;  %v5878_v45 = vpop.f32.mrf.mxu3  ;;  %v1281_v46 = vpop.f32.mrf.mxu2  ;;  %v5898_v2 = vsel %vm2499_vm8, 1.0, %v7381_v12  ;;  %v2412_v9 = vmul.f32 %v2404_v55, %v5783_v61  ;;  %v2453_v61 = vmul.f32 0.6666667, %v5799_v5  ;;  %v2591_v5 = vmul.f32 0.33333334, %v5900_v57 }
  0xcc   : > { %2236 = vmatpush.msrb.mxu2 %v720_v10  ;;  %3434 = vmatpush.msrb.mxu1 %v3348_v20  ;;  %7410 = vst [vmem:[#allocation4_spill] sm:$0xff] %v5878_v45  ;;  %v5888_v38 = vadd.f32 %v2452_v25, %v1281_v46  ;;  %v1321_v4 = vpop.f32.mrf.mxu0  ;;  %v2474_v10 = vadd.f32 %v2466_v56, %v5683_v60  ;;  %v2482_v20 = vmul.f32 0.8, %v2410_v58  ;;  %v2523_v32 = vsub.f32 1.0, %v5898_v2 }
  0xcd   : > { %2177 = vmatpush.msrb.mxu3 %v653_v11  ;;  %2197 = vmatpush.msrb.mxu0 %v654_v47  ;;  %v1421_v15 = vpop.f32.mrf.mxu1  ;;  %v3332_v47 = vld [vmem:[%s7375_s3 + $0x70] sm:$0xff]  ;;  %v5934_v23 = vadd.f32 %v2478_v0, %v2470_v63  ;;  %v2484_v25 = vmul.f32 0.8, %v2412_v9  ;;  %v2599_v55 = vadd.f32 %v2591_v5, %v5683_v60  ;;  %v2413_v30 = vmul.f32 %v2405_v41, %v5866_v43 }
  0xce   : > { %2237 = vmatpush.msrb.mxu2 %v656_v21  ;;  %3435 = vmatpush.msrb.mxu1 %v3347_v37  ;;  %v2468_v11 = vmul.f32 0.33333334, %v5888_v38  ;;  %v593_v21 = vunpack.c.h.bf16 %v5819_v16  ;;  %v2527_v37 = vmul.f32 %v2519_v53, %v5813_v44  ;;  %v3342_v16 = vld [vmem:[%s7375_s3 + $0xc0] sm:$0xff]  ;;  %v3340_v63 = vld [vmem:[%s7375_s3 + $0xb0] sm:$0xff]  ;;  %v2578_v0 = vmul.f32 0.6666667, %v5849_v8 }
  0xcf   : > { %2178 = vmatpush.msrb.mxu3 %v589_v26  ;;  %2198 = vmatpush.msrb.mxu0 %v590_v27  ;;  %v2574_v26 = vmul.f32 0.6666667, %v5823_v19  ;;  %v5939_v27 = vadd.f32 %v2579_v7, %v1421_v15  ;;  %vm2494_vm10 = vcmp.gt.f32.partialorder %v5934_v23, 1.0  ;;  %v3327_v8 = vld [vmem:[%s7375_s3 + $0x48] sm:$0xff] }
  0xd0   : > { %2238 = vmatpush.msrb.mxu2 %v592_v39  ;;  %3436 = vmatpush.msrb.mxu1 %v3346_v48  ;;  %v3331_v39 = vld [vmem:[%s7375_s3 + $0x68] sm:$0xff]  ;;  %v2476_v19 = vadd.f32 %v2468_v11, %v5683_v60  ;;  %v3330_v48 = vld [vmem:[%s7375_s3 + $0x60] sm:$0xff]  ;;  %v2607_v46 = vmul.f32 0.8, %v2527_v37  ;;  %v5989_v53 = vsel %vm2494_vm10, 1.0, %v7381_v12  ;;  %v3337_v37 = vld [vmem:[%s7375_s3 + $0x98] sm:$0xff] }
  0xd1   : > { %2179 = vmatpush.msrb.mxu3 %v525_v40  ;;  %2199 = vmatpush.msrb.mxu0 %v526_v34  ;;  %v5948_v40 = vadd.f32 %v2482_v20, %v2474_v10  ;;  %v3341_v34 = vld [vmem:[%s7375_s3 + $0xb8] sm:$0xff]  ;;  %v5962_v28 = vadd.f32 %v2574_v26, %v1321_v4  ;;  %v2595_v56 = vmul.f32 0.33333334, %v5939_v27  ;;  %v5984_v4 = vmul.f32 0.33333334, %v5713_v13  ;;  %v3339_v13 = vld [vmem:[%s7375_s3 + $0xa8] sm:$0xff] }
  0xd2   : > { %2239 = vmatpush.msrb.mxu2 %v528_v49  ;;  %3437 = vmatpush.msrb.mxu1 %v3345_v14  ;;  %v2531_v49 = vmul.f32 %v2523_v32, %v5847_v36  ;;  %v3329_v14 = vld [vmem:[%s7375_s3 + $0x58] sm:$0xff]  ;;  %v5972_v36 = vadd.f32 %v2484_v25, %v2476_v19  ;;  %v2615_v11 = vadd.f32 %v2607_v46, %v2599_v55  ;;  %v2518_v15 = vsub.f32 1.0, %v5989_v53  ;;  %v3338_v20 = vld [vmem:[%s7375_s3 + $0xa0] sm:$0xff]  ;;  %v3324_v55 = vld [vmem:[%s7375_s3 + $0x30] sm:$0xff] }
  0xd3   : > { %4546 = vmatmul.msk.f32.vlgmr.msrb.gmra.mxu3 %vm787_vm1, %v5496_v29  ;;  %4548 = vmatmul.msk.f32.vlgmr.msrb.gmra.mxu0 %vm787_vm1, %v5496_v29  ;;  %vm2498_vm11 = vcmp.gt.f32.partialorder %v5948_v40, 1.0  ;;  %v2603_v10 = vadd.f32 %v2595_v56, %v5683_v60  ;;  %v3326_v32 = vld [vmem:[%s7375_s3 + $0x40] sm:$0xff]  ;;  %v3325_v25 = vld [vmem:[%s7375_s3 + $0x38] sm:$0xff] }
  0xd4   : > { %4552 = vmatmul.msk.f32.vlgmr.msrb.gmra.mxu2 %vm787_vm1, %v5496_v29  ;;  %4553 = vmatpush.msk.msra.mxu3 %vm791_vm0, %v785_v62  ;;  %v6001_v9 = vsel %vm2498_vm11, 1.0, %v7381_v12  ;;  %vm2500_vm12 = vcmp.gt.f32.partialorder %v5972_v36, 1.0  ;;  %vm2623_vm13 = vcmp.gt.f32.partialorder %v2615_v11, 1.0 }
  0xd5   : > { %3392 = vmatpush.msra.mxu0 %v3333_v51  ;;  %3438 = vmatpush.msrb.mxu1 %v3344_v59  ;;  %v1301_v42 = vpop.f32.mrf.mxu3  ;;  %v5975_v62 = vpop.f32.mrf.mxu2  ;;  %v2590_v51 = vmul.f32 0.33333334, %v5962_v28  ;;  %v2611_v59 = vmul.f32 0.8, %v2531_v49  ;;  %v2522_v5 = vsub.f32 1.0, %v6001_v9 }
  0xd6   : > { %2256 = vmatpush.msra.mxu3 %v721_v1  ;;  %v5952_v44 = vadd.f32 %v2453_v61, %v1301_v42  ;;  %v3328_v1 = vld [vmem:[%s7375_s3 + $0x50] sm:$0xff] }
  0xd7   : > { %3393 = vmatpush.msra.mxu0 %v3332_v47  ;;  %3439 = vmatpush.msrb.mxu1 %v3343_v3  ;;  %v2535_v47 = vsub.f32 %v5883_v35, %v5984_v4  ;;  %v2703_v3 = vmul.f32 0.6666667, %v5900_v57  ;;  %v2598_v26 = vadd.f32 %v2590_v51, %v5683_v60  ;;  %v6030_v35 = vsel %vm2500_vm12, 1.0, %v7381_v12  ;;  %v3336_v42 = vld [vmem:[%s7375_s3 + $0x90] sm:$0xff] }
  0xd8   : > { %2257 = vmatpush.msra.mxu3 %v657_v17  ;;  %v2469_v58 = vmul.f32 0.33333334, %v5952_v44  ;;  %v1401_v43 = vpop.f32.mrf.mxu0  ;;  %v6032_v57 = vadd.f32 %v2611_v59, %v2603_v10  ;;  %v2524_v56 = vsub.f32 1.0, %v6030_v35 }
  0xd9   : > { %3394 = vmatpush.msra.mxu0 %v3331_v39  ;;  %3440 = vmatpush.msrb.mxu1 %v3342_v16  ;;  %v6010_v61 = vadd.f32 %v2578_v0, %v1401_v43  ;;  %v1501_v7 = vpop.f32.mrf.mxu1  ;;  %v6037_v39 = vsel %vm2623_vm13, 1.0, %v7381_v12  ;;  %v3334_v43 = vld [vmem:[%s7375_s3 + $0x80] sm:$0xff] }
  0xda   : > { %2258 = vmatpush.msra.mxu3 %v593_v21  ;;  %v2477_v17 = vadd.f32 %v2469_v58, %v5683_v60  ;;  %v2526_v21 = vmul.f32 %v2518_v15, %v5934_v23  ;;  %v6034_v23 = vadd.f32 %v2703_v3, %v1501_v7  ;;  %vm2627_vm14 = vcmp.gt.f32.partialorder %v6032_v57, 1.0 }
  0xdb   : > { %3395 = vmatpush.msra.mxu0 %v3330_v48  ;;  %3441 = vmatpush.msrb.mxu1 %v3341_v34  ;;  %v2594_v19 = vmul.f32 0.33333334, %v6010_v61  ;;  %v2543_v48 = vmul.f32 0.33333334, %v2535_v47  ;;  %v2647_v34 = vsub.f32 1.0, %v6037_v39  ;;  %v2532_v10 = vmul.f32 %v2524_v56, %v5972_v36 }
  0xdc   : > { %2259 = vmatpush.msra.mxu3 %v529_v50  ;;  %v2606_v49 = vmul.f32 0.8, %v2526_v21  ;;  %v2530_v50 = vmul.f32 %v2522_v5, %v5948_v40  ;;  %v2580_v58 = vmul.f32 0.6666667, %v5888_v38  ;;  %v3323_v40 = vld [vmem:[%s7375_s3 + $0x28] sm:$0xff]  ;;  %v6083_v15 = vsel %vm2627_vm14, 1.0, %v7381_v12 }
  0xdd   : > { %3396 = vmatpush.msra.mxu0 %v3329_v14  ;;  %4554 = vmatmul.msk.f32.vlgmr.msra.gmra.mxu3 %vm787_vm1, %v5496_v29  ;;  %v2485_v29 = vmul.f32 0.8, %v2413_v30  ;;  %v3335_v14 = vld [vmem:[%s7375_s3 + $0x88] sm:$0xff]  ;;  %v2719_v30 = vmul.f32 0.33333334, %v6034_v23  ;;  %v6071_v51 = vadd.f32 %v2543_v48, %v5984_v4  ;;  %v2655_v59 = vmul.f32 %v2647_v34, %v2615_v11 }
  0xde   : > { %3442 = vmatpush.msrb.mxu1 %v3340_v63  ;;  %v2614_v63 = vadd.f32 %v2606_v49, %v2598_v26  ;;  %v2414_v38 = vmul.f32 0.33333334, %v5796_v52  ;;  %v2702_v7 = vmul.f32 0.6666667, %v5962_v28  ;;  %v2707_v36 = vmul.f32 0.6666667, %v5939_v27 }
  0xdf   : > { %3397 = vmatpush.msra.mxu0 %v3328_v1  ;;  %v6044_v41 = vadd.f32 %v2485_v29, %v2477_v17  ;;  %v2602_v1 = vadd.f32 %v2594_v19, %v5683_v60  ;;  %v2727_v11 = vadd.f32 %v2719_v30, %v5683_v60  ;;  %v2735_v28 = vmul.f32 0.8, %v2655_v59  ;;  %v3319_v48 = vld [vmem:[%s7375_s3 + $0x8] sm:$0xff] }
  0xe0   : > { %3443 = vmatpush.msrb.mxu1 %v3339_v13  ;;  %v3322_v13 = vld [vmem:[%s7375_s3 + $0x20] sm:$0xff]  ;;  %vm2622_vm0 = vcmp.gt.f32.partialorder %v2614_v63, 1.0  ;;  %v2534_v27 = vsub.f32 %v5989_v53, %v2414_v38  ;;  %v2663_v19 = vsub.f32 %v6037_v39, %v6071_v51  ;;  %v2612_v49 = vmul.f32 0.8, %v2532_v10 }
  0xe1   : > { %3398 = vmatpush.msra.mxu0 %v3327_v8  ;;  %v6039_v16 = vpop.f32.mrf.mxu3  ;;  %v1441_v46 = vpop.f32.mrf.mxu2  ;;  %vm2501_vm15 = vcmp.gt.f32.partialorder %v6044_v41, 1.0  ;;  %v2610_v8 = vmul.f32 0.8, %v2530_v50  ;;  %v6100_v21 = vsel %vm2622_vm0, 1.0, %v7381_v12  ;;  %v2743_v53 = vadd.f32 %v2735_v28, %v2727_v11 }
  0xe2   : > { %7411 = vst [vmem:[#allocation5_spill] sm:$0xff] %v6039_v16  ;;  %3444 = vmatpush.msrb.mxu1 %v3338_v20  ;;  %v6074_v0 = vadd.f32 %v2580_v58, %v1441_v46  ;;  %v6088_v52 = vsel %vm2501_vm15, 1.0, %v7381_v12  ;;  %v3321_v20 = vld [vmem:[%s7375_s3 + $0x18] sm:$0xff]  ;;  %v2671_v30 = vmul.f32 0.33333334, %v2663_v19 }
  0xe3   : > { %3399 = vmatpush.msra.mxu0 %v3326_v32  ;;  %v6096_v47 = vadd.f32 %v2610_v8, %v2602_v1  ;;  %v2581_v32 = vmul.f32 0.6666667, %v5952_v44  ;;  %v2651_v44 = vsub.f32 1.0, %v6083_v15  ;;  %vm2751_vm2 = vcmp.gt.f32.partialorder %v2743_v53, 1.0 }
  0xe4   : > { %3445 = vmatpush.msrb.mxu1 %v3337_v37  ;;  %v1481_v29 = vpop.f32.mrf.mxu0  ;;  %v2596_v3 = vmul.f32 0.33333334, %v6074_v0  ;;  %v2679_v11 = vadd.f32 %v2671_v30, %v6071_v51 }
  0xe5   : > { %3400 = vmatpush.msra.mxu0 %v3325_v25  ;;  %v6105_v5 = vadd.f32 %v2702_v7, %v1481_v29  ;;  %v3320_v25 = vld [vmem:[%s7375_s3 + $0x10] sm:$0xff]  ;;  %vm2626_vm1 = vcmp.gt.f32.partialorder %v6096_v47, 1.0  ;;  %v2659_v58 = vmul.f32 %v2651_v44, %v6032_v57 }
  0xe6   : > { %3446 = vmatpush.msrb.mxu1 %v3336_v42  ;;  %v1581_v17 = vpop.f32.mrf.mxu1  ;;  %v2646_v42 = vsub.f32 1.0, %v6100_v21  ;;  %v2604_v34 = vadd.f32 %v2596_v3, %v5683_v60 }
  0xe7   : > { %3401 = vmatpush.msra.mxu0 %v3324_v55  ;;  %v6107_v26 = vadd.f32 %v2707_v36, %v1581_v17  ;;  %v2542_v55 = vmul.f32 0.33333334, %v2534_v27  ;;  %v2718_v56 = vmul.f32 0.33333334, %v6105_v5  ;;  %v2706_v17 = vmul.f32 0.6666667, %v6010_v61 }
  0xe8   : > { %3447 = vmatpush.msrb.mxu1 %v3335_v14  ;;  %v3318_v14 = vld [vmem:[%s7375_s3] sm:$0xff]  ;;  %v2654_v1 = vmul.f32 %v2646_v42, %v2614_v63  ;;  %v2620_v59 = vadd.f32 %v2612_v49, %v2604_v34  ;;  %v2739_v36 = vmul.f32 0.8, %v2659_v58  ;;  %v2831_v61 = vmul.f32 0.6666667, %v6034_v23 }
  0xe9   : > { %3402 = vmatpush.msra.mxu0 %v3323_v40  ;;  %v2723_v46 = vmul.f32 0.33333334, %v6107_v26  ;;  %v6133_v40 = vsel %vm2626_vm1, 1.0, %v7381_v12  ;;  %v2550_v8 = vadd.f32 %v2542_v55, %v2414_v38  ;;  %v2726_v29 = vadd.f32 %v2718_v56, %v5683_v60 }
  0xea   : > { %3448 = vmatpush.msrb.mxu1 %v3334_v43  ;;  %v1461_v37 = vpop.f32.mrf.mxu3  ;;  %v2650_v63 = vsub.f32 1.0, %v6133_v40  ;;  %v2734_v3 = vmul.f32 0.8, %v2654_v1  ;;  %vm2628_vm3 = vcmp.gt.f32.partialorder %v2620_v59, 1.0  ;;  %v2708_v34 = vmul.f32 0.6666667, %v6074_v0 }
  0xeb   : > { %3403 = vmatpush.msra.mxu0 %v3322_v13  ;;  %3449 = vmatmul.f32.vlgmr.msrb.gmra.mxu1 %v5984_v4  ;;  %v2525_v4 = vsub.f32 1.0, %v6088_v52  ;;  %v6122_v50 = vadd.f32 %v2581_v32, %v1461_v37  ;;  %v6124_v39 = vpop.f32.mrf.mxu2  ;;  %v2731_v57 = vadd.f32 %v2723_v46, %v5683_v60  ;;  %v6157_v49 = vsel %vm2628_vm3, 1.0, %v7381_v12 }
  0xec   : > { %v2658_v42 = vmul.f32 %v2650_v63, %v6096_v47  ;;  %v2830_v58 = vmul.f32 0.6666667, %v6105_v5  ;;  %v2652_v0 = vsub.f32 1.0, %v6157_v49  ;;  %v2835_v5 = vmul.f32 0.6666667, %v6107_v26 }
  0xed   : > { %3404 = vmatpush.msra.mxu0 %v3321_v20  ;;  %v2533_v43 = vmul.f32 %v2525_v4, %v6044_v41  ;;  %v2597_v13 = vmul.f32 0.33333334, %v6122_v50  ;;  %v4580_v41 = vsel %vm2751_vm2, 1.0, %v7381_v12  ;;  %v2662_v20 = vsub.f32 %v6100_v21, %v2550_v8 }
  0xee   : > { %v2791_v37 = vsub.f32 %v4580_v41, %v2679_v11  ;;  %v2775_v19 = vsub.f32 1.0, %v4580_v41  ;;  %v2709_v26 = vmul.f32 0.6666667, %v6122_v50 }
  0xef   : > { %3405 = vmatpush.msra.mxu0 %v3320_v25  ;;  %v2605_v28 = vadd.f32 %v2597_v13, %v5683_v60  ;;  %v2613_v27 = vmul.f32 0.8, %v2533_v43  ;;  %v2738_v43 = vmul.f32 0.8, %v2658_v42 }
  0xf0   : > { %v1561_v10 = vpop.f32.mrf.mxu0  ;;  %v2799_v56 = vmul.f32 0.33333334, %v2791_v37  ;;  %v2783_v30 = vmul.f32 %v2775_v19, %v2743_v53 }
  0xf1   : > { %3406 = vmatpush.msra.mxu0 %v3319_v48  ;;  %v6145_v32 = vadd.f32 %v2706_v17, %v1561_v10  ;;  %v2670_v48 = vmul.f32 0.33333334, %v2662_v20  ;;  %v2621_v23 = vadd.f32 %v2613_v27, %v2605_v28  ;;  %v2660_v20 = vmul.f32 %v2652_v0, %v2620_v59 }
  0xf2   : > { %v1661_v7 = vpop.f32.mrf.mxu1  ;;  %v2807_v63 = vadd.f32 %v2799_v56, %v2679_v11 }
  0xf3   : > { %3407 = vmatpush.msra.mxu0 %v3318_v14  ;;  %3452 = vmatmul.f32.gmra.mxu1 %v6071_v51  ;;  %v2722_v25 = vmul.f32 0.33333334, %v6145_v32  ;;  %v2742_v51 = vadd.f32 %v2734_v3, %v2726_v29  ;;  %v6150_v44 = vadd.f32 %v2831_v61, %v1661_v7  ;;  %v2678_v1 = vadd.f32 %v2670_v48, %v2550_v8 }
  0xf4   : > { %3408 = vmatmul.f32.vlgmr.msra.gmra.mxu0 %v2414_v38  ;;  %v2747_v38 = vadd.f32 %v2739_v36, %v2731_v57  ;;  %vm2629_vm6 = vcmp.gt.f32.partialorder %v2621_v23, 1.0  ;;  %v2863_v7 = vmul.f32 0.8, %v2783_v30  ;;  %v2740_v42 = vmul.f32 0.8, %v2660_v20 }
  0xf5   : > { %v2847_v55 = vmul.f32 0.33333334, %v6150_v44  ;;  %vm2750_vm4 = vcmp.gt.f32.partialorder %v2742_v51, 1.0  ;;  %v2730_v46 = vadd.f32 %v2722_v25, %v5683_v60  ;;  %v6178_v27 = vsel %vm2629_vm6, 1.0, %v7381_v12 }
  0xf6   : > { %v6152_v4 = vpop.f32.mrf.mxu3  ;;  %vm2755_vm5 = vcmp.gt.f32.partialorder %v2747_v38, 1.0  ;;  %v4579_v13 = vsel %vm2750_vm4, 1.0, %v7381_v12 }
  0xf7   : > { %7412 = vst [vmem:[#allocation6_spill] sm:$0xff] %v6152_v4  ;;  %v1601_v21 = vpop.f32.mrf.mxu2  ;;  %v6167_v10 = vsel %vm2755_vm5, 1.0, %v7381_v12  ;;  %v2855_v29 = vadd.f32 %v2847_v55, %v5683_v60  ;;  %v2746_v53 = vadd.f32 %v2738_v43, %v2730_v46  ;;  %v2790_v36 = vsub.f32 %v4579_v13, %v2678_v1 }
  0xf8   : > { %v6161_v14 = vadd.f32 %v2708_v34, %v1601_v21  ;;  %v2779_v28 = vsub.f32 1.0, %v6167_v10  ;;  %v2653_v21 = vsub.f32 1.0, %v6178_v27 }
  0xf9   : > { %v2871_v61 = vadd.f32 %v2863_v7, %v2855_v29  ;;  %vm2754_vm7 = vcmp.gt.f32.partialorder %v2746_v53, 1.0  ;;  %v2798_v19 = vmul.f32 0.33333334, %v2790_v36 }
  0xfa   : > { %v2724_v41 = vmul.f32 0.33333334, %v6161_v14  ;;  %v2787_v56 = vmul.f32 %v2779_v28, %v2747_v38  ;;  %v6190_v46 = vsel %vm2754_vm7, 1.0, %v7381_v12 }
  0xfb   : > { %3455 = vmatmul.f32.gmra.mxu1 %v2679_v11  ;;  %vm2879_vm8 = vcmp.gt.f32.partialorder %v2871_v61, 1.0  ;;  %v2806_v0 = vadd.f32 %v2798_v19, %v2678_v1  ;;  %v2778_v7 = vsub.f32 1.0, %v6190_v46  ;;  %v2836_v19 = vmul.f32 0.6666667, %v6161_v14 }
  0xfc   : > { %3411 = vmatmul.f32.gmra.mxu0 %v2550_v8  ;;  %v1641_v47 = vpop.f32.mrf.mxu0  ;;  %v2774_v8 = vsub.f32 1.0, %v4579_v13  ;;  %v2732_v25 = vadd.f32 %v2724_v41, %v5683_v60 }
  0xfd   : > { %v6170_v57 = vadd.f32 %v2830_v58, %v1641_v47  ;;  %v2834_v58 = vmul.f32 0.6666667, %v6145_v32 }
  0xfe   : > { %v1741_v17 = vpop.f32.mrf.mxu1  ;;  %v2782_v59 = vmul.f32 %v2774_v8, %v2742_v51  ;;  %v2748_v50 = vadd.f32 %v2740_v42, %v2732_v25  ;;  %v4588_v51 = vsel %vm2879_vm8, 1.0, %v7381_v12 }
  0xff   : > { %v6174_v3 = vadd.f32 %v2835_v5, %v1741_v17  ;;  %v2846_v37 = vmul.f32 0.33333334, %v6170_v57  ;;  %v2919_v13 = vsub.f32 %v4588_v51, %v2807_v63  ;;  %v2661_v17 = vmul.f32 %v2653_v21, %v2621_v23 }
 0x100   : > { %v2862_v43 = vmul.f32 0.8, %v2782_v59  ;;  %v2959_v5 = vmul.f32 0.6666667, %v6150_v44  ;;  %v2903_v36 = vsub.f32 1.0, %v4588_v51  ;;  %vm2756_vm9 = vcmp.gt.f32.partialorder %v2748_v50, 1.0 }
 0x101   : > { %v2851_v48 = vmul.f32 0.33333334, %v6174_v3  ;;  %v2854_v30 = vadd.f32 %v2846_v37, %v5683_v60  ;;  %v2927_v20 = vmul.f32 0.33333334, %v2919_v13  ;;  %v2867_v37 = vmul.f32 0.8, %v2787_v56 }
 0x102   : > { %v1621_v11 = vpop.f32.mrf.mxu3  ;;  %v2786_v59 = vmul.f32 %v2778_v7, %v2746_v53  ;;  %v6210_v21 = vsel %vm2756_vm9, 1.0, %v7381_v12  ;;  %v2911_v42 = vmul.f32 %v2903_v36, %v2871_v61 }
 0x103   : > { %3458 = vmatmul.f32.gmra.mxu1 %v2807_v63  ;;  %v6185_v34 = vadd.f32 %v2709_v26, %v1621_v11  ;;  %v6187_v55 = vpop.f32.mrf.mxu2  ;;  %v2859_v38 = vadd.f32 %v2851_v48, %v5683_v60  ;;  %v2870_v8 = vadd.f32 %v2862_v43, %v2854_v30  ;;  %v6204_v23 = vadd.f32 %v2927_v20, %v2807_v63 }
 0x104   : > { %3414 = vmatmul.f32.gmra.mxu0 %v2678_v1  ;;  %v2741_v26 = vmul.f32 0.8, %v2661_v17  ;;  %v2780_v14 = vsub.f32 1.0, %v6210_v21  ;;  %v2991_v43 = vmul.f32 0.8, %v2911_v42 }
 0x105   : > { %v2725_v47 = vmul.f32 0.33333334, %v6185_v34  ;;  %v2875_v25 = vadd.f32 %v2867_v37, %v2859_v38  ;;  %vm2878_vm10 = vcmp.gt.f32.partialorder %v2870_v8, 1.0  ;;  %v2963_v37 = vmul.f32 0.6666667, %v6174_v3 }
 0x106   : > { %v4587_v51 = vsel %vm2878_vm10, 1.0, %v7381_v12 }
 0x107   : > { %v2733_v32 = vadd.f32 %v2725_v47, %v5683_v60  ;;  %vm2883_vm11 = vcmp.gt.f32.partialorder %v2875_v25, 1.0  ;;  %v2902_v13 = vsub.f32 1.0, %v4587_v51  ;;  %v2918_v61 = vsub.f32 %v4587_v51, %v2806_v0 }
 0x108   : > { %v1721_v29 = vpop.f32.mrf.mxu0  ;;  %v6223_v17 = vsel %vm2883_vm11, 1.0, %v7381_v12 }
 0x109   : > { %v6197_v41 = vadd.f32 %v2834_v58, %v1721_v29  ;;  %v2749_v48 = vadd.f32 %v2741_v26, %v2733_v32  ;;  %v2866_v58 = vmul.f32 0.8, %v2786_v59  ;;  %v2958_v29 = vmul.f32 0.6666667, %v6170_v57 }
 0x10a   : > { %v1821_v28 = vpop.f32.mrf.mxu1  ;;  %v2926_v7 = vmul.f32 0.33333334, %v2918_v61  ;;  %v2788_v32 = vmul.f32 %v2780_v14, %v2748_v50  ;;  %v2910_v57 = vmul.f32 %v2902_v13, %v2870_v8  ;;  %v2907_v59 = vsub.f32 1.0, %v6223_v17 }
 0x10b   : > { %v6202_v1 = vadd.f32 %v2959_v5, %v1821_v28  ;;  %v2850_v11 = vmul.f32 0.33333334, %v6197_v41  ;;  %3461 = vmatmul.f32.gmra.mxu1 %v6204_v23  ;;  %vm2757_vm12 = vcmp.gt.f32.partialorder %v2749_v48, 1.0 }
 0x10c   : > { %3417 = vmatmul.f32.gmra.mxu0 %v2806_v0  ;;  %v6232_v26 = vadd.f32 %v2926_v7, %v2806_v0 }
 0x10d   : > { %v2975_v44 = vmul.f32 0.33333334, %v6202_v1  ;;  %v2858_v63 = vadd.f32 %v2850_v11, %v5683_v60  ;;  %v6230_v11 = vsel %vm2757_vm12, 1.0, %v7381_v12 }
 0x10e   : > { %v6215_v47 = vpop.f32.mrf.mxu3  ;;  %v2781_v51 = vsub.f32 1.0, %v6230_v11 }
 0x10f   : > { %v1761_v56 = vpop.f32.mrf.mxu2  ;;  %v2983_v30 = vadd.f32 %v2975_v44, %v5683_v60  ;;  %7413 = vst [vmem:[#allocation7_spill] sm:$0xff] %v6215_v47  ;;  %v2874_v38 = vadd.f32 %v2866_v58, %v2858_v63  ;;  %v2990_v63 = vmul.f32 0.8, %v2910_v57  ;;  %v2868_v58 = vmul.f32 0.8, %v2788_v32 }
 0x110   : > { %v6219_v53 = vadd.f32 %v2836_v19, %v1761_v56  ;;  %v2837_v56 = vmul.f32 0.6666667, %v6185_v34  ;;  %v2789_v57 = vmul.f32 %v2781_v51, %v2749_v48  ;;  %v3087_v48 = vmul.f32 0.6666667, %v6202_v1 }
 0x111   : > { %v2999_v5 = vadd.f32 %v2991_v43, %v2983_v30  ;;  %vm2882_vm13 = vcmp.gt.f32.partialorder %v2874_v38, 1.0  ;;  %v2915_v43 = vmul.f32 %v2907_v59, %v2875_v25  ;;  %v2962_v25 = vmul.f32 0.6666667, %v6197_v41 }
 0x112   : > { %v2852_v20 = vmul.f32 0.33333334, %v6219_v53  ;;  %v6247_v34 = vsel %vm2882_vm13, 1.0, %v7381_v12  ;;  %v7414_v41 = vmov 0.0  }
 0x113   : > { %vm3007_vm14 = vcmp.gt.f32.partialorder %v2999_v5, 1.0 }
 0x114   : > { %v1801_v36 = vpop.f32.mrf.mxu0  ;;  %3420 = vmatmul.f32.gmra.mxu0 %v6232_v26  ;;  %v2860_v3 = vadd.f32 %v2852_v20, %v5683_v60  ;;  %v4596_v8 = vsel %vm3007_vm14, 1.0, %v7381_v12  ;;  %v2995_v12 = vmul.f32 0.8, %v2915_v43 }
 0x115   : > { %v6226_v28 = vadd.f32 %v2958_v29, %v1801_v36  ;;  %v3047_v14 = vsub.f32 %v4596_v8, %v6204_v23  ;;  %v3031_v32 = vsub.f32 1.0, %v4596_v8 }
 0x116   : > { %v1901_v44 = vpop.f32.mrf.mxu1  ;;  %v2876_v7 = vadd.f32 %v2868_v58, %v2860_v3 }
 0x117   : > { %v2974_v19 = vmul.f32 0.33333334, %v6226_v28  ;;  %v6236_v42 = vadd.f32 %v2963_v37, %v1901_v44  ;;  %v3055_v29 = vmul.f32 0.33333334, %v3047_v14  ;;  %v3039_v8 = vmul.f32 %v3031_v32, %v2999_v5 }
 0x118   : > { %vm2884_vm0 = vcmp.gt.f32.partialorder %v2876_v7, 1.0 }
 0x119   : > { %v2982_v50 = vadd.f32 %v2974_v19, %v5683_v60  ;;  %v2979_v0 = vmul.f32 0.33333334, %v6236_v42  ;;  %v6256_v44 = vadd.f32 %v3055_v29, %v6204_v23  ;;  %v2906_v19 = vsub.f32 1.0, %v6247_v34 }
 0x11a   : > { %v1781_v30 = vpop.f32.mrf.mxu3  ;;  %v2869_v23 = vmul.f32 0.8, %v2789_v57  ;;  %v6270_v58 = vsel %vm2884_vm0, 1.0, %v7414_v41 }
 0x11b   : > { %v6249_v13 = vadd.f32 %v2837_v56, %v1781_v30  ;;  %v2998_v61 = vadd.f32 %v2990_v63, %v2982_v50  ;;  %v2987_v36 = vadd.f32 %v2979_v0, %v5683_v60  ;;  %v6253_v37 = vpop.f32.mrf.mxu2  ;;  %3464 = vmatmul.f32.gmra.mxu1 %v6256_v44  ;;  %v2914_v0 = vmul.f32 %v2906_v19, %v2874_v38 }
 0x11c   : > { %v2908_v19 = vsub.f32 1.0, %v6270_v58 }
 0x11d   : > { %v2853_v20 = vmul.f32 0.33333334, %v6249_v13  ;;  %vm3006_vm15 = vcmp.gt.f32.partialorder %v2998_v61, 1.0  ;;  %v3003_v3 = vadd.f32 %v2995_v12, %v2987_v36  ;;  %v2964_v12 = vmul.f32 0.6666667, %v6219_v53 }
 0x11e   : > { %v4595_v14 = vsel %vm3006_vm15, 1.0, %v7414_v41  ;;  %v2994_v36 = vmul.f32 0.8, %v2914_v0  ;;  %v2916_v47 = vmul.f32 %v2908_v19, %v2876_v7 }
 0x11f   : > { %v2861_v59 = vadd.f32 %v2853_v20, %v5683_v60  ;;  %vm3011_vm1 = vcmp.gt.f32.partialorder %v3003_v3, 1.0  ;;  %v3046_v38 = vsub.f32 %v4595_v14, %v6232_v26  ;;  %v3119_v20 = vmul.f32 0.8, %v3039_v8 }
 0x120   : > { %v1881_v56 = vpop.f32.mrf.mxu0  ;;  %v6279_v32 = vsel %vm3011_vm1, 1.0, %v7414_v41 }
 0x121   : > { %v6262_v50 = vadd.f32 %v2962_v25, %v1881_v56  ;;  %v2877_v43 = vadd.f32 %v2869_v23, %v2861_v59  ;;  %v3054_v59 = vmul.f32 0.33333334, %v3046_v38 }
 0x122   : > { %v1981_v63 = vpop.f32.mrf.mxu1 }
 0x123   : > { %v2978_v30 = vmul.f32 0.33333334, %v6262_v50  ;;  %v6266_v51 = vadd.f32 %v3087_v48, %v1981_v63  ;;  %vm2885_vm2 = vcmp.gt.f32.partialorder %v2877_v43, 1.0  ;;  %v3030_v48 = vsub.f32 1.0, %v4595_v14 }
 0x124   : > { %v3062_v63 = vadd.f32 %v3054_v59, %v6232_v26  ;;  %v6289_v8 = vsel %vm2885_vm2, 1.0, %v7414_v41  ;;  %v2965_v59 = vmul.f32 0.6666667, %v6249_v13 }
 0x125   : > { %v3103_v29 = vmul.f32 0.33333334, %v6266_v51  ;;  %v2986_v1 = vadd.f32 %v2978_v30, %v5683_v60  ;;  %v3035_v30 = vsub.f32 1.0, %v6279_v32  ;;  %v2909_v26 = vsub.f32 1.0, %v6289_v8 }
 0x126   : > { %v6281_v25 = vpop.f32.mrf.mxu3  ;;  %3423 = vmatmul.f32.gmra.mxu0 %v3062_v63 }
 0x127   : > { %v3111_v5 = vadd.f32 %v3103_v29, %v5683_v60  ;;  %v1921_v57 = vpop.f32.mrf.mxu2  ;;  %7415 = vst [vmem:[#allocation8_spill] sm:$0xff] %v6281_v25  ;;  %v3002_v23 = vadd.f32 %v2994_v36, %v2986_v1  ;;  %v3086_v29 = vmul.f32 0.6666667, %v6226_v28  ;;  %v3091_v1 = vmul.f32 0.6666667, %v6236_v42 }
 0x128   : > { %v6283_v53 = vadd.f32 %v2964_v12, %v1921_v57  ;;  %v3043_v28 = vmul.f32 %v3035_v30, %v3003_v3  ;;  %v2917_v25 = vmul.f32 %v2909_v26, %v2877_v43 }
 0x129   : > { %v3127_v56 = vadd.f32 %v3119_v20, %v3111_v5  ;;  %v3038_v5 = vmul.f32 %v3030_v48, %v2998_v61  ;;  %vm3010_vm4 = vcmp.gt.f32.partialorder %v3002_v23, 1.0  ;;  %v2996_v61 = vmul.f32 0.8, %v2916_v47 }
 0x12a   : > { %v2980_v0 = vmul.f32 0.33333334, %v6283_v53  ;;  %v3123_v13 = vmul.f32 0.8, %v3043_v28  ;;  %v2997_v43 = vmul.f32 0.8, %v2917_v25 }
 0x12b   : > { %vm3135_vm3 = vcmp.gt.f32.partialorder %v3127_v56, 1.0 }
 0x12c   : > { %v1961_v12 = vpop.f32.mrf.mxu0  ;;  %v4604_v38 = vsel %vm3135_vm3, 1.0, %v7414_v41  ;;  %v2988_v36 = vadd.f32 %v2980_v0, %v5683_v60 }
 0x12d   : > { %v6293_v14 = vadd.f32 %v3086_v29, %v1961_v12  ;;  %v3175_v57 = vsub.f32 %v4604_v38, %v6256_v44  ;;  %v6304_v29 = vsel %vm3010_vm4, 1.0, %v7414_v41  ;;  %v3118_v12 = vmul.f32 0.8, %v3038_v5 }
 0x12e   : > { %v2061_v20 = vpop.f32.mrf.mxu1  ;;  %v3004_v4 = vadd.f32 %v2996_v61, %v2988_v36  ;;  %v3159_v36 = vsub.f32 1.0, %v4604_v38  ;;  %v3090_v61 = vmul.f32 0.6666667, %v6262_v50 }
 0x12f   : > { %v3102_v7 = vmul.f32 0.33333334, %v6293_v14  ;;  %v6300_v19 = vadd.f32 %v3091_v1, %v2061_v20  ;;  %v3183_v48 = vmul.f32 0.33333334, %v3175_v57  ;;  %v3034_v20 = vsub.f32 1.0, %v6304_v29 }
 0x130   : > { %vm3012_vm6 = vcmp.gt.f32.partialorder %v3004_v4, 1.0  ;;  %v3167_v45 = vmul.f32 %v3159_v36, %v3127_v56 }
 0x131   : > { %v3110_v42 = vadd.f32 %v3102_v7, %v5683_v60  ;;  %v3107_v0 = vmul.f32 0.33333334, %v6300_v19  ;;  %v6309_v3 = vadd.f32 %v3183_v48, %v6256_v44  ;;  %v3215_v48 = vmul.f32 0.6666667, %v6266_v51 }
 0x132   : > { %v1941_v16 = vpop.f32.mrf.mxu3  ;;  %v3247_v36 = vmul.f32 0.8, %v3167_v45 }
 0x133   : > { %v3126_v30 = vadd.f32 %v3118_v12, %v3110_v42  ;;  %v3115_v1 = vadd.f32 %v3107_v0, %v5683_v60  ;;  %v2973_v47 = vadd.f32 %v2965_v59, %v1941_v16  ;;  %3467 = vmatmul.f32.gmra.mxu1 %v6309_v3  ;;  %v6314_v5 = vpop.f32.mrf.mxu2  ;;  %v3042_v16 = vmul.f32 %v3034_v20, %v3002_v23 }
 0x134   : > { %7416 = vst [vmem:[#allocation9_spill] sm:$0xff] %v6314_v5  ;;  %v6321_v42 = vsel %vm3012_vm6, 1.0, %v7414_v41  ;;  %v3092_v23 = vmul.f32 0.6666667, %v6283_v53  ;;  %vm3482_vm6 = vcmask 523264  }
 0x135   : > { %v3131_v57 = vadd.f32 %v3123_v13, %v3115_v1  ;;  %v2981_v7 = vmul.f32 0.33333334, %v2973_v47  ;;  %vm3134_vm5 = vcmp.gt.f32.partialorder %v3126_v30, 1.0  ;;  %v3036_v50 = vsub.f32 1.0, %v6321_v42 }
 0x136   : > { %v4603_v26 = vsel %vm3134_vm5, 1.0, %v7414_v41  ;;  %v3122_v20 = vmul.f32 0.8, %v3042_v16 }
 0x137   : > { %v2989_v44 = vadd.f32 %v2981_v7, %v5683_v60  ;;  %v3174_v28 = vsub.f32 %v4603_v26, %v3062_v63  ;;  %vm3139_vm7 = vcmp.gt.f32.partialorder %v3131_v57, 1.0 }
 0x138   : > { %v2041_v59 = vpop.f32.mrf.mxu0 }
 0x139   : > { %v3005_v12 = vadd.f32 %v2997_v43, %v2989_v44  ;;  %v6323_v0 = vadd.f32 %v3090_v61, %v2041_v59  ;;  %v3182_v1 = vmul.f32 0.33333334, %v3174_v28  ;;  %v6333_v43 = vsel %vm3139_vm7, 1.0, %v7414_v41 }
 0x13a   : > { %v2141_v25 = vpop.f32.mrf.mxu1  ;;  %v3044_v61 = vmul.f32 %v3036_v50, %v3004_v4  ;;  %v3163_v16 = vsub.f32 1.0, %v6333_v43 }
 0x13b   : > { %v3106_v13 = vmul.f32 0.33333334, %v6323_v0  ;;  %v3223_v7 = vadd.f32 %v3215_v48, %v2141_v25  ;;  %v6326_v38 = vadd.f32 %v3182_v1, %v3062_v63  ;;  %vm3013_vm8 = vcmp.gt.f32.partialorder %v3005_v12, 1.0 }
 0x13c   : > { %v3158_v48 = vsub.f32 1.0, %v4603_v26  ;;  %v6340_v25 = vsel %vm3013_vm8, 1.0, %v7414_v41  ;;  %v3124_v45 = vmul.f32 0.8, %v3044_v61  ;;  %v6349_v61 = vmul.f32 0.33333334, %v5838_v22 }
 0x13d   : > { %v3114_v51 = vadd.f32 %v3106_v13, %v5683_v60  ;;  %v3231_v5 = vmul.f32 0.33333334, %v3223_v7  ;;  %3426 = vmatmul.f32.gmra.mxu0 %v6326_v38  ;;  %v3214_v13 = vmul.f32 0.6666667, %v6293_v14 }
 0x13e   : > { %v6336_v28 = vpop.f32.mrf.mxu3  ;;  %v3166_v50 = vmul.f32 %v3158_v48, %v3126_v30 }
 0x13f   : > { %v3130_v44 = vadd.f32 %v3122_v20, %v3114_v51  ;;  %v3239_v56 = vadd.f32 %v3231_v5, %v5683_v60  ;;  %v2081_v63 = vpop.f32.mrf.mxu2  ;;  %7417 = vst [vmem:[#allocation10_spill] sm:$0xff] %v6336_v28  ;;  %v3037_v20 = vsub.f32 1.0, %v6340_v25 }
 0x140   : > { %v3100_v59 = vadd.f32 %v3092_v23, %v2081_v63  ;;  %v3219_v23 = vmul.f32 0.6666667, %v6300_v19  ;;  %v3171_v63 = vmul.f32 %v3163_v16, %v3131_v57  ;;  %v3246_v48 = vmul.f32 0.8, %v3166_v50 }
 0x141   : > { %v3255_v53 = vadd.f32 %v3247_v36, %v3239_v56  ;;  %vm3138_vm10 = vcmp.gt.f32.partialorder %v3130_v44, 1.0  ;;  %v3045_v57 = vmul.f32 %v3037_v20, %v3005_v12  ;;  %v3218_v20 = vmul.f32 0.6666667, %v6323_v0 }
 0x142   : > { %v3108_v1 = vmul.f32 0.33333334, %v3100_v59 }
 0x143   : > { %vm3263_vm9 = vcmp.gt.f32.partialorder %v3255_v53, 1.0  ;;  %v3093_v53 = vmul.f32 0.6666667, %v2973_v47  ;;  %v2538_v47 = vsub.f32 %v6001_v9, %v6349_v61  ;;  %v3125_v12 = vmul.f32 0.8, %v3045_v57 }
 0x144   : > { %v3116_v5 = vadd.f32 %v3108_v1, %v5683_v60  ;;  %v2121_v7 = vpop.f32.mrf.mxu0  ;;  %v4612_v4 = vsel %vm3263_vm9, 1.0, %v7414_v41 }
 0x145   : > { %v3222_v51 = vadd.f32 %v3214_v13, %v2121_v7  ;;  %v3287_v26 = vsub.f32 %v4612_v4, %v6309_v3  ;;  %v6354_v7 = vsel %vm3138_vm10, 1.0, %v7414_v41 }
 0x146   : > { %v3132_v56 = vadd.f32 %v3124_v45, %v3116_v5  ;;  %v2221_v36 = vpop.f32.mrf.mxu1  ;;  %v3251_v5 = vmul.f32 0.8, %v3171_v63 }
 0x147   : > { %v3230_v14 = vmul.f32 0.33333334, %v3222_v51  ;;  %v3227_v28 = vadd.f32 %v3219_v23, %v2221_v36  ;;  %v3295_v1 = vmul.f32 0.33333334, %v3287_v26  ;;  %v6365_v23 = vmul.f32 0.33333334, %v5920_v6 }
 0x148   : > { %vm3140_vm12 = vcmp.gt.f32.partialorder %v3132_v56, 1.0  ;;  %v2546_v26 = vmul.f32 0.33333334, %v2538_v47 }
 0x149   : > { %v3238_v30 = vadd.f32 %v3230_v14, %v5683_v60  ;;  %v3235_v13 = vmul.f32 0.33333334, %v3227_v28  ;;  %v3303_v19 = vadd.f32 %v3295_v1, %v6309_v3  ;;  %v3162_v3 = vsub.f32 1.0, %v6354_v7 }
 0x14a   : > { %v2101_v45 = vpop.f32.mrf.mxu3  ;;  %v6372_v14 = vsel %vm3140_vm12, 1.0, %v7414_v41 }
 0x14b   : > { %v3254_v16 = vadd.f32 %v3246_v48, %v3238_v30  ;;  %v3243_v4 = vadd.f32 %v3235_v13, %v5683_v60  ;;  %v3101_v22 = vadd.f32 %v3093_v53, %v2101_v45  ;;  %3470 = vmatmul.f32.gmra.mxu1 %v3303_v19  ;;  %v6361_v50 = vpop.f32.mrf.mxu2  ;;  %v3170_v30 = vmul.f32 %v3162_v3, %v3130_v44 }
 0x14c   : > { %v6375_v13 = vadd.f32 %v2546_v26, %v6349_v61  ;;  %v2541_v19 = vsub.f32 %v6088_v52, %v6365_v23  ;;  %v3164_v0 = vsub.f32 1.0, %v6372_v14  ;;  %v3220_v45 = vmul.f32 0.6666667, %v3100_v59 }
 0x14d   : > { %vm3262_vm11 = vcmp.gt.f32.partialorder %v3254_v16, 1.0  ;;  %v6359_v51 = vadd.f32 %v3251_v5, %v3243_v4  ;;  %v3109_v28 = vmul.f32 0.33333334, %v3101_v22  ;;  %v3250_v44 = vmul.f32 0.8, %v3170_v30 }
 0x14e   : > { %v4611_v36 = vsel %vm3262_vm11, 1.0, %v7414_v41  ;;  %v2666_v57 = vsub.f32 %v6133_v40, %v6375_v13  ;;  %v3172_v26 = vmul.f32 %v3164_v0, %v3132_v56  ;;  %v3221_v30 = vmul.f32 0.6666667, %v3101_v22 }
 0x14f   : > { %v3117_v9 = vadd.f32 %v3109_v28, %v5683_v60  ;;  %v3286_v53 = vsub.f32 %v4611_v36, %v6326_v38  ;;  %v2549_v28 = vmul.f32 0.33333334, %v2541_v19  ;;  %vm3267_vm1 = vcmp.gt.f32.partialorder %v6359_v51, 1.0 }
 0x150   : > { %v2201_v63 = vpop.f32.mrf.mxu0 }
 0x151   : > { %v3133_v1 = vadd.f32 %v3125_v12, %v3117_v9  ;;  %v3226_v48 = vadd.f32 %v3218_v20, %v2201_v63  ;;  %v3294_v6 = vmul.f32 0.33333334, %v3286_v53  ;;  %v2674_v12 = vmul.f32 0.33333334, %v2666_v57 }
 0x152   : > { %v6389_v59 = vadd.f32 %v2549_v28, %v6365_v23  ;;  %v3252_v63 = vmul.f32 0.8, %v3172_v26 }
 0x153   : > { %v3234_v5 = vmul.f32 0.33333334, %v3226_v48  ;;  %v3302_v47 = vadd.f32 %v3294_v6, %v6326_v38  ;;  %vm3141_vm13 = vcmp.gt.f32.partialorder %v3133_v1, 1.0  ;;  %v6398_v53 = vadd.f32 %v2674_v12, %v6375_v13 }
 0x154   : > { %v6392_v38 = vsel %vm3141_vm13, 1.0, %v7414_v41  ;;  %v2669_v20 = vsub.f32 %v6178_v27, %v6389_v59  ;;  %v6406_v27 = vmul.f32 0.33333334, %v5746_v31 }
 0x155   : > { %v3242_v16 = vadd.f32 %v3234_v5, %v5683_v60  ;;  %3429 = vmatmul.f32.gmra.mxu0 %v3302_v47  ;;  %v3165_v56 = vsub.f32 1.0, %v6392_v38  ;;  %v2794_v6 = vsub.f32 %v6190_v46, %v6398_v53 }
 0x156   : > { %v6384_v4 = vpop.f32.mrf.mxu3  ;;  %v2677_v19 = vmul.f32 0.33333334, %v2669_v20  ;;  %v2539_v22 = vsub.f32 %v5898_v2, %v6406_v27  ;;  %v6427_v2 = vmul.f32 0.33333334, %v5858_v24 }
 0x157   : > { %v6386_v3 = vadd.f32 %v3250_v44, %v3242_v16  ;;  %v2241_v52 = vpop.f32.mrf.mxu2  ;;  %v3173_v0 = vmul.f32 %v3165_v56, %v3133_v1  ;;  %v2802_v47 = vmul.f32 0.33333334, %v2794_v6 }
 0x158   : > { %v3228_v9 = vadd.f32 %v3220_v45, %v2241_v52  ;;  %v6409_v16 = vadd.f32 %v2677_v19, %v6389_v59  ;;  %v2547_v31 = vmul.f32 0.33333334, %v2539_v22  ;;  %7419 = vst [vmem:[#allocation12_spill] sm:$0xff] %v6427_v2 }
 0x159   : > { %v3253_v28 = vmul.f32 0.8, %v3173_v0  ;;  %v6417_v1 = vadd.f32 %v2802_v47, %v6398_v53  ;;  %vm3266_vm14 = vcmp.gt.f32.partialorder %v6386_v3, 1.0 }
 0x15a   : > { %v3236_v40 = vmul.f32 0.33333334, %v3228_v9  ;;  %v2797_v46 = vsub.f32 %v6230_v11, %v6409_v16  ;;  %v6424_v12 = vadd.f32 %v2547_v31, %v6406_v27 }
 0x15b   : > { %v2922_v26 = vsub.f32 %v6247_v34, %v6417_v1  ;;  %v2540_v34 = vsub.f32 %v6030_v35, %v6427_v2 }
 0x15c   : > { %v3244_v36 = vadd.f32 %v3236_v40, %v5683_v60  ;;  %v2805_v9 = vmul.f32 0.33333334, %v2797_v46  ;;  %7418 = vst [vmem:[#allocation11_spill] sm:$0xff] %v6424_v12  ;;  %v2667_v11 = vsub.f32 %v6083_v15, %v6424_v12 }
 0x15d   : > { %v2930_v40 = vmul.f32 0.33333334, %v2922_v26  ;;  %v2548_v0 = vmul.f32 0.33333334, %v2540_v34 }
 0x15e   : > { %v6401_v48 = vadd.f32 %v3252_v63, %v3244_v36  ;;  %v6430_v20 = vadd.f32 %v2805_v9, %v6409_v16  ;;  %v2675_v24 = vmul.f32 0.33333334, %v2667_v11 }
 0x15f   : > { %v6437_v63 = vadd.f32 %v2930_v40, %v6417_v1  ;;  %v6454_v47 = vadd.f32 %v2548_v0, %v6427_v2 }
 0x160   : > { %v2261_v5 = vpop.f32.mrf.mxu3  ;;  %v2925_v36 = vsub.f32 %v6289_v8, %v6430_v20  ;;  %v6446_v15 = vadd.f32 %v2675_v24, %v6424_v12  ;;  %vm3268_vm2 = vcmp.gt.f32.partialorder %v6401_v48, 1.0 }
 0x161   : > { %v3229_v45 = vadd.f32 %v3221_v30, %v2261_v5  ;;  %v3050_v19 = vsub.f32 %v6304_v29, %v6437_v63  ;;  %7421 = vst [vmem:[#allocation14_spill] sm:$0xff] %v6454_v47  ;;  %v2668_v46 = vsub.f32 %v6157_v49, %v6454_v47 }
 0x162   : > { %v2933_v5 = vmul.f32 0.33333334, %v2925_v36  ;;  %7420 = vst [vmem:[#allocation13_spill] sm:$0xff] %v6446_v15  ;;  %v2795_v35 = vsub.f32 %v6167_v10, %v6446_v15 }
 0x163   : > { %v3237_v57 = vmul.f32 0.33333334, %v3229_v45  ;;  %v3058_v8 = vmul.f32 0.33333334, %v3050_v19  ;;  %v2676_v9 = vmul.f32 0.33333334, %v2668_v46 }
 0x164   : > { %v6449_v45 = vadd.f32 %v2933_v5, %v6430_v20 }
 0x165   : > { %v3245_v44 = vadd.f32 %v3237_v57, %v5683_v60  ;;  %v6459_v29 = vadd.f32 %v3058_v8, %v6437_v63  ;;  %v6477_v11 = vadd.f32 %v2676_v9, %v6454_v47  ;;  %v6698_v47 = vld [vmem:[%s7375_s3 + $0x18] sm:$0xff] }
 0x166   : > { %v3053_v57 = vsub.f32 %v6340_v25, %v6449_v45 }
 0x167   : > { %v6419_v52 = vadd.f32 %v3253_v28, %v3245_v44  ;;  %v2803_v44 = vmul.f32 0.33333334, %v2795_v35  ;;  %v3178_v28 = vsub.f32 %v6354_v7, %v6459_v29  ;;  %7423 = vst [vmem:[#allocation16_spill] sm:$0xff] %v6477_v11  ;;  %v2796_v49 = vsub.f32 %v6210_v21, %v6477_v11 }
 0x168   : > { %v3450_v56 = vpop.f32.mrf.mxu1  ;;  %v3061_v22 = vmul.f32 0.33333334, %v3053_v57  ;;  %v2352_v57 = vmul.f32 0.33333334, %v5675_v54 }
 0x169   : > { %v3186_v10 = vmul.f32 0.33333334, %v3178_v28  ;;  %v6469_v26 = vadd.f32 %v2803_v44, %v6446_v15  ;;  %v2804_v34 = vmul.f32 0.33333334, %v2796_v49  ;;  %vm3269_vm15 = vcmp.gt.f32.partialorder %v6419_v52, 1.0 }
 0x16a   : > { %v6466_v31 = vadd.f32 %v3061_v22, %v6449_v45  ;;  %v2448_v52 = vmul.f32 0.6666667, %v5675_v54 }
 0x16b   : > { %7422 = vst [vmem:[#allocation15_spill] sm:$0xff] %v6469_v26  ;;  %v6472_v25 = vadd.f32 %v3186_v10, %v6459_v29  ;;  %v2923_v40 = vsub.f32 %v6223_v17, %v6469_v26  ;;  %v6492_v5 = vadd.f32 %v2804_v34, %v6477_v11  ;;  %v4618_v10 = vsel %vm3269_vm15, 1.0, %v7414_v41 }
 0x16c   : > { %v2456_v54 = vadd.f32 %v2448_v52, %v5801_v18 }
 0x16d   : > { %v2931_v7 = vmul.f32 0.33333334, %v2923_v40  ;;  %7425 = vst [vmem:[#allocation18_spill] sm:$0xff] %v6492_v5  ;;  %v2924_v8 = vsub.f32 %v6270_v58, %v6492_v5  ;;  %v2360_v58 = vadd.f32 %v2352_v57, %v5683_v60 }
 0x16e   : > { %v2576_v52 = vmul.f32 0.6666667, %v2456_v54 }
 0x16f   : > { %v6483_v36 = vadd.f32 %v2931_v7, %v6469_v26  ;;  %vm2376_vm0 = vcmp.gt.f32.partialorder %v2360_v58, 1.0 }
 0x170   : > { %v6522_v49 = vsel %vm2376_vm0, 1.0, %v7414_v41  ;;  %v6525_v34 = vpop.f32.mrf.mxu1 }
 0x171   : > { %v3409_v30 = vpop.f32.mrf.mxu0  ;;  %7424 = vst [vmem:[#allocation17_spill] sm:$0xff] %v6483_v36  ;;  %v3051_v17 = vsub.f32 %v6279_v32, %v6483_v36  ;;  %v2932_v32 = vmul.f32 0.33333334, %v2924_v8 }
 0x172   : > { %v6441_v6 = vadd.f32 %v3450_v56, %v3409_v30  ;;  %v4615_v56 = vsel %vm3266_vm14, 1.0, %v7414_v41  ;;  %v3181_v30 = vsub.f32 %v6392_v38, %v6466_v31 }
 0x173   : > { %v3290_v19 = vsub.f32 %v4615_v56, %v6472_v25  ;;  %v3059_v3 = vmul.f32 0.33333334, %v3051_v17  ;;  %v6510_v28 = vadd.f32 %v2932_v32, %v6492_v5  ;;  %v2400_v17 = vsub.f32 1.0, %v6522_v49 }
 0x174   : > { %v3189_v24 = vmul.f32 0.33333334, %v3181_v30 }
 0x175   : > { %v3298_v0 = vmul.f32 0.33333334, %v3290_v19  ;;  %v6503_v38 = vadd.f32 %v3059_v3, %v6483_v36  ;;  %7427 = vst [vmem:[#allocation20_spill] sm:$0xff] %v6510_v28  ;;  %v3052_v9 = vsub.f32 %v6321_v42, %v6510_v28  ;;  %v2408_v3 = vmul.f32 %v2400_v17, %v2360_v58 }
 0x176   : > { %v6495_v21 = vadd.f32 %v3189_v24, %v6466_v31  ;;  %v4616_v24 = vsel %vm3267_vm1, 1.0, %v7414_v41 }
 0x177   : > { %v6500_v35 = vadd.f32 %v3298_v0, %v6472_v25  ;;  %7426 = vst [vmem:[#allocation19_spill] sm:$0xff] %v6503_v38  ;;  %v3179_v22 = vsub.f32 %v6333_v43, %v6503_v38  ;;  %v3060_v43 = vmul.f32 0.33333334, %v3052_v9  ;;  %v2464_v0 = vmul.f32 0.33333334, %v2456_v54 }
 0x178   : > { %v3293_v40 = vsub.f32 %v4618_v10, %v6495_v21  ;;  %v3456_v10 = vpop.f32.mrf.mxu1 }
 0x179   : > { %v3187_v44 = vmul.f32 0.33333334, %v3179_v22  ;;  %v6527_v56 = vpop.f32.mrf.mxu0  ;;  %v6533_v42 = vadd.f32 %v3060_v43, %v6510_v28  ;;  %v2480_v22 = vmul.f32 0.8, %v2408_v3 }
 0x17a   : > { %v3301_v7 = vmul.f32 0.33333334, %v3293_v40 }
 0x17b   : > { %v6514_v46 = vadd.f32 %v3187_v44, %v6503_v38  ;;  %7429 = vst [vmem:[#allocation22_spill] sm:$0xff] %v6533_v42  ;;  %v3180_v19 = vsub.f32 %v6372_v14, %v6533_v42  ;;  %v2472_v44 = vadd.f32 %v2464_v0, %v5683_v60  ;;  %v4617_v14 = vsel %vm3268_vm2, 1.0, %v7414_v41 }
 0x17c   : > { %v6530_v30 = vadd.f32 %v3301_v7, %v6495_v21 }
 0x17d   : > { %7428 = vst [vmem:[#allocation21_spill] sm:$0xff] %v6514_v46  ;;  %v3188_v51 = vmul.f32 0.33333334, %v3180_v19  ;;  %v3291_v8 = vsub.f32 %v4616_v24, %v6514_v46  ;;  %v2488_v40 = vadd.f32 %v2480_v22, %v2472_v44 }
 0x17f   : > { %v6542_v32 = vadd.f32 %v3188_v51, %v6533_v42  ;;  %v3299_v57 = vmul.f32 0.33333334, %v3291_v8  ;;  %vm2496_vm3 = vcmp.gt.f32.partialorder %v2488_v40, 1.0  ;;  %v2584_v51 = vadd.f32 %v2576_v52, %v5975_v62 }
 0x180   : > { %v3459_v58 = vpop.f32.mrf.mxu1  ;;  %v6551_v7 = vsel %vm2496_vm3, 1.0, %v7414_v41 }
 0x181   : > { %7430 = vst [vmem:[#allocation23_spill] sm:$0xff] %v6542_v32  ;;  %v3415_v9 = vpop.f32.mrf.mxu0  ;;  %v6546_v18 = vadd.f32 %v3299_v57, %v6514_v46  ;;  %v3292_v17 = vsub.f32 %v4617_v14, %v6542_v32  ;;  %v2520_v19 = vsub.f32 1.0, %v6551_v7  ;;  %v2592_v57 = vmul.f32 0.33333334, %v2584_v51  ;;  %v6719_v46 = vld [vmem:[%s7375_s3] sm:$0xff] }
 0x182   : > { %v2704_v14 = vmul.f32 0.6666667, %v2584_v51 }
 0x183   : > { %7431 = vst [vmem:[#allocation24_spill] sm:$0xff] %v6546_v18  ;;  %v3300_v24 = vmul.f32 0.33333334, %v3292_v17  ;;  %v2528_v8 = vmul.f32 %v2520_v19, %v2488_v40  ;;  %v2600_v22 = vadd.f32 %v2592_v57, %v5683_v60  ;;  %v6712_v18 = vld [vmem:[%s7375_s3 + $0x8] sm:$0xff] }
 0x184   : > { %v2712_v52 = vadd.f32 %v2704_v14, %v6124_v39  ;;  %v6580_v14 = vld [vmem:[%s7376_s4 + $0x28] sm:$0xff] }
 0x185   : > { %v6557_v3 = vadd.f32 %v3300_v24, %v6542_v32  ;;  %v2608_v54 = vmul.f32 0.8, %v2528_v8  ;;  %v6568_v8 = vld [vmem:[%s7376_s4 + $0x38] sm:$0xff] }
 0x186   : > { %v2720_v40 = vmul.f32 0.33333334, %v2712_v52 }
 0x187   : > { %7432 = vst [vmem:[#allocation25_spill] sm:$0xff] %v6557_v3  ;;  %v2616_v28 = vadd.f32 %v2608_v54, %v2600_v22  ;;  %v6573_v54 = vld [vmem:[%s7376_s4 + $0x30] sm:$0xff] }
 0x188   : > { %v3462_v48 = vpop.f32.mrf.mxu1  ;;  %v2728_v39 = vadd.f32 %v2720_v40, %v5683_v60 }
 0x189   : > { %v3418_v43 = vpop.f32.mrf.mxu0  ;;  %vm2624_vm4 = vcmp.gt.f32.partialorder %v2616_v28, 1.0 }
 0x18a   : > { %v6561_v11 = vsel %vm2624_vm4, 1.0, %v7414_v41  ;;  %vm3537_vm4 = vcmask 122880  }
 0x18b   : > { %v2648_v62 = vsub.f32 1.0, %v6561_v11 }
 0x18d   : > { %v2656_v24 = vmul.f32 %v2648_v62, %v2616_v28 }
 0x18f   : > { %v2736_v28 = vmul.f32 0.8, %v2656_v24  ;;  %v6592_v24 = vld [vmem:[%s7376_s4 + $0x18] sm:$0xff] }
 0x191   : > { %v3421_v0 = vpop.f32.mrf.mxu0  ;;  %v2744_v40 = vadd.f32 %v2736_v28, %v2728_v39  ;;  %v4673_v28 = vld [vmem:[%s7375_s3 + $0x70] sm:$0xff] }
 0x192   : > { %v3463_v62 = vadd.f32 %v3462_v48, %v3421_v0  ;;  %v6612_v0 = vld [vmem:[%s7376_s4] sm:$0xff] }
 0x193   : > { %vm2752_vm5 = vcmp.gt.f32.partialorder %v2744_v40, 1.0 }
 0x198   : > { %v3465_v44 = vpop.f32.mrf.mxu1 }
 0x1a3   : > { %v3424_v42 = vpop.f32.mrf.mxu0 }
 0x1a4   : > { %v3466_v3 = vadd.f32 %v3465_v44, %v3424_v42  ;;  %v3460_v42 = vadd.f32 %v3459_v58, %v3418_v43  ;;  %v3454_v58 = vadd.f32 %v6525_v34, %v6527_v56  ;;  %v6615_v34 = vsel %vm2752_vm5, 1.0, %v7414_v41 }
 0x1a6   : > { %v3479_v44 = vmul.f32 %v3466_v3, %v6580_v14  ;;  %v3477_v43 = vmul.f32 %v3460_v42, %v6592_v24  ;;  %v2832_v3 = vmul.f32 0.6666667, %v2712_v52 }
 0x1a8   : > { %v2840_v52 = vadd.f32 %v2832_v3, %v6187_v55  ;;  %v4672_v55 = vld [vmem:[%s7375_s3 + $0x78] sm:$0xff]  ;;  %v6655_v3 = vld [vmem:[%s7375_s3 + $0x48] sm:$0xff] }
 0x1aa   : > { %v2848_v39 = vmul.f32 0.33333334, %v2840_v52 }
 0x1b0   : > { %v3468_v17 = vpop.f32.mrf.mxu1 }
 0x1ba   : > { %v3427_v5 = vpop.f32.mrf.mxu0 }
 0x1bb   : > { %v3469_v22 = vadd.f32 %v3468_v17, %v3427_v5  ;;  %v6586_v17 = vld [vmem:[%s7376_s4 + $0x20] sm:$0xff] }
 0x1bc   : > { %v3478_v48 = vmul.f32 %v3463_v62, %v6586_v17  ;;  %v2856_v62 = vadd.f32 %v2848_v39, %v5683_v60  ;;  %v6679_v39 = vld [vmem:[%s7375_s3 + $0x30] sm:$0xff] }
 0x1bd   : > { %v3480_v5 = vmul.f32 %v3469_v22, %v6573_v54  ;;  %v6624_v22 = vld [vmem:[%s7377_s5] sm:$0xff] }
 0x1c8   : > { %v3471_v19 = vpop.f32.mrf.mxu1 }
 0x1d2   : > { %v3430_v57 = vpop.f32.mrf.mxu0 }
 0x1d3   : > { %v3472_v51 = vadd.f32 %v3471_v19, %v3430_v57  ;;  %v3457_v19 = vadd.f32 %v3456_v10, %v3415_v9  ;;  %v6606_v10 = vld [vmem:[%s7376_s4 + $0x8] sm:$0xff]  ;;  %v3474_v57 = vmul.f32 %v6441_v6, %v6612_v0 }
 0x1d4   : > { %v3475_v56 = vmul.f32 %v3454_v58, %v6606_v10  ;;  %v6649_v58 = vld [vmem:[%s7375_s3 + $0x50] sm:$0xff] }
 0x1d5   : > { %v3481_v32 = vmul.f32 %v3472_v51, %v6568_v8  ;;  %v2776_v51 = vsub.f32 1.0, %v6615_v34 }
 0x1d7   : > { %3494 = vmatpush.msra.mxu2 %v3481_v32  ;;  %v6598_v32 = vld [vmem:[%s7376_s4 + $0x10] sm:$0xff]  ;;  %v2784_v6 = vmul.f32 %v2776_v51, %v2744_v40  ;;  %v4676_v40 = vld [vmem:[%s7375_s3 + $0x58] sm:$0xff] }
 0x1d8   : > { %v3476_v9 = vmul.f32 %v3457_v19, %v6598_v32 }
 0x1d9   : > { %3495 = vmatpush.msra.mxu2 %v3480_v5  ;;  %v4674_v5 = vld [vmem:[%s7375_s3 + $0x68] sm:$0xff]  ;;  %v2864_v42 = vmul.f32 0.8, %v2784_v6 }
 0x1db   : > { %3496 = vmatpush.msra.mxu2 %v3479_v44  ;;  %v4675_v44 = vld [vmem:[%s7375_s3 + $0x60] sm:$0xff]  ;;  %v2872_v19 = vadd.f32 %v2864_v42, %v2856_v62 }
 0x1dd   : > { %3497 = vmatpush.msra.mxu2 %v3478_v48  ;;  %v2416_v48 = vmul.f32 0.33333334, %v6522_v49  ;;  %vm2880_vm7 = vcmp.gt.f32.partialorder %v2872_v19, 1.0 }
 0x1de   : > { %v6660_v49 = vsel %vm2880_vm7, 1.0, %v7414_v41 }
 0x1df   : > { %3498 = vmatpush.msra.mxu2 %v3477_v43  ;;  %v2960_v43 = vmul.f32 0.6666667, %v2840_v52 }
 0x1e1   : > { %3499 = vmatpush.msra.mxu2 %v3476_v9  ;;  %v2536_v9 = vsub.f32 %v6551_v7, %v2416_v48  ;;  %v2968_v52 = vadd.f32 %v2960_v43, %v6253_v37  ;;  %v2904_v7 = vsub.f32 1.0, %v6660_v49  ;;  %v6685_v37 = vld [vmem:[%s7375_s3 + $0x28] sm:$0xff]  ;;  %v6691_v43 = vld [vmem:[%s7375_s3 + $0x20] sm:$0xff] }
 0x1e3   : > { %3500 = vmatpush.msra.mxu2 %v3475_v56  ;;  %v6665_v56 = vld [vmem:[%s7375_s3 + $0x40] sm:$0xff]  ;;  %v2544_v51 = vmul.f32 0.33333334, %v2536_v9  ;;  %v2976_v6 = vmul.f32 0.33333334, %v2968_v52  ;;  %v2912_v62 = vmul.f32 %v2904_v7, %v2872_v19 }
 0x1e4   : > { %v2353_v7 = vmul.f32 0.33333334, %v5750_v33  ;;  %v3088_v38 = vmul.f32 0.6666667, %v2968_v52 }
 0x1e5   : > { %3501 = vmatpush.msra.mxu2 %v3474_v57  ;;  %v6672_v57 = vld [vmem:[%s7375_s3 + $0x38] sm:$0xff]  ;;  %v2552_v42 = vadd.f32 %v2544_v51, %v2416_v48  ;;  %v2984_v9 = vadd.f32 %v2976_v6, %v5683_v60  ;;  %v2992_v2 = vmul.f32 0.8, %v2912_v62  ;;  %v6706_v51 = vld [vmem:[%s7375_s3 + $0x10] sm:$0xff] }
 0x1e6   : > { %4619 = vmatmul.msk.f32.vlgmr.msra.gmra.mxu2 %vm3482_vm6, %v6624_v22 }
 0x1e7   : > { %3645 = vmatpush.msrb.mxu2 %v4672_v55  ;;  %v2664_v19 = vsub.f32 %v6561_v11, %v2552_v42  ;;  %v3000_v6 = vadd.f32 %v2992_v2, %v2984_v9  ;;  %v2361_v11 = vadd.f32 %v2353_v7, %v5683_v60  ;;  %v2449_v7 = vmul.f32 0.6666667, %v5750_v33 }
 0x1e9   : > { %3646 = vmatpush.msrb.mxu2 %v4673_v28  ;;  %v2672_v62 = vmul.f32 0.33333334, %v2664_v19  ;;  %vm3008_vm8 = vcmp.gt.f32.partialorder %v3000_v6, 1.0  ;;  %vm2377_vm9 = vcmp.gt.f32.partialorder %v2361_v11, 1.0  ;;  %v7433_v19 = vld [vmem:[#allocation9_spill] sm:$0xff] }
 0x1ea   : > { %v6723_v9 = vsel %vm3008_vm8, 1.0, %v7414_v41  ;;  %v3096_v36 = vadd.f32 %v3088_v38, %v7433_v19  ;;  %v6728_v26 = vsel %vm2377_vm9, 1.0, %v7414_v41 }
 0x1eb   : > { %3647 = vmatpush.msrb.mxu2 %v4674_v5  ;;  %v2680_v2 = vadd.f32 %v2672_v62, %v2552_v42  ;;  %v3032_v15 = vsub.f32 1.0, %v6723_v9  ;;  %v2401_v38 = vsub.f32 1.0, %v6728_v26 }
 0x1ed   : > { %3648 = vmatpush.msrb.mxu2 %v4675_v44  ;;  %v2792_v52 = vsub.f32 %v6615_v34, %v2680_v2 }
 0x1ef   : > { %3649 = vmatpush.msrb.mxu2 %v4676_v40  ;;  %v2800_v62 = vmul.f32 0.33333334, %v2792_v52 }
 0x1f1   : > { %3650 = vmatpush.msrb.mxu2 %v6649_v58  ;;  %v2808_v12 = vadd.f32 %v2800_v62, %v2680_v2 }
 0x1f3   : > { %3651 = vmatpush.msrb.mxu2 %v6655_v3 }
 0x1f5   : > { %3652 = vmatpush.msrb.mxu2 %v6665_v56 }
 0x1f7   : > { %3653 = vmatpush.msrb.mxu2 %v6672_v57 }
 0x1f9   : > { %3654 = vmatpush.msrb.mxu2 %v6679_v39 }
 0x1fb   : > { %3655 = vmatpush.msrb.mxu2 %v6685_v37 }
 0x1fd   : > { %3656 = vmatpush.msrb.mxu2 %v6691_v43 }
 0x1ff   : > { %3657 = vmatpush.msrb.mxu2 %v6698_v47 }
 0x201   : > { %3658 = vmatpush.msrb.mxu2 %v6706_v51 }
 0x203   : > { %3659 = vmatpush.msrb.mxu2 %v6712_v18 }
 0x205   : > { %3660 = vmatpush.msrb.mxu2 %v6719_v46 }
 0x206   : > { %3661 = vmatmul.f32.vlgmr.msrb.gmra.mxu2 %v2416_v48  ;;  %v6735_v48 = vld [vmem:[%s7378_s6 + $0x78] sm:$0xff] }
 0x207   : > { %3890 = vmatpush.msra.mxu2 %v4672_v55  ;;  %v3104_v55 = vmul.f32 0.33333334, %v3096_v36  ;;  %3509 = vmatpush.msrb.mxu3 %v6735_v48 }
 0x208   : > { %3755 = vmatpush.msra.mxu1 %v6735_v48 }
 0x209   : > { %3891 = vmatpush.msra.mxu2 %v4673_v28  ;;  %v7434_v28 = vld [vmem:[#allocation4_spill] sm:$0xff]  ;;  %v3112_v34 = vadd.f32 %v3104_v55, %v5683_v60  ;;  %v6783_v55 = vld [vmem:[%s7378_s6 + $0x50] sm:$0xff] }
 0x20a   : > { %v2457_v33 = vadd.f32 %v2449_v7, %v7434_v28  ;;  %7438 = vst [vmem:[#allocation27_spill] sm:$0xff] %v6783_v55 }
 0x20b   : > { %3892 = vmatpush.msra.mxu2 %v4674_v5  ;;  %v3040_v5 = vmul.f32 %v3032_v15, %v3000_v6  ;;  %v6749_v15 = vld [vmem:[%s7378_s6 + $0x70] sm:$0xff] }
 0x20c   : > { %3510 = vmatpush.msrb.mxu3 %v6749_v15  ;;  %3756 = vmatpush.msra.mxu1 %v6749_v15  ;;  %v2577_v28 = vmul.f32 0.6666667, %v2457_v33 }
 0x20d   : > { %3893 = vmatpush.msra.mxu2 %v4675_v44  ;;  %v2409_v44 = vmul.f32 %v2401_v38, %v2361_v11  ;;  %v3120_v19 = vmul.f32 0.8, %v3040_v5 }
 0x20e   : > { %3664 = vmatmul.f32.gmra.mxu2 %v2552_v42  ;;  %v2465_v42 = vmul.f32 0.33333334, %v2457_v33  ;;  %v7442_v33 = vld [vmem:[#allocation5_spill] sm:$0xff] }
 0x20f   : > { %3894 = vmatpush.msra.mxu2 %v4676_v40  ;;  %v3128_v7 = vadd.f32 %v3120_v19, %v3112_v34  ;;  %v2920_v40 = vsub.f32 %v6660_v49, %v2808_v12  ;;  %v2481_v6 = vmul.f32 0.8, %v2409_v44  ;;  %v6762_v49 = vld [vmem:[%s7378_s6 + $0x60] sm:$0xff]  ;;  %v2585_v34 = vadd.f32 %v2577_v28, %v7442_v33 }
 0x210   : > { %7436 = vst [vmem:[#allocation4_spill] sm:$0xff] %v6762_v49 }
 0x211   : > { %3895 = vmatpush.msra.mxu2 %v6649_v58  ;;  %v6754_v58 = vld [vmem:[%s7378_s6 + $0x68] sm:$0xff]  ;;  %vm3136_vm10 = vcmp.gt.f32.partialorder %v3128_v7, 1.0  ;;  %v2928_v11 = vmul.f32 0.33333334, %v2920_v40  ;;  %v2705_v33 = vmul.f32 0.6666667, %v2585_v34 }
 0x212   : > { %7435 = vst [vmem:[#allocation9_spill] sm:$0xff] %v6754_v58  ;;  %3511 = vmatpush.msrb.mxu3 %v6754_v58  ;;  %3757 = vmatpush.msra.mxu1 %v6754_v58  ;;  %v4605_v52 = vsel %vm3136_vm10, 1.0, %v7414_v41 }
 0x213   : > { %3896 = vmatpush.msra.mxu2 %v6655_v3  ;;  %v2473_v3 = vadd.f32 %v2465_v42, %v5683_v60  ;;  %v6822_v42 = vld [vmem:[%s7378_s6 + $0x30] sm:$0xff] }
 0x214   : > { %3512 = vmatpush.msrb.mxu3 %v6762_v49  ;;  %3758 = vmatpush.msra.mxu1 %v6762_v49  ;;  %7443 = vst [vmem:[#allocation5_spill] sm:$0xff] %v6822_v42 }
 0x215   : > { %3897 = vmatpush.msra.mxu2 %v6665_v56  ;;  %v3216_v56 = vmul.f32 0.6666667, %v3096_v36 }
 0x216   : > { %3667 = vmatmul.f32.gmra.mxu2 %v2680_v2  ;;  %v6770_v2 = vld [vmem:[%s7378_s6 + $0x58] sm:$0xff] }
 0x217   : > { %3898 = vmatpush.msra.mxu2 %v6672_v57  ;;  %7437 = vst [vmem:[#allocation26_spill] sm:$0xff] %v6770_v2  ;;  %v2489_v57 = vadd.f32 %v2481_v6, %v2473_v3  ;;  %3513 = vmatpush.msrb.mxu3 %v6770_v2  ;;  %v3224_v36 = vadd.f32 %v3216_v56, %v6361_v50  ;;  %v3160_v50 = vsub.f32 1.0, %v4605_v52  ;;  %v2593_v6 = vmul.f32 0.33333334, %v2585_v34 }
 0x218   : > { %3759 = vmatpush.msra.mxu1 %v6770_v2 }
 0x219   : > { %3899 = vmatpush.msra.mxu2 %v6679_v39  ;;  %v2936_v39 = vadd.f32 %v2928_v11, %v2808_v12  ;;  %vm2497_vm11 = vcmp.gt.f32.partialorder %v2489_v57, 1.0  ;;  %3514 = vmatpush.msrb.mxu3 %v6783_v55  ;;  %v3232_v5 = vmul.f32 0.33333334, %v3224_v36  ;;  %v6843_v11 = vld [vmem:[%s7378_s6 + $0x18] sm:$0xff] }
 0x21a   : > { %3760 = vmatpush.msra.mxu1 %v6783_v55  ;;  %v6803_v38 = vsel %vm2497_vm11, 1.0, %v7414_v41  ;;  %7446 = vst [vmem:[#allocation33_spill] sm:$0xff] %v6843_v11 }
 0x21b   : > { %3900 = vmatpush.msra.mxu2 %v6685_v37  ;;  %v6788_v37 = vld [vmem:[%s7378_s6 + $0x48] sm:$0xff]  ;;  %v3240_v44 = vadd.f32 %v3232_v5, %v5683_v60 }
 0x21c   : > { %7439 = vst [vmem:[#allocation28_spill] sm:$0xff] %v6788_v37  ;;  %3515 = vmatpush.msrb.mxu3 %v6788_v37  ;;  %3761 = vmatpush.msra.mxu1 %v6788_v37 }
 0x21d   : > { %3901 = vmatpush.msra.mxu2 %v6691_v43  ;;  %v6797_v43 = vld [vmem:[%s7378_s6 + $0x40] sm:$0xff] }
 0x21e   : > { %3670 = vmatmul.f32.gmra.mxu2 %v2808_v12  ;;  %v3048_v12 = vsub.f32 %v6723_v9, %v2936_v39  ;;  %7440 = vst [vmem:[#allocation29_spill] sm:$0xff] %v6797_v43  ;;  %3516 = vmatpush.msrb.mxu3 %v6797_v43  ;;  %v3168_v9 = vmul.f32 %v3160_v50, %v3128_v7  ;;  %v6835_v7 = vld [vmem:[%s7378_s6 + $0x20] sm:$0xff]  ;;  %v6860_v50 = vld [vmem:[%s7378_s6 + $0x8] sm:$0xff] }
 0x21f   : > { %3902 = vmatpush.msra.mxu2 %v6698_v47  ;;  %v6808_v47 = vld [vmem:[%s7378_s6 + $0x38] sm:$0xff]  ;;  %3762 = vmatpush.msra.mxu1 %v6797_v43  ;;  %7445 = vst [vmem:[#allocation32_spill] sm:$0xff] %v6835_v7 }
 0x220   : > { %7441 = vst [vmem:[#allocation30_spill] sm:$0xff] %v6808_v47  ;;  %v3056_v62 = vmul.f32 0.33333334, %v3048_v12  ;;  %3517 = vmatpush.msrb.mxu3 %v6808_v47  ;;  %v6868_v12 = vld [vmem:[%s7378_s6] sm:$0xff] }
 0x221   : > { %3903 = vmatpush.msra.mxu2 %v6706_v51  ;;  %v2521_v51 = vsub.f32 1.0, %v6803_v38  ;;  %3763 = vmatpush.msra.mxu1 %v6808_v47  ;;  %7448 = vst [vmem:[#allocation35_spill] sm:$0xff] %v6860_v50 }
 0x222   : > { %3518 = vmatpush.msrb.mxu3 %v6822_v42  ;;  %v3064_v19 = vadd.f32 %v3056_v62, %v2936_v39  ;;  %7449 = vst [vmem:[#allocation36_spill] sm:$0xff] %v6868_v12 }
 0x223   : > { %3904 = vmatpush.msra.mxu2 %v6712_v18  ;;  %v6827_v18 = vld [vmem:[%s7378_s6 + $0x28] sm:$0xff]  ;;  %3764 = vmatpush.msra.mxu1 %v6822_v42  ;;  %v2529_v40 = vmul.f32 %v2521_v51, %v2489_v57  ;;  %v6880_v51 = vld [vmem:[%s7375_s3 + $0xf8] sm:$0xff] }
 0x224   : > { %7444 = vst [vmem:[#allocation31_spill] sm:$0xff] %v6827_v18  ;;  %3519 = vmatpush.msrb.mxu3 %v6827_v18  ;;  %v3176_v56 = vsub.f32 %v4605_v52, %v3064_v19  ;;  %v2601_v52 = vadd.f32 %v2593_v6, %v5683_v60 }
 0x225   : > { %3905 = vmatpush.msra.mxu2 %v6719_v46  ;;  %v3248_v46 = vmul.f32 0.8, %v3168_v9  ;;  %3765 = vmatpush.msra.mxu1 %v6827_v18  ;;  %v2609_v57 = vmul.f32 0.8, %v2529_v40  ;;  %v7450_v40 = vld [vmem:[#allocation6_spill] sm:$0xff] }
 0x226   : > { %3673 = vmatmul.f32.gmra.mxu2 %v2936_v39  ;;  %3520 = vmatpush.msrb.mxu3 %v6835_v7  ;;  %v3184_v36 = vmul.f32 0.33333334, %v3176_v56  ;;  %v6855_v39 = vld [vmem:[%s7378_s6 + $0x10] sm:$0xff]  ;;  %v2713_v6 = vadd.f32 %v2705_v33, %v7450_v40  ;;  %v6943_v40 = vld [vmem:[%s7375_s3 + $0xb8] sm:$0xff] }
 0x227   : > { %4000 = vmatpush.msrb.mxu2 %v6735_v48  ;;  %v3256_v3 = vadd.f32 %v3248_v46, %v3240_v44  ;;  %3766 = vmatpush.msra.mxu1 %v6835_v7  ;;  %7447 = vst [vmem:[#allocation34_spill] sm:$0xff] %v6855_v39  ;;  %v2617_v5 = vadd.f32 %v2609_v57, %v2601_v52  ;;  %v6888_v44 = vld [vmem:[%s7375_s3 + $0xf0] sm:$0xff]  ;;  %v6914_v52 = vld [vmem:[%s7375_s3 + $0xd8] sm:$0xff] }
 0x228   : > { %3521 = vmatpush.msrb.mxu3 %v6843_v11  ;;  %v3192_v9 = vadd.f32 %v3184_v36, %v3064_v19  ;;  %v2721_v36 = vmul.f32 0.33333334, %v2713_v6 }
 0x229   : > { %4001 = vmatpush.msrb.mxu2 %v6749_v15  ;;  %vm3264_vm12 = vcmp.gt.f32.partialorder %v3256_v3, 1.0  ;;  %3767 = vmatpush.msra.mxu1 %v6843_v11  ;;  %vm2625_vm13 = vcmp.gt.f32.partialorder %v2617_v5, 1.0  ;;  %v6906_v3 = vld [vmem:[%s7375_s3 + $0xe0] sm:$0xff] }
 0x22a   : > { %3522 = vmatpush.msrb.mxu3 %v6855_v39  ;;  %v4613_v28 = vsel %vm3264_vm12, 1.0, %v7414_v41  ;;  %v6899_v34 = vsel %vm2625_vm13, 1.0, %v7414_v41  ;;  %v2729_v33 = vadd.f32 %v2721_v36, %v5683_v60  ;;  %v6957_v36 = vld [vmem:[%s7375_s3 + $0xa8] sm:$0xff] }
 0x22b   : > { %4002 = vmatpush.msrb.mxu2 %v6754_v58  ;;  %3768 = vmatpush.msra.mxu1 %v6855_v39  ;;  %v3288_v62 = vsub.f32 %v4613_v28, %v3192_v9  ;;  %v2649_v56 = vsub.f32 1.0, %v6899_v34  ;;  %v6921_v28 = vld [vmem:[%s7375_s3 + $0xd0] sm:$0xff] }
 0x22c   : > { %3523 = vmatpush.msrb.mxu3 %v6860_v50 }
 0x22d   : > { %4003 = vmatpush.msrb.mxu2 %v6762_v49  ;;  %3769 = vmatpush.msra.mxu1 %v6860_v50  ;;  %v3296_v46 = vmul.f32 0.33333334, %v3288_v62  ;;  %v6928_v62 = vld [vmem:[%s7375_s3 + $0xc8] sm:$0xff] }
 0x22e   : > { %3676 = vmatmul.f32.gmra.mxu2 %v3064_v19  ;;  %3524 = vmatpush.msrb.mxu3 %v6868_v12  ;;  %v6895_v19 = vld [vmem:[%s7375_s3 + $0xe8] sm:$0xff] }
 0x22f   : > { %4004 = vmatpush.msrb.mxu2 %v6770_v2  ;;  %3770 = vmatpush.msra.mxu1 %v6868_v12  ;;  %v3304_v57 = vadd.f32 %v3296_v46, %v3192_v9  ;;  %v6936_v46 = vld [vmem:[%s7375_s3 + $0xc0] sm:$0xff] }
 0x230   : > { %3686 = vmatpush.msra.mxu3 %v6880_v51 }
 0x231   : > { %4005 = vmatpush.msrb.mxu2 %v6783_v55  ;;  %v7452_v55 = vld [vmem:[#allocation8_spill] sm:$0xff] }
 0x232   : > { %3687 = vmatpush.msra.mxu3 %v6888_v44 }
 0x233   : > { %4006 = vmatpush.msrb.mxu2 %v6788_v37 }
 0x234   : > { %3688 = vmatpush.msra.mxu3 %v6895_v19 }
 0x235   : > { %4007 = vmatpush.msrb.mxu2 %v6797_v43  ;;  %v2417_v43 = vmul.f32 0.33333334, %v6728_v26 }
 0x236   : > { %3679 = vmatmul.f32.gmra.mxu2 %v3192_v9  ;;  %3689 = vmatpush.msra.mxu3 %v6906_v3  ;;  %v2657_v9 = vmul.f32 %v2649_v56, %v2617_v5 }
 0x237   : > { %4008 = vmatpush.msrb.mxu2 %v6808_v47  ;;  %v2537_v49 = vsub.f32 %v6803_v38, %v2417_v43  ;;  %v7453_v38 = vld [vmem:[#allocation10_spill] sm:$0xff] }
 0x238   : > { %3690 = vmatpush.msra.mxu3 %v6914_v52  ;;  %v2737_v5 = vmul.f32 0.8, %v2657_v9  ;;  %v2833_v9 = vmul.f32 0.6666667, %v2713_v6  ;;  %v6978_v6 = vld [vmem:[%s7375_s3 + $0x90] sm:$0xff] }
 0x239   : > { %4009 = vmatpush.msrb.mxu2 %v6822_v42 }
 0x23a   : > { %3691 = vmatpush.msra.mxu3 %v6921_v28  ;;  %v2745_v56 = vadd.f32 %v2737_v5, %v2729_v33  ;;  %v6969_v33 = vld [vmem:[%s7375_s3 + $0x98] sm:$0xff] }
 0x23b   : > { %4010 = vmatpush.msrb.mxu2 %v6827_v18 }
 0x23c   : > { %3692 = vmatpush.msra.mxu3 %v6928_v62  ;;  %vm2753_vm14 = vcmp.gt.f32.partialorder %v2745_v56, 1.0 }
 0x23d   : > { %4011 = vmatpush.msrb.mxu2 %v6835_v7  ;;  %v4582_v5 = vsel %vm2753_vm14, 1.0, %v7414_v41 }
 0x23e   : > { %3682 = vmatmul.f32.gmra.mxu2 %v3304_v57  ;;  %3693 = vmatpush.msra.mxu3 %v6936_v46  ;;  %v6951_v57 = vld [vmem:[%s7375_s3 + $0xb0] sm:$0xff] }
 0x23f   : > { %4012 = vmatpush.msrb.mxu2 %v6843_v11  ;;  %v6984_v11 = vld [vmem:[%s7375_s3 + $0x88] sm:$0xff] }
 0x240   : > { %3694 = vmatpush.msra.mxu3 %v6943_v40 }
 0x241   : > { %4013 = vmatpush.msrb.mxu2 %v6855_v39  ;;  %v2777_v39 = vsub.f32 1.0, %v4582_v5 }
 0x242   : > { %3695 = vmatpush.msra.mxu3 %v6951_v57 }
 0x243   : > { %4014 = vmatpush.msrb.mxu2 %v6860_v50 }
 0x244   : > { %3696 = vmatpush.msra.mxu3 %v6957_v36 }
 0x245   : > { %4015 = vmatpush.msrb.mxu2 %v6868_v12  ;;  %v7451_v12 = vld [vmem:[#allocation7_spill] sm:$0xff] }
 0x246   : > { %3906 = vmatmul.f32.vlgmr.msra.gmra.mxu2 %v6349_v61  ;;  %v6963_v61 = vld [vmem:[%s7375_s3 + $0xa0] sm:$0xff]  ;;  %v2841_v50 = vadd.f32 %v2833_v9, %v7451_v12  ;;  %v2785_v12 = vmul.f32 %v2777_v39, %v2745_v56 }
 0x247   : > { %3697 = vmatpush.msra.mxu3 %v6963_v61 }
 0x248   : > { %v2849_v7 = vmul.f32 0.33333334, %v2841_v50  ;;  %v2865_v18 = vmul.f32 0.8, %v2785_v12  ;;  %v2961_v47 = vmul.f32 0.6666667, %v2841_v50 }
 0x249   : > { %3698 = vmatpush.msra.mxu3 %v6969_v33 }
 0x24a   : > { %v2857_v9 = vadd.f32 %v2849_v7, %v5683_v60  ;;  %v2969_v2 = vadd.f32 %v2961_v47, %v7452_v55  ;;  %v2545_v7 = vmul.f32 0.33333334, %v2537_v49 }
 0x24b   : > { %3699 = vmatpush.msra.mxu3 %v6978_v6 }
 0x24c   : > { %v2873_v42 = vadd.f32 %v2865_v18, %v2857_v9  ;;  %v2977_v39 = vmul.f32 0.33333334, %v2969_v2  ;;  %v2553_v50 = vadd.f32 %v2545_v7, %v2417_v43 }
 0x24d   : > { %3700 = vmatpush.msra.mxu3 %v6984_v11 }
 0x24e   : > { %3909 = vmatmul.f32.gmra.mxu2 %v6375_v13  ;;  %v6990_v13 = vld [vmem:[%s7375_s3 + $0x80] sm:$0xff]  ;;  %vm2881_vm15 = vcmp.gt.f32.partialorder %v2873_v42, 1.0  ;;  %v2985_v18 = vadd.f32 %v2977_v39, %v5683_v60  ;;  %v2665_v55 = vsub.f32 %v6899_v34, %v2553_v50 }
 0x24f   : > { %3701 = vmatpush.msra.mxu3 %v6990_v13  ;;  %v4590_v37 = vsel %vm2881_vm15, 1.0, %v7414_v41 }
 0x250   : > { %v2905_v58 = vsub.f32 1.0, %v4590_v37 }
 0x256   : > { %3912 = vmatmul.f32.gmra.mxu2 %v6398_v53  ;;  %v2913_v53 = vmul.f32 %v2905_v58, %v2873_v42  ;;  %v2673_v58 = vmul.f32 0.33333334, %v2665_v55 }
 0x25e   : > { %3915 = vmatmul.f32.gmra.mxu2 %v6417_v1  ;;  %v2993_v1 = vmul.f32 0.8, %v2913_v53 }
 0x260   : > { %v3001_v26 = vadd.f32 %v2993_v1, %v2985_v18 }
 0x262   : > { %vm3009_vm0 = vcmp.gt.f32.partialorder %v3001_v26, 1.0 }
 0x263   : > { %v4598_v49 = vsel %vm3009_vm0, 1.0, %v7414_v41 }
 0x264   : > { %v3033_v42 = vsub.f32 1.0, %v4598_v49 }
 0x266   : > { %3918 = vmatmul.f32.gmra.mxu2 %v6437_v63  ;;  %v3089_v63 = vmul.f32 0.6666667, %v2969_v2 }
 0x268   : > { %v3097_v47 = vadd.f32 %v3089_v63, %v7453_v38 }
 0x269   : > { %v3503_v56 = vpop.f32.mrf.mxu2 }
 0x26a   : > { %3525 = vmatmul.f32.vlgmr.msrb.gmra.mxu3 %v3503_v56  ;;  %v3105_v2 = vmul.f32 0.33333334, %v3097_v47  ;;  %v3217_v53 = vmul.f32 0.6666667, %v3097_v47 }
 0x26b   : > { %4176 = vmatpush.msrb.mxu3 %v6880_v51 }
 0x26c   : > { %v3113_v9 = vadd.f32 %v3105_v2, %v5683_v60  ;;  %v3225_v18 = vadd.f32 %v3217_v53, %v6384_v4 }
 0x26d   : > { %4177 = vmatpush.msrb.mxu3 %v6888_v44 }
 0x26e   : > { %3921 = vmatmul.f32.gmra.mxu2 %v6459_v29  ;;  %v2681_v29 = vadd.f32 %v2673_v58, %v2553_v50 }
 0x26f   : > { %4178 = vmatpush.msrb.mxu3 %v6895_v19 }
 0x270   : > { %v2793_v34 = vsub.f32 %v4582_v5, %v2681_v29 }
 0x271   : > { %4179 = vmatpush.msrb.mxu3 %v6906_v3 }
 0x272   : > { %3702 = vmatmul.f32.vlgmr.msra.gmra.mxu3 %v2417_v43  ;;  %v3041_v43 = vmul.f32 %v3033_v42, %v3001_v26  ;;  %v2801_v12 = vmul.f32 0.33333334, %v2793_v34 }
 0x273   : > { %4180 = vmatpush.msrb.mxu3 %v6914_v52 }
 0x274   : > { %v2809_v39 = vadd.f32 %v2801_v12, %v2681_v29 }
 0x275   : > { %4181 = vmatpush.msrb.mxu3 %v6921_v28 }
 0x276   : > { %3924 = vmatmul.f32.gmra.mxu2 %v6472_v25  ;;  %v3121_v25 = vmul.f32 0.8, %v3041_v43  ;;  %v2921_v7 = vsub.f32 %v4590_v37, %v2809_v39  ;;  %v3233_v37 = vmul.f32 0.33333334, %v3225_v18 }
 0x277   : > { %4182 = vmatpush.msrb.mxu3 %v6928_v62 }
 0x278   : > { %v3129_v5 = vadd.f32 %v3121_v25, %v3113_v9  ;;  %v2929_v56 = vmul.f32 0.33333334, %v2921_v7  ;;  %v3241_v58 = vadd.f32 %v3233_v37, %v5683_v60  ;;  %v7040_v60 = vld [vmem:[%s7379_s7] ss:$0 sm:$0xff] }
 0x279   : > { %4183 = vmatpush.msrb.mxu3 %v6936_v46 }
 0x27a   : > { %3705 = vmatmul.f32.gmra.mxu3 %v2553_v50  ;;  %vm3137_vm1 = vcmp.gt.f32.partialorder %v3129_v5, 1.0  ;;  %v2937_v50 = vadd.f32 %v2929_v56, %v2809_v39 }
 0x27b   : > { %4184 = vmatpush.msrb.mxu3 %v6943_v40 }
 0x27c   : > { %v3049_v26 = vsub.f32 %v4598_v49, %v2937_v50 }
 0x27d   : > { %4185 = vmatpush.msrb.mxu3 %v6951_v57 }
 0x27e   : > { %3927 = vmatmul.f32.gmra.mxu2 %v6500_v35  ;;  %v4606_v35 = vsel %vm3137_vm1, 1.0, %v7414_v41  ;;  %v3057_v63 = vmul.f32 0.33333334, %v3049_v26 }
 0x27f   : > { %4186 = vmatpush.msrb.mxu3 %v6957_v36  ;;  %v3161_v1 = vsub.f32 1.0, %v4606_v35 }
 0x280   : > { %v3065_v47 = vadd.f32 %v3057_v63, %v2937_v50 }
 0x281   : > { %4187 = vmatpush.msrb.mxu3 %v6963_v61  ;;  %v3169_v55 = vmul.f32 %v3161_v1, %v3129_v5 }
 0x282   : > { %3708 = vmatmul.f32.gmra.mxu3 %v2681_v29  ;;  %v3177_v42 = vsub.f32 %v4606_v35, %v3065_v47 }
 0x283   : > { %4188 = vmatpush.msrb.mxu3 %v6969_v33  ;;  %v3249_v38 = vmul.f32 0.8, %v3169_v55 }
 0x284   : > { %v3185_v34 = vmul.f32 0.33333334, %v3177_v42 }
 0x285   : > { %4189 = vmatpush.msrb.mxu3 %v6978_v6  ;;  %v3257_v29 = vadd.f32 %v3249_v38, %v3241_v58 }
 0x286   : > { %v3193_v4 = vadd.f32 %v3185_v34, %v3065_v47 }
 0x287   : > { %4190 = vmatpush.msrb.mxu3 %v6984_v11  ;;  %vm3265_vm2 = vcmp.gt.f32.partialorder %v3257_v29, 1.0 }
 0x288   : > { %v4614_v2 = vsel %vm3265_vm2, 1.0, %v7414_v41 }
 0x289   : > { %4191 = vmatpush.msrb.mxu3 %v6990_v13  ;;  %v3289_v43 = vsub.f32 %v4614_v2, %v3193_v4  ;;  %v3662_v34 = vpop.f32.mrf.mxu2 }
 0x28a   : > { %3711 = vmatmul.f32.gmra.mxu3 %v2809_v39 }
 0x28b   : > { %v3297_v49 = vmul.f32 0.33333334, %v3289_v43 }
 0x28d   : > { %v3305_v12 = vadd.f32 %v3297_v49, %v3193_v4 }
 0x292   : > { %3714 = vmatmul.f32.gmra.mxu3 %v2937_v50 }
 0x29a   : > { %3717 = vmatmul.f32.gmra.mxu3 %v3065_v47 }
 0x2a2   : > { %3720 = vmatmul.f32.gmra.mxu3 %v3193_v4 }
 0x2aa   : > { %3723 = vmatmul.f32.gmra.mxu3 %v3305_v12 }
 0x2b2   : > { %4192 = vmatmul.f32.vlgmr.msrb.gmra.mxu3 %v6365_v23 }
 0x2ba   : > { %4195 = vmatmul.f32.gmra.mxu3 %v6389_v59 }
 0x2c2   : > { %4198 = vmatmul.f32.gmra.mxu3 %v6409_v16 }
 0x2ca   : > { %4201 = vmatmul.f32.gmra.mxu3 %v6430_v20 }
 0x2d2   : > { %4204 = vmatmul.f32.gmra.mxu3 %v6449_v45 }
 0x2da   : > { %4207 = vmatmul.f32.gmra.mxu3 %v6466_v31 }
 0x2e2   : > { %4210 = vmatmul.f32.gmra.mxu3 %v6495_v21 }
 0x2ea   : > { %4213 = vmatmul.f32.gmra.mxu3 %v6530_v30 }
 0x2ed   : > { %v3526_v23 = vpop.f32.mrf.mxu3 }
 0x2ee   : > { %v7044_v59 = vadd.f32 %v7040_v60, %v3526_v23 }
 0x2f0   : > { %vm3530_vm3 = vcmp.gt.f32.partialorder %v7044_v59, 1.0  ;;  %v3541_v30 = vrot.slane %v7044_v59, 1  ;;  %v3554_v18 = vrot.slane %v7044_v59, 2  ;;  %v3567_v47 = vrot.slane %v7044_v59, 3 }
 0x2f1   : > { %v4620_v16 = vsel %vm3530_vm3, 1.0, %v7414_v41 }
 0x2f2   : > { %v3533_v20 = vsub.f32 1.0, %v4620_v16  ;;  %v3535_v45 = vmul.f32 0.33333334, %v4620_v16  ;;  %v3580_v16 = vrot.slane %v7044_v59, 4 }
 0x2f4   : > { %v3534_v31 = vmul.f32 %v3533_v20, %v7044_v59  ;;  %3538 = vst.msk [vmem:[%s7050_s20] sm:$0x1] %vm3537_vm4, %v3535_v45 }
 0x2f6   : > { %v3539_v21 = vmul.f32 0.8, %v3534_v31  ;;  %v7070_v31 = vpop.f32.mrf.mxu2 }
 0x2f8   : > { %v3543_v9 = vadd.f32 %v3541_v30, %v3539_v21 }
 0x2fa   : > { %vm3544_vm5 = vcmp.gt.f32.partialorder %v3543_v9, 1.0 }
 0x2fb   : > { %v4621_v25 = vsel %vm3544_vm5, 1.0, %v7414_v41 }
 0x2fc   : > { %v3547_v39 = vsub.f32 1.0, %v4621_v25  ;;  %v3549_v5 = vsub.f32 %v4621_v25, %v3535_v45 }
 0x2fe   : > { %v3548_v7 = vmul.f32 %v3547_v39, %v3543_v9  ;;  %v3550_v53 = vmul.f32 0.33333334, %v3549_v5 }
 0x300   : > { %v3551_v56 = vadd.f32 %v3550_v53, %v3535_v45  ;;  %v3553_v35 = vmul.f32 0.8, %v3548_v7  ;;  %v3593_v7 = vrot.slane %v7044_v59, 5  ;;  %v3703_v53 = vpop.f32.mrf.mxu3 }
 0x302   : > { %3552 = vst.msk [vmem:[%s7050_s20 + $0x1] sm:$0x1] %vm3537_vm4, %v3551_v56  ;;  %v3556_v50 = vadd.f32 %v3554_v18, %v3553_v35 }
 0x304   : > { %vm3557_vm7 = vcmp.gt.f32.partialorder %v3556_v50, 1.0 }
 0x305   : > { %v4622_v1 = vsel %vm3557_vm7, 1.0, %v7414_v41 }
 0x306   : > { %v3560_v26 = vsub.f32 1.0, %v4622_v1  ;;  %v3562_v37 = vsub.f32 %v4622_v1, %v3551_v56 }
 0x308   : > { %v3561_v55 = vmul.f32 %v3560_v26, %v3556_v50  ;;  %v3563_v63 = vmul.f32 0.33333334, %v3562_v37  ;;  %v3668_v50 = vpop.f32.mrf.mxu2 }
 0x30a   : > { %v3564_v58 = vadd.f32 %v3563_v63, %v3551_v56  ;;  %v3566_v38 = vmul.f32 0.8, %v3561_v55  ;;  %v7073_v56 = vadd.f32 %v3703_v53, %v3662_v34  ;;  %v3706_v63 = vpop.f32.mrf.mxu3 }
 0x30c   : > { %3565 = vst.msk [vmem:[%s7050_s20 + $0x2] sm:$0x1] %vm3537_vm4, %v3564_v58  ;;  %v3569_v29 = vadd.f32 %v3567_v47, %v3566_v38  ;;  %v3606_v47 = vrot.slane %v7044_v59, 6 }
 0x30e   : > { %vm3570_vm8 = vcmp.gt.f32.partialorder %v3569_v29, 1.0 }
 0x30f   : > { %v4623_v42 = vsel %vm3570_vm8, 1.0, %v7414_v41 }
 0x310   : > { %v3573_v2 = vsub.f32 1.0, %v4623_v42  ;;  %v3575_v4 = vsub.f32 %v4623_v42, %v3564_v58  ;;  %v3671_v34 = vpop.f32.mrf.mxu2 }
 0x312   : > { %v3574_v43 = vmul.f32 %v3573_v2, %v3569_v29  ;;  %v3576_v49 = vmul.f32 0.33333334, %v3575_v4 }
 0x314   : > { %v3577_v12 = vadd.f32 %v3576_v49, %v3564_v58  ;;  %v3579_v23 = vmul.f32 0.8, %v3574_v43  ;;  %v3709_v43 = vpop.f32.mrf.mxu3 }
 0x316   : > { %3578 = vst.msk [vmem:[%s7050_s20 + $0x3] sm:$0x1] %vm3537_vm4, %v3577_v12  ;;  %v3582_v20 = vadd.f32 %v3580_v16, %v3579_v23 }
 0x318   : > { %vm3583_vm9 = vcmp.gt.f32.partialorder %v3582_v20, 1.0 }
 0x319   : > { %v4624_v45 = vsel %vm3583_vm9, 1.0, %v7414_v41 }
 0x31a   : > { %v3586_v21 = vsub.f32 1.0, %v4624_v45  ;;  %v3588_v30 = vsub.f32 %v4624_v45, %v3577_v12 }
 0x31c   : > { %v3587_v9 = vmul.f32 %v3586_v21, %v3582_v20  ;;  %v3589_v25 = vmul.f32 0.33333334, %v3588_v30  ;;  %v3619_v20 = vrot.slane %v7044_v59, 7  ;;  %v3712_v21 = vpop.f32.mrf.mxu3 }
 0x31e   : > { %v3590_v39 = vadd.f32 %v3589_v25, %v3577_v12  ;;  %v3592_v5 = vmul.f32 0.8, %v3587_v9  ;;  %v3674_v9 = vpop.f32.mrf.mxu2 }
 0x320   : > { %3591 = vst.msk [vmem:[%s7050_s20 + $0x4] sm:$0x1] %vm3537_vm4, %v3590_v39  ;;  %v3595_v35 = vadd.f32 %v3593_v7, %v3592_v5 }
 0x322   : > { %vm3596_vm10 = vcmp.gt.f32.partialorder %v3595_v35, 1.0 }
 0x323   : > { %v4625_v18 = vsel %vm3596_vm10, 1.0, %v7414_v41 }
 0x324   : > { %v3599_v1 = vsub.f32 1.0, %v4625_v18  ;;  %v3601_v26 = vsub.f32 %v4625_v18, %v3590_v39  ;;  %v3715_v7 = vpop.f32.mrf.mxu3 }
 0x326   : > { %v3600_v37 = vmul.f32 %v3599_v1, %v3595_v35  ;;  %v3602_v55 = vmul.f32 0.33333334, %v3601_v26  ;;  %v3677_v53 = vpop.f32.mrf.mxu2 }
 0x328   : > { %v3603_v58 = vadd.f32 %v3602_v55, %v3590_v39  ;;  %v3605_v38 = vmul.f32 0.8, %v3600_v37 }
 0x32a   : > { %3604 = vst.msk [vmem:[%s7050_s20 + $0x5] sm:$0x1] %vm3537_vm4, %v3603_v58  ;;  %v3608_v29 = vadd.f32 %v3606_v47, %v3605_v38  ;;  %v3716_v47 = vadd.f32 %v3715_v7, %v3674_v9 }
 0x32c   : > { %vm3609_vm11 = vcmp.gt.f32.partialorder %v3608_v29, 1.0  ;;  %v3718_v35 = vpop.f32.mrf.mxu3 }
 0x32d   : > { %v4626_v42 = vsel %vm3609_vm11, 1.0, %v7414_v41 }
 0x32e   : > { %v3612_v2 = vsub.f32 1.0, %v4626_v42  ;;  %v3614_v4 = vsub.f32 %v4626_v42, %v3603_v58  ;;  %v3680_v18 = vpop.f32.mrf.mxu2  ;;  %v3713_v42 = vadd.f32 %v3712_v21, %v3671_v34 }
 0x330   : > { %v3613_v49 = vmul.f32 %v3612_v2, %v3608_v29  ;;  %v3615_v12 = vmul.f32 0.33333334, %v3614_v4  ;;  %v3710_v4 = vadd.f32 %v3709_v43, %v3668_v50 }
 0x332   : > { %v3616_v23 = vadd.f32 %v3615_v12, %v3603_v58  ;;  %v3618_v16 = vmul.f32 0.8, %v3613_v49  ;;  %v3719_v58 = vadd.f32 %v3718_v35, %v3677_v53  ;;  %v3731_v49 = vmul.f32 %v3716_v47, %v6586_v17  ;;  %v7455_v17 = vld [vmem:[#allocation4_spill] sm:$0xff]  ;;  %v7143_v35 = vld [vmem:[%s7376_s4 + $0x38] sm:$0xff] }
 0x333   : > { %v3707_v12 = vadd.f32 %v3706_v63, %v7070_v31  ;;  %v7161_v47 = vld [vmem:[%s7376_s4 + $0x20] sm:$0xff] }
 0x334   : > { %3617 = vst.msk [vmem:[%s7050_s20 + $0x6] sm:$0x1] %vm3537_vm4, %v3616_v23  ;;  %v3621_v45 = vadd.f32 %v3619_v20, %v3618_v16  ;;  %v3721_v1 = vpop.f32.mrf.mxu3  ;;  %v3732_v2 = vmul.f32 %v3719_v58, %v6580_v14  ;;  %v3729_v16 = vmul.f32 %v3710_v4, %v6598_v32  ;;  %v7454_v14 = vld [vmem:[#allocation9_spill] sm:$0xff]  ;;  %v7457_v32 = vld [vmem:[#allocation26_spill] sm:$0xff] }
 0x335   : > { %v3722_v37 = vadd.f32 %v3721_v1, %v3680_v18 }
 0x336   : > { %vm3622_vm12 = vcmp.gt.f32.partialorder %v3621_v45, 1.0  ;;  %v3683_v26 = vpop.f32.mrf.mxu2 }
 0x337   : > { %v4627_v30 = vsel %vm3622_vm12, 1.0, %v7414_v41  ;;  %v3733_v29 = vmul.f32 %v3722_v37, %v6573_v54  ;;  %v3727_v54 = vmul.f32 %v7073_v56, %v6612_v0  ;;  %v7459_v0 = vld [vmem:[#allocation28_spill] sm:$0xff] }
 0x338   : > { %v3625_v25 = vsub.f32 %v4627_v30, %v3616_v23 }
 0x33a   : > { %v3626_v39 = vmul.f32 0.33333334, %v3625_v25 }
 0x33c   : > { %v3627_v5 = vadd.f32 %v3626_v39, %v3616_v23  ;;  %v3724_v59 = vpop.f32.mrf.mxu3  ;;  %v3730_v23 = vmul.f32 %v3713_v42, %v6592_v24  ;;  %v7456_v24 = vld [vmem:[#allocation11_spill] sm:$0xff] }
 0x33d   : > { %v3725_v55 = vadd.f32 %v3724_v59, %v3683_v26  ;;  %v7149_v26 = vld [vmem:[%s7376_s4 + $0x30] sm:$0xff] }
 0x33e   : > { %3628 = vst.msk [vmem:[%s7050_s20 + $0x7] sm:$0x1] %vm3537_vm4, %v3627_v5 }
 0x33f   : > { %v3734_v38 = vmul.f32 %v3725_v55, %v6568_v8  ;;  %v3728_v8 = vmul.f32 %v3707_v12, %v6606_v10  ;;  %v7458_v10 = vld [vmem:[#allocation27_spill] sm:$0xff]  ;;  %v7155_v55 = vld [vmem:[%s7376_s4 + $0x28] sm:$0xff] }
 0x341   : > { %3743 = vmatpush.msrb.mxu0 %v3734_v38 }
 0x343   : > { %3744 = vmatpush.msrb.mxu0 %v3733_v29 }
 0x345   : > { %3745 = vmatpush.msrb.mxu0 %v3732_v2  ;;  %v7167_v2 = vld [vmem:[%s7376_s4 + $0x18] sm:$0xff] }
 0x347   : > { %3746 = vmatpush.msrb.mxu0 %v3731_v49  ;;  %v7173_v49 = vld [vmem:[%s7376_s4 + $0x10] sm:$0xff] }
 0x349   : > { %3747 = vmatpush.msrb.mxu0 %v3730_v23  ;;  %v7179_v23 = vld [vmem:[%s7376_s4 + $0x8] sm:$0xff] }
 0x34b   : > { %3748 = vmatpush.msrb.mxu0 %v3729_v16 }
 0x34d   : > { %3749 = vmatpush.msrb.mxu0 %v3728_v8  ;;  %v7185_v8 = vld [vmem:[%s7376_s4] sm:$0xff] }
 0x34f   : > { %3750 = vmatpush.msrb.mxu0 %v3727_v54 }
 0x350   : > { %4628 = vmatmul.msk.f32.vlgmr.msrb.gmra.mxu0 %vm3482_vm6, %v6624_v22  ;;  %v7460_v22 = vld [vmem:[#allocation29_spill] sm:$0xff] }
 0x351   : > { %3931 = vmatpush.msra.mxu0 %v6880_v51  ;;  %v7465_v51 = vld [vmem:[#allocation32_spill] sm:$0xff] }
 0x353   : > { %3932 = vmatpush.msra.mxu0 %v6888_v44  ;;  %v7466_v44 = vld [vmem:[#allocation15_spill] sm:$0xff] }
 0x355   : > { %3933 = vmatpush.msra.mxu0 %v6895_v19  ;;  %v7467_v19 = vld [vmem:[#allocation33_spill] sm:$0xff] }
 0x357   : > { %3934 = vmatpush.msra.mxu0 %v6906_v3  ;;  %v7468_v3 = vld [vmem:[#allocation34_spill] sm:$0xff] }
 0x359   : > { %3935 = vmatpush.msra.mxu0 %v6914_v52  ;;  %v7469_v52 = vld [vmem:[#allocation35_spill] sm:$0xff] }
 0x35b   : > { %3936 = vmatpush.msra.mxu0 %v6921_v28  ;;  %v7470_v28 = vld [vmem:[#allocation36_spill] sm:$0xff] }
 0x35d   : > { %3937 = vmatpush.msra.mxu0 %v6928_v62  ;;  %v7471_v62 = vld [vmem:[#allocation17_spill] sm:$0xff] }
 0x35f   : > { %3938 = vmatpush.msra.mxu0 %v6936_v46  ;;  %v7472_v46 = vld [vmem:[#allocation19_spill] sm:$0xff] }
 0x361   : > { %3939 = vmatpush.msra.mxu0 %v6943_v40  ;;  %v7473_v40 = vld [vmem:[#allocation21_spill] sm:$0xff] }
 0x363   : > { %3940 = vmatpush.msra.mxu0 %v6951_v57  ;;  %v7474_v57 = vld [vmem:[#allocation24_spill] sm:$0xff] }
 0x365   : > { %3941 = vmatpush.msra.mxu0 %v6957_v36 }
 0x367   : > { %3942 = vmatpush.msra.mxu0 %v6963_v61  ;;  %v3907_v61 = vpop.f32.mrf.mxu2 }
 0x369   : > { %3943 = vmatpush.msra.mxu0 %v6969_v33 }
 0x36b   : > { %3944 = vmatpush.msra.mxu0 %v6978_v6 }
 0x36d   : > { %3945 = vmatpush.msra.mxu0 %v6984_v11  ;;  %v7461_v11 = vld [vmem:[#allocation13_spill] sm:$0xff] }
 0x36f   : > { %3946 = vmatpush.msra.mxu0 %v6990_v13  ;;  %v3910_v33 = vpop.f32.mrf.mxu2 }
 0x370   : > { %3947 = vmatmul.f32.vlgmr.msra.gmra.mxu0 %v6406_v27  ;;  %v7462_v27 = vld [vmem:[#allocation30_spill] sm:$0xff] }
 0x371   : > { %4245 = vmatpush.msrb.mxu0 %v6735_v48  ;;  %v7463_v48 = vld [vmem:[#allocation5_spill] sm:$0xff] }
 0x373   : > { %4246 = vmatpush.msrb.mxu0 %v6749_v15  ;;  %v7464_v15 = vld [vmem:[#allocation31_spill] sm:$0xff] }
 0x375   : > { %4247 = vmatpush.msrb.mxu0 %v7454_v14  ;;  %v7191_v14 = vld [vmem:[%s7377_s5] sm:$0xff] }
 0x377   : > { %4248 = vmatpush.msrb.mxu0 %v7455_v17  ;;  %v3913_v31 = vpop.f32.mrf.mxu2  ;;  %v4713_v17 = vld [vmem:[%s7375_s3 + $0x78] sm:$0xff] }
 0x378   : > { %3950 = vmatmul.f32.gmra.mxu0 %v7456_v24  ;;  %v4714_v24 = vld [vmem:[%s7375_s3 + $0x70] sm:$0xff] }
 0x379   : > { %4249 = vmatpush.msrb.mxu0 %v7457_v32  ;;  %v4715_v32 = vld [vmem:[%s7375_s3 + $0x68] sm:$0xff] }
 0x37b   : > { %4250 = vmatpush.msrb.mxu0 %v7458_v10  ;;  %v4716_v10 = vld [vmem:[%s7375_s3 + $0x60] sm:$0xff] }
 0x37d   : > { %4251 = vmatpush.msrb.mxu0 %v7459_v0  ;;  %v4717_v0 = vld [vmem:[%s7375_s3 + $0x58] sm:$0xff] }
 0x37f   : > { %4252 = vmatpush.msrb.mxu0 %v7460_v22  ;;  %v3916_v50 = vpop.f32.mrf.mxu2  ;;  %v4718_v22 = vld [vmem:[%s7375_s3 + $0x50] sm:$0xff] }
 0x380   : > { %3953 = vmatmul.f32.gmra.mxu0 %v7461_v11  ;;  %v4719_v11 = vld [vmem:[%s7375_s3 + $0x48] sm:$0xff] }
 0x381   : > { %4253 = vmatpush.msrb.mxu0 %v7462_v27  ;;  %v4720_v27 = vld [vmem:[%s7375_s3 + $0x40] sm:$0xff] }
 0x383   : > { %4254 = vmatpush.msrb.mxu0 %v7463_v48  ;;  %v4721_v48 = vld [vmem:[%s7375_s3 + $0x38] sm:$0xff] }
 0x385   : > { %4255 = vmatpush.msrb.mxu0 %v7464_v15 }
 0x387   : > { %4256 = vmatpush.msrb.mxu0 %v7465_v51  ;;  %v3919_v43 = vpop.f32.mrf.mxu2  ;;  %v4722_v51 = vld [vmem:[%s7375_s3 + $0x30] sm:$0xff] }
 0x388   : > { %3956 = vmatmul.f32.gmra.mxu0 %v7466_v44 }
 0x389   : > { %4257 = vmatpush.msrb.mxu0 %v7467_v19  ;;  %v4723_v19 = vld [vmem:[%s7375_s3 + $0x28] sm:$0xff] }
 0x38b   : > { %4258 = vmatpush.msrb.mxu0 %v7468_v3 }
 0x38d   : > { %4259 = vmatpush.msrb.mxu0 %v7469_v52 }
 0x38f   : > { %4260 = vmatpush.msrb.mxu0 %v7470_v28  ;;  %v3922_v45 = vpop.f32.mrf.mxu2 }
 0x390   : > { %3959 = vmatmul.f32.gmra.mxu0 %v7471_v62  ;;  %v4724_v62 = vld [vmem:[%s7375_s3 + $0x20] sm:$0xff] }
 0x397   : > { %v3925_v30 = vpop.f32.mrf.mxu2 }
 0x398   : > { %3962 = vmatmul.f32.gmra.mxu0 %v7472_v46 }
 0x39f   : > { %v3928_v25 = vpop.f32.mrf.mxu2 }
 0x3a0   : > { %3965 = vmatmul.f32.gmra.mxu0 %v7473_v40 }
 0x3a8   : > { %3968 = vmatmul.f32.gmra.mxu0 %v7474_v57  ;;  %v4725_v57 = vld [vmem:[%s7375_s3 + $0x18] sm:$0xff] }
 0x3cd   : > { %v3752_v36 = vpop.f32.mrf.mxu0 }
 0x3ce   : > { %3771 = vmatmul.f32.vlgmr.msra.gmra.mxu1 %v3752_v36 }
 0x3ed   : > { %v3948_v6 = vpop.f32.mrf.mxu0 }
 0x3ee   : > { %v3949_v13 = vadd.f32 %v3948_v6, %v3907_v61  ;;  %v4726_v61 = vld [vmem:[%s7375_s3 + $0x10] sm:$0xff]  ;;  %v4727_v6 = vld [vmem:[%s7375_s3 + $0x8] sm:$0xff] }
 0x3f0   : > { %v3972_v54 = vmul.f32 %v7185_v8, %v3949_v13  ;;  %v4728_v13 = vld [vmem:[%s7375_s3] sm:$0xff] }
 0x3f5   : > { %v3951_v56 = vpop.f32.mrf.mxu0 }
 0x3f6   : > { %v3952_v42 = vadd.f32 %v3951_v56, %v3910_v33  ;;  %v7475_v56 = vld [vmem:[#allocation12_spill] sm:$0xff] }
 0x3f8   : > { %v3973_v16 = vmul.f32 %v7179_v23, %v3952_v42 }
 0x3fd   : > { %v3954_v63 = vpop.f32.mrf.mxu0 }
 0x3fe   : > { %v3955_v38 = vadd.f32 %v3954_v63, %v3913_v31 }
 0x400   : > { %v3974_v12 = vmul.f32 %v7173_v49, %v3955_v38 }
 0x405   : > { %v3957_v34 = vpop.f32.mrf.mxu0 }
 0x406   : > { %v3958_v37 = vadd.f32 %v3957_v34, %v3916_v50 }
 0x408   : > { %v3975_v4 = vmul.f32 %v7167_v2, %v3958_v37  ;;  %v7477_v37 = vld [vmem:[#allocation16_spill] sm:$0xff] }
 0x40d   : > { %v3960_v20 = vpop.f32.mrf.mxu0 }
 0x40e   : > { %v3961_v1 = vadd.f32 %v3960_v20, %v3919_v43 }
 0x410   : > { %v3976_v29 = vmul.f32 %v7161_v47, %v3961_v1 }
 0x415   : > { %v3963_v21 = vpop.f32.mrf.mxu0 }
 0x416   : > { %v3964_v53 = vadd.f32 %v3963_v21, %v3922_v45 }
 0x418   : > { %v3977_v58 = vmul.f32 %v7155_v55, %v3964_v53 }
 0x41d   : > { %v3966_v9 = vpop.f32.mrf.mxu0 }
 0x41e   : > { %v3967_v5 = vadd.f32 %v3966_v9, %v3925_v30  ;;  %v7476_v9 = vld [vmem:[#allocation14_spill] sm:$0xff] }
 0x420   : > { %v3978_v59 = vmul.f32 %v7149_v26, %v3967_v5 }
 0x425   : > { %v3969_v39 = vpop.f32.mrf.mxu0 }
 0x426   : > { %v3970_v7 = vadd.f32 %v3969_v39, %v3928_v25 }
 0x428   : > { %v3979_v18 = vmul.f32 %v7143_v35, %v3970_v7 }
 0x42a   : > { %3988 = vmatpush.msrb.mxu1 %v3979_v18 }
 0x42c   : > { %3989 = vmatpush.msrb.mxu1 %v3978_v59 }
 0x42e   : > { %3990 = vmatpush.msrb.mxu1 %v3977_v58 }
 0x430   : > { %3991 = vmatpush.msrb.mxu1 %v3976_v29 }
 0x432   : > { %3992 = vmatpush.msrb.mxu1 %v3975_v4 }
 0x434   : > { %3993 = vmatpush.msrb.mxu1 %v3974_v12 }
 0x436   : > { %3994 = vmatpush.msrb.mxu1 %v3973_v16  ;;  %v7478_v16 = vld [vmem:[#allocation18_spill] sm:$0xff] }
 0x438   : > { %3995 = vmatpush.msrb.mxu1 %v3972_v54 }
 0x439   : > { %4637 = vmatmul.msk.f32.vlgmr.msrb.gmra.mxu1 %vm3482_vm6, %v7191_v14 }
 0x43a   : > { %4135 = vmatpush.msra.mxu1 %v4713_v17 }
 0x43c   : > { %4136 = vmatpush.msra.mxu1 %v4714_v24 }
 0x43e   : > { %4137 = vmatpush.msra.mxu1 %v4715_v32 }
 0x440   : > { %4138 = vmatpush.msra.mxu1 %v4716_v10 }
 0x442   : > { %4139 = vmatpush.msra.mxu1 %v4717_v0 }
 0x444   : > { %4140 = vmatpush.msra.mxu1 %v4718_v22 }
 0x446   : > { %4141 = vmatpush.msra.mxu1 %v4719_v11  ;;  %v7479_v11 = vld [vmem:[#allocation20_spill] sm:$0xff] }
 0x448   : > { %4142 = vmatpush.msra.mxu1 %v4720_v27 }
 0x44a   : > { %4143 = vmatpush.msra.mxu1 %v4721_v48 }
 0x44b   : > { %v3772_v15 = vpop.f32.mrf.mxu1 }
 0x44c   : > { %4144 = vmatpush.msra.mxu1 %v4722_v51  ;;  %v7226_v44 = vadd.f32 %v7040_v60, %v3772_v15 }
 0x44e   : > { %vm3776_vm13 = vcmp.gt.f32.partialorder %v7226_v44, 1.0  ;;  %4145 = vmatpush.msra.mxu1 %v4723_v19  ;;  %v3786_v40 = vrot.slane %v7226_v44, 1  ;;  %v3799_v20 = vrot.slane %v7226_v44, 2  ;;  %v3812_v59 = vrot.slane %v7226_v44, 3 }
 0x44f   : > { %v4629_v3 = vsel %vm3776_vm13, 1.0, %v7414_v41  ;;  %v3825_v24 = vrot.slane %v7226_v44, 4  ;;  %v3838_v19 = vrot.slane %v7226_v44, 5 }
 0x450   : > { %v3779_v52 = vsub.f32 1.0, %v4629_v3  ;;  %v3781_v28 = vmul.f32 0.33333334, %v4629_v3  ;;  %4146 = vmatpush.msra.mxu1 %v4724_v62 }
 0x452   : > { %v3780_v46 = vmul.f32 %v3779_v52, %v7226_v44  ;;  %3783 = vst.msk [vmem:[%s7050_s20 + $0x8] sm:$0x1] %vm3537_vm4, %v3781_v28  ;;  %4147 = vmatpush.msra.mxu1 %v4725_v57 }
 0x454   : > { %v3784_v36 = vmul.f32 0.8, %v3780_v46  ;;  %4148 = vmatpush.msra.mxu1 %v4726_v61 }
 0x456   : > { %v3788_v33 = vadd.f32 %v3786_v40, %v3784_v36  ;;  %4149 = vmatpush.msra.mxu1 %v4727_v6 }
 0x458   : > { %vm3789_vm14 = vcmp.gt.f32.partialorder %v3788_v33, 1.0  ;;  %4150 = vmatpush.msra.mxu1 %v4728_v13  ;;  %v7481_v13 = vld [vmem:[#allocation23_spill] sm:$0xff] }
 0x459   : > { %v4630_v31 = vsel %vm3789_vm14, 1.0, %v7414_v41  ;;  %4151 = vmatmul.f32.vlgmr.msra.gmra.mxu1 %v7475_v56 }
 0x45a   : > { %v3792_v50 = vsub.f32 1.0, %v4630_v31  ;;  %v3794_v63 = vsub.f32 %v4630_v31, %v3781_v28 }
 0x45c   : > { %v3793_v34 = vmul.f32 %v3792_v50, %v3788_v33  ;;  %v3795_v43 = vmul.f32 0.33333334, %v3794_v63  ;;  %v3851_v33 = vrot.slane %v7226_v44, 6 }
 0x45e   : > { %v3796_v45 = vadd.f32 %v3795_v43, %v3781_v28  ;;  %v3798_v21 = vmul.f32 0.8, %v3793_v34  ;;  %v7480_v28 = vld [vmem:[#allocation22_spill] sm:$0xff] }
 0x460   : > { %3797 = vst.msk [vmem:[%s7050_s20 + $0x9] sm:$0x1] %vm3537_vm4, %v3796_v45  ;;  %v3801_v30 = vadd.f32 %v3799_v20, %v3798_v21  ;;  %v7482_v21 = vld [vmem:[#allocation25_spill] sm:$0xff] }
 0x461   : > { %4154 = vmatmul.f32.gmra.mxu1 %v7476_v9 }
 0x462   : > { %vm3802_vm15 = vcmp.gt.f32.partialorder %v3801_v30, 1.0 }
 0x463   : > { %v4631_v25 = vsel %vm3802_vm15, 1.0, %v7414_v41 }
 0x464   : > { %v3805_v39 = vsub.f32 1.0, %v4631_v25  ;;  %v3807_v5 = vsub.f32 %v4631_v25, %v3796_v45 }
 0x466   : > { %v3806_v7 = vmul.f32 %v3805_v39, %v3801_v30  ;;  %v3808_v53 = vmul.f32 0.33333334, %v3807_v5 }
 0x468   : > { %v3809_v18 = vadd.f32 %v3808_v53, %v3796_v45  ;;  %v3811_v1 = vmul.f32 0.8, %v3806_v7  ;;  %v3864_v45 = vrot.slane %v7226_v44, 7  ;;  %v4193_v53 = vpop.f32.mrf.mxu3 }
 0x469   : > { %4157 = vmatmul.f32.gmra.mxu1 %v7477_v37 }
 0x46a   : > { %3810 = vst.msk [vmem:[%s7050_s20 + $0xa] sm:$0x1] %vm3537_vm4, %v3809_v18  ;;  %v3814_v58 = vadd.f32 %v3812_v59, %v3811_v1 }
 0x46c   : > { %vm3815_vm0 = vcmp.gt.f32.partialorder %v3814_v58, 1.0 }
 0x46d   : > { %v4632_v38 = vsel %vm3815_vm0, 1.0, %v7414_v41 }
 0x46e   : > { %v3818_v29 = vsub.f32 1.0, %v4632_v38  ;;  %v3820_v42 = vsub.f32 %v4632_v38, %v3809_v18 }
 0x470   : > { %v3819_v4 = vmul.f32 %v3818_v29, %v3814_v58  ;;  %v3821_v12 = vmul.f32 0.33333334, %v3820_v42 }
 0x471   : > { %4160 = vmatmul.f32.gmra.mxu1 %v7478_v16 }
 0x472   : > { %v3822_v54 = vadd.f32 %v3821_v12, %v3809_v18  ;;  %v3824_v17 = vmul.f32 0.8, %v3819_v4  ;;  %v4196_v18 = vpop.f32.mrf.mxu3 }
 0x474   : > { %3823 = vst.msk [vmem:[%s7050_s20 + $0xb] sm:$0x1] %vm3537_vm4, %v3822_v54  ;;  %v3827_v32 = vadd.f32 %v3825_v24, %v3824_v17 }
 0x476   : > { %vm3828_vm1 = vcmp.gt.f32.partialorder %v3827_v32, 1.0 }
 0x477   : > { %v4633_v10 = vsel %vm3828_vm1, 1.0, %v7414_v41 }
 0x478   : > { %v3831_v0 = vsub.f32 1.0, %v4633_v10  ;;  %v3833_v22 = vsub.f32 %v4633_v10, %v3822_v54 }
 0x479   : > { %4163 = vmatmul.f32.gmra.mxu1 %v7479_v11 }
 0x47a   : > { %v3832_v27 = vmul.f32 %v3831_v0, %v3827_v32  ;;  %v3834_v48 = vmul.f32 0.33333334, %v3833_v22  ;;  %v4199_v44 = vpop.f32.mrf.mxu3 }
 0x47c   : > { %v3835_v15 = vadd.f32 %v3834_v48, %v3822_v54  ;;  %v3837_v51 = vmul.f32 0.8, %v3832_v27 }
 0x47e   : > { %3836 = vst.msk [vmem:[%s7050_s20 + $0xc] sm:$0x1] %vm3537_vm4, %v3835_v15  ;;  %v3840_v3 = vadd.f32 %v3838_v19, %v3837_v51 }
 0x480   : > { %vm3841_vm2 = vcmp.gt.f32.partialorder %v3840_v3, 1.0 }
 0x481   : > { %v4634_v52 = vsel %vm3841_vm2, 1.0, %v7414_v41  ;;  %4166 = vmatmul.f32.gmra.mxu1 %v7480_v28 }
 0x482   : > { %v3844_v62 = vsub.f32 1.0, %v4634_v52  ;;  %v3846_v46 = vsub.f32 %v4634_v52, %v3835_v15  ;;  %v4202_v58 = vpop.f32.mrf.mxu3 }
 0x484   : > { %v3845_v40 = vmul.f32 %v3844_v62, %v3840_v3  ;;  %v3847_v57 = vmul.f32 0.33333334, %v3846_v46 }
 0x486   : > { %v3848_v36 = vadd.f32 %v3847_v57, %v3835_v15  ;;  %v3850_v61 = vmul.f32 0.8, %v3845_v40 }
 0x488   : > { %3849 = vst.msk [vmem:[%s7050_s20 + $0xd] sm:$0x1] %vm3537_vm4, %v3848_v36  ;;  %v3853_v6 = vadd.f32 %v3851_v33, %v3850_v61 }
 0x489   : > { %4169 = vmatmul.f32.gmra.mxu1 %v7481_v13 }
 0x48a   : > { %vm3854_vm3 = vcmp.gt.f32.partialorder %v3853_v6, 1.0  ;;  %v4205_v42 = vpop.f32.mrf.mxu3 }
 0x48b   : > { %v4635_v31 = vsel %vm3854_vm3, 1.0, %v7414_v41 }
 0x48c   : > { %v3857_v56 = vsub.f32 1.0, %v4635_v31  ;;  %v3859_v50 = vsub.f32 %v4635_v31, %v3848_v36 }
 0x48e   : > { %v3858_v63 = vmul.f32 %v3857_v56, %v3853_v6  ;;  %v3860_v34 = vmul.f32 0.33333334, %v3859_v50 }
 0x490   : > { %v3861_v43 = vadd.f32 %v3860_v34, %v3848_v36  ;;  %v3863_v20 = vmul.f32 0.8, %v3858_v63 }
 0x491   : > { %4172 = vmatmul.f32.gmra.mxu1 %v7482_v21 }
 0x492   : > { %3862 = vst.msk [vmem:[%s7050_s20 + $0xe] sm:$0x1] %vm3537_vm4, %v3861_v43  ;;  %v3866_v30 = vadd.f32 %v3864_v45, %v3863_v20  ;;  %v4208_v12 = vpop.f32.mrf.mxu3 }
 0x494   : > { %vm3867_vm5 = vcmp.gt.f32.partialorder %v3866_v30, 1.0 }
 0x495   : > { %v4636_v9 = vsel %vm3867_vm5, 1.0, %v7414_v41 }
 0x496   : > { %v3870_v25 = vsub.f32 %v4636_v9, %v3861_v43 }
 0x498   : > { %v3871_v39 = vmul.f32 0.33333334, %v3870_v25 }
 0x49a   : > { %v3872_v5 = vadd.f32 %v3871_v39, %v3861_v43  ;;  %v4211_v54 = vpop.f32.mrf.mxu3 }
 0x49c   : > { %3873 = vst.msk [vmem:[%s7050_s20 + $0xf] sm:$0x1] %vm3537_vm4, %v3872_v5 }
 0x4a2   : > { %v4214_v24 = vpop.f32.mrf.mxu3 }
 0x4b6   : > { %v3997_v7 = vpop.f32.mrf.mxu1 }
 0x4b7   : > { %4016 = vmatmul.f32.vlgmr.msrb.gmra.mxu2 %v3997_v7 }
 0x4d6   : > { %v4152_v1 = vpop.f32.mrf.mxu1 }
 0x4d7   : > { %v4194_v59 = vadd.f32 %v4193_v53, %v4152_v1 }
 0x4de   : > { %v4155_v37 = vpop.f32.mrf.mxu1 }
 0x4df   : > { %v4197_v52 = vadd.f32 %v4196_v18, %v4155_v37 }
 0x4e6   : > { %v4158_v38 = vpop.f32.mrf.mxu1 }
 0x4e7   : > { %v4200_v19 = vadd.f32 %v4199_v44, %v4158_v38 }
 0x4e9   : > { %v4219_v62 = vmul.f32 %v7173_v49, %v4200_v19 }
 0x4ee   : > { %v4161_v29 = vpop.f32.mrf.mxu1 }
 0x4ef   : > { %v4203_v15 = vadd.f32 %v4202_v58, %v4161_v29 }
 0x4f1   : > { %v4220_v28 = vmul.f32 %v7167_v2, %v4203_v15 }
 0x4f6   : > { %v4164_v4 = vpop.f32.mrf.mxu1 }
 0x4f7   : > { %v4206_v27 = vadd.f32 %v4205_v42, %v4164_v4 }
 0x4f9   : > { %v4221_v3 = vmul.f32 %v7161_v47, %v4206_v27 }
 0x4fe   : > { %v4167_v16 = vpop.f32.mrf.mxu1 }
 0x4ff   : > { %v4209_v22 = vadd.f32 %v4208_v12, %v4167_v16 }
 0x501   : > { %v4222_v51 = vmul.f32 %v7155_v55, %v4209_v22 }
 0x506   : > { %v4170_v17 = vpop.f32.mrf.mxu1 }
 0x507   : > { %v4212_v10 = vadd.f32 %v4211_v54, %v4170_v17 }
 0x509   : > { %v4223_v48 = vmul.f32 %v7149_v26, %v4212_v10  ;;  %v4217_v26 = vmul.f32 %v7185_v8, %v4194_v59 }
 0x50e   : > { %v4173_v32 = vpop.f32.mrf.mxu1 }
 0x50f   : > { %v4215_v0 = vadd.f32 %v4214_v24, %v4173_v32 }
 0x511   : > { %v4224_v11 = vmul.f32 %v7143_v35, %v4215_v0  ;;  %v4218_v35 = vmul.f32 %v7179_v23, %v4197_v52 }
 0x513   : > { %4233 = vmatpush.msra.mxu2 %v4224_v11 }
 0x515   : > { %4234 = vmatpush.msra.mxu2 %v4223_v48 }
 0x517   : > { %4235 = vmatpush.msra.mxu2 %v4222_v51 }
 0x519   : > { %4236 = vmatpush.msra.mxu2 %v4221_v3 }
 0x51b   : > { %4237 = vmatpush.msra.mxu2 %v4220_v28 }
 0x51d   : > { %4238 = vmatpush.msra.mxu2 %v4219_v62 }
 0x51f   : > { %4239 = vmatpush.msra.mxu2 %v4218_v35 }
 0x521   : > { %4240 = vmatpush.msra.mxu2 %v4217_v26 }
 0x522   : > { %4646 = vmatmul.msk.f32.vlgmr.msra.gmra.mxu2 %vm3482_vm6, %v7191_v14 }
 0x53a   : > { %v4017_v55 = vpop.f32.mrf.mxu2 }
 0x53b   : > { %v7298_v47 = vadd.f32 %v7040_v60, %v4017_v55 }
 0x53d   : > { %vm4021_vm7 = vcmp.gt.f32.partialorder %v7298_v47, 1.0  ;;  %v4031_v8 = vrot.slane %v7298_v47, 1  ;;  %v4044_v13 = vrot.slane %v7298_v47, 2  ;;  %v4057_v9 = vrot.slane %v7298_v47, 3 }
 0x53e   : > { %v4638_v2 = vsel %vm4021_vm7, 1.0, %v7414_v41  ;;  %v4070_v44 = vrot.slane %v7298_v47, 4  ;;  %v4083_v54 = vrot.slane %v7298_v47, 5  ;;  %v4096_v48 = vrot.slane %v7298_v47, 6 }
 0x53f   : > { %v4024_v49 = vsub.f32 1.0, %v4638_v2  ;;  %v4026_v46 = vmul.f32 0.33333334, %v4638_v2  ;;  %v4109_v26 = vrot.slane %v7298_v47, 7 }
 0x541   : > { %v4025_v23 = vmul.f32 %v4024_v49, %v7298_v47  ;;  %4028 = vst.msk [vmem:[%s7050_s20 + $0x10] sm:$0x1] %vm3537_vm4, %v4026_v46 }
 0x543   : > { %v4029_v40 = vmul.f32 0.8, %v4025_v23 }
 0x545   : > { %v4033_v57 = vadd.f32 %v4031_v8, %v4029_v40 }
 0x547   : > { %vm4034_vm6 = vcmp.gt.f32.partialorder %v4033_v57, 1.0 }
 0x548   : > { %v4639_v14 = vsel %vm4034_vm6, 1.0, %v7414_v41 }
 0x549   : > { %v4037_v36 = vsub.f32 1.0, %v4639_v14  ;;  %v4039_v61 = vsub.f32 %v4639_v14, %v4026_v46 }
 0x54b   : > { %v4038_v33 = vmul.f32 %v4037_v36, %v4033_v57  ;;  %v4040_v6 = vmul.f32 0.33333334, %v4039_v61 }
 0x54d   : > { %v4041_v31 = vadd.f32 %v4040_v6, %v4026_v46  ;;  %v4043_v56 = vmul.f32 0.8, %v4038_v33 }
 0x54f   : > { %4042 = vst.msk [vmem:[%s7050_s20 + $0x11] sm:$0x1] %vm3537_vm4, %v4041_v31  ;;  %v4046_v50 = vadd.f32 %v4044_v13, %v4043_v56 }
 0x551   : > { %vm4047_vm8 = vcmp.gt.f32.partialorder %v4046_v50, 1.0 }
 0x552   : > { %v4640_v63 = vsel %vm4047_vm8, 1.0, %v7414_v41 }
 0x553   : > { %v4050_v34 = vsub.f32 1.0, %v4640_v63  ;;  %v4052_v43 = vsub.f32 %v4640_v63, %v4041_v31 }
 0x555   : > { %v4051_v20 = vmul.f32 %v4050_v34, %v4046_v50  ;;  %v4053_v45 = vmul.f32 0.33333334, %v4052_v43 }
 0x557   : > { %v4054_v21 = vadd.f32 %v4053_v45, %v4041_v31  ;;  %v4056_v30 = vmul.f32 0.8, %v4051_v20 }
 0x559   : > { %4055 = vst.msk [vmem:[%s7050_s20 + $0x12] sm:$0x1] %vm3537_vm4, %v4054_v21  ;;  %v4059_v25 = vadd.f32 %v4057_v9, %v4056_v30 }
 0x55b   : > { %vm4060_vm9 = vcmp.gt.f32.partialorder %v4059_v25, 1.0 }
 0x55c   : > { %v4641_v39 = vsel %vm4060_vm9, 1.0, %v7414_v41 }
 0x55d   : > { %v4063_v5 = vsub.f32 1.0, %v4641_v39  ;;  %v4065_v7 = vsub.f32 %v4641_v39, %v4054_v21 }
 0x55f   : > { %v4064_v53 = vmul.f32 %v4063_v5, %v4059_v25  ;;  %v4066_v18 = vmul.f32 0.33333334, %v4065_v7 }
 0x561   : > { %v4067_v1 = vadd.f32 %v4066_v18, %v4054_v21  ;;  %v4069_v59 = vmul.f32 0.8, %v4064_v53 }
 0x563   : > { %4068 = vst.msk [vmem:[%s7050_s20 + $0x13] sm:$0x1] %vm3537_vm4, %v4067_v1  ;;  %v4072_v37 = vadd.f32 %v4070_v44, %v4069_v59 }
 0x565   : > { %vm4073_vm10 = vcmp.gt.f32.partialorder %v4072_v37, 1.0 }
 0x566   : > { %v4642_v58 = vsel %vm4073_vm10, 1.0, %v7414_v41 }
 0x567   : > { %v4076_v38 = vsub.f32 1.0, %v4642_v58  ;;  %v4078_v29 = vsub.f32 %v4642_v58, %v4067_v1 }
 0x569   : > { %v4077_v42 = vmul.f32 %v4076_v38, %v4072_v37  ;;  %v4079_v4 = vmul.f32 0.33333334, %v4078_v29 }
 0x56b   : > { %v4080_v12 = vadd.f32 %v4079_v4, %v4067_v1  ;;  %v4082_v16 = vmul.f32 0.8, %v4077_v42 }
 0x56d   : > { %4081 = vst.msk [vmem:[%s7050_s20 + $0x14] sm:$0x1] %vm3537_vm4, %v4080_v12  ;;  %v4085_v17 = vadd.f32 %v4083_v54, %v4082_v16 }
 0x56f   : > { %vm4086_vm11 = vcmp.gt.f32.partialorder %v4085_v17, 1.0 }
 0x570   : > { %v4643_v24 = vsel %vm4086_vm11, 1.0, %v7414_v41 }
 0x571   : > { %v4089_v32 = vsub.f32 1.0, %v4643_v24  ;;  %v4091_v10 = vsub.f32 %v4643_v24, %v4080_v12 }
 0x573   : > { %v4090_v0 = vmul.f32 %v4089_v32, %v4085_v17  ;;  %v4092_v22 = vmul.f32 0.33333334, %v4091_v10 }
 0x575   : > { %v4093_v11 = vadd.f32 %v4092_v22, %v4080_v12  ;;  %v4095_v27 = vmul.f32 0.8, %v4090_v0 }
 0x577   : > { %4094 = vst.msk [vmem:[%s7050_s20 + $0x15] sm:$0x1] %vm3537_vm4, %v4093_v11  ;;  %v4098_v15 = vadd.f32 %v4096_v48, %v4095_v27 }
 0x579   : > { %vm4099_vm12 = vcmp.gt.f32.partialorder %v4098_v15, 1.0 }
 0x57a   : > { %v4644_v51 = vsel %vm4099_vm12, 1.0, %v7414_v41 }
 0x57b   : > { %v4102_v19 = vsub.f32 1.0, %v4644_v51  ;;  %v4104_v3 = vsub.f32 %v4644_v51, %v4093_v11 }
 0x57d   : > { %v4103_v52 = vmul.f32 %v4102_v19, %v4098_v15  ;;  %v4105_v28 = vmul.f32 0.33333334, %v4104_v3 }
 0x57f   : > { %v4106_v62 = vadd.f32 %v4105_v28, %v4093_v11  ;;  %v4108_v35 = vmul.f32 0.8, %v4103_v52 }
 0x581   : > { %4107 = vst.msk [vmem:[%s7050_s20 + $0x16] sm:$0x1] %vm3537_vm4, %v4106_v62  ;;  %v4111_v55 = vadd.f32 %v4109_v26, %v4108_v35 }
 0x583   : > { %vm4112_vm13 = vcmp.gt.f32.partialorder %v4111_v55, 1.0 }
 0x584   : > { %v4645_v2 = vsel %vm4112_vm13, 1.0, %v7414_v41 }
 0x585   : > { %v4115_v49 = vsub.f32 %v4645_v2, %v4106_v62 }
 0x587   : > { %v4116_v46 = vmul.f32 0.33333334, %v4115_v49 }
 0x589   : > { %v4117_v23 = vadd.f32 %v4116_v46, %v4106_v62 }
 0x58b   : > { %4118 = vst.msk [vmem:[%s7050_s20 + $0x17] sm:$0x1] %vm3537_vm4, %v4117_v23 }
 0x5a5   : > { %v4242_v8 = vpop.f32.mrf.mxu2 }
 0x5a6   : > { %4261 = vmatmul.f32.vlgmr.msrb.gmra.mxu0 %v4242_v8 }
 0x623   : > { %v4262_v40 = vpop.f32.mrf.mxu0 }
 0x624   : > { %v7334_v57 = vadd.f32 %v7040_v60, %v4262_v40 }
 0x626   : > { %vm4266_vm14 = vcmp.gt.f32.partialorder %v7334_v57, 1.0  ;;  %v4276_v6 = vrot.slane %v7334_v57, 1  ;;  %v4289_v20 = vrot.slane %v7334_v57, 2  ;;  %v4302_v53 = vrot.slane %v7334_v57, 3 }
 0x627   : > { %v4647_v47 = vsel %vm4266_vm14, 1.0, %v7414_v41  ;;  %v4315_v42 = vrot.slane %v7334_v57, 4  ;;  %v4328_v0 = vrot.slane %v7334_v57, 5  ;;  %v4341_v52 = vrot.slane %v7334_v57, 6 }
 0x628   : > { %v4269_v14 = vsub.f32 1.0, %v4647_v47  ;;  %v4271_v36 = vmul.f32 0.33333334, %v4647_v47  ;;  %v4354_v23 = vrot.slane %v7334_v57, 7 }
 0x62a   : > { %v4270_v61 = vmul.f32 %v4269_v14, %v7334_v57  ;;  %4273 = vst.msk [vmem:[%s7050_s20 + $0x18] sm:$0x1] %vm3537_vm4, %v4271_v36 }
 0x62c   : > { %v4274_v33 = vmul.f32 0.8, %v4270_v61 }
 0x62e   : > { %v4278_v13 = vadd.f32 %v4276_v6, %v4274_v33 }
 0x630   : > { %vm4279_vm15 = vcmp.gt.f32.partialorder %v4278_v13, 1.0 }
 0x631   : > { %v4648_v31 = vsel %vm4279_vm15, 1.0, %v7414_v41 }
 0x632   : > { %v4282_v60 = vsub.f32 1.0, %v4648_v31  ;;  %v4284_v56 = vsub.f32 %v4648_v31, %v4271_v36 }
 0x634   : > { %v4283_v50 = vmul.f32 %v4282_v60, %v4278_v13  ;;  %v4285_v63 = vmul.f32 0.33333334, %v4284_v56 }
 0x636   : > { %v4286_v34 = vadd.f32 %v4285_v63, %v4271_v36  ;;  %v4288_v43 = vmul.f32 0.8, %v4283_v50 }
 0x638   : > { %4287 = vst.msk [vmem:[%s7050_s20 + $0x19] sm:$0x1] %vm3537_vm4, %v4286_v34  ;;  %v4291_v45 = vadd.f32 %v4289_v20, %v4288_v43 }
 0x63a   : > { %vm4292_vm0 = vcmp.gt.f32.partialorder %v4291_v45, 1.0 }
 0x63b   : > { %v4649_v21 = vsel %vm4292_vm0, 1.0, %v7414_v41 }
 0x63c   : > { %v4295_v30 = vsub.f32 1.0, %v4649_v21  ;;  %v4297_v9 = vsub.f32 %v4649_v21, %v4286_v34 }
 0x63e   : > { %v4296_v25 = vmul.f32 %v4295_v30, %v4291_v45  ;;  %v4298_v39 = vmul.f32 0.33333334, %v4297_v9 }
 0x640   : > { %v4299_v5 = vadd.f32 %v4298_v39, %v4286_v34  ;;  %v4301_v7 = vmul.f32 0.8, %v4296_v25 }
 0x642   : > { %4300 = vst.msk [vmem:[%s7050_s20 + $0x1a] sm:$0x1] %vm3537_vm4, %v4299_v5  ;;  %v4304_v18 = vadd.f32 %v4302_v53, %v4301_v7 }
 0x644   : > { %vm4305_vm1 = vcmp.gt.f32.partialorder %v4304_v18, 1.0 }
 0x645   : > { %v4650_v1 = vsel %vm4305_vm1, 1.0, %v7414_v41 }
 0x646   : > { %v4308_v59 = vsub.f32 1.0, %v4650_v1  ;;  %v4310_v44 = vsub.f32 %v4650_v1, %v4299_v5 }
 0x648   : > { %v4309_v37 = vmul.f32 %v4308_v59, %v4304_v18  ;;  %v4311_v58 = vmul.f32 0.33333334, %v4310_v44 }
 0x64a   : > { %v4312_v38 = vadd.f32 %v4311_v58, %v4299_v5  ;;  %v4314_v29 = vmul.f32 0.8, %v4309_v37 }
 0x64c   : > { %4313 = vst.msk [vmem:[%s7050_s20 + $0x1b] sm:$0x1] %vm3537_vm4, %v4312_v38  ;;  %v4317_v4 = vadd.f32 %v4315_v42, %v4314_v29 }
 0x64e   : > { %vm4318_vm2 = vcmp.gt.f32.partialorder %v4317_v4, 1.0 }
 0x64f   : > { %v4651_v12 = vsel %vm4318_vm2, 1.0, %v7414_v41 }
 0x650   : > { %v4321_v16 = vsub.f32 1.0, %v4651_v12  ;;  %v4323_v54 = vsub.f32 %v4651_v12, %v4312_v38 }
 0x652   : > { %v4322_v17 = vmul.f32 %v4321_v16, %v4317_v4  ;;  %v4324_v24 = vmul.f32 0.33333334, %v4323_v54 }
 0x654   : > { %v4325_v32 = vadd.f32 %v4324_v24, %v4312_v38  ;;  %v4327_v10 = vmul.f32 0.8, %v4322_v17 }
 0x656   : > { %4326 = vst.msk [vmem:[%s7050_s20 + $0x1c] sm:$0x1] %vm3537_vm4, %v4325_v32  ;;  %v4330_v22 = vadd.f32 %v4328_v0, %v4327_v10 }
 0x658   : > { %vm4331_vm3 = vcmp.gt.f32.partialorder %v4330_v22, 1.0 }
 0x659   : > { %v4652_v11 = vsel %vm4331_vm3, 1.0, %v7414_v41 }
 0x65a   : > { %v4334_v27 = vsub.f32 1.0, %v4652_v11  ;;  %v4336_v48 = vsub.f32 %v4652_v11, %v4325_v32 }
 0x65c   : > { %v4335_v15 = vmul.f32 %v4334_v27, %v4330_v22  ;;  %v4337_v51 = vmul.f32 0.33333334, %v4336_v48 }
 0x65e   : > { %v4338_v19 = vadd.f32 %v4337_v51, %v4325_v32  ;;  %v4340_v3 = vmul.f32 0.8, %v4335_v15 }
 0x660   : > { %4339 = vst.msk [vmem:[%s7050_s20 + $0x1d] sm:$0x1] %vm3537_vm4, %v4338_v19  ;;  %v4343_v28 = vadd.f32 %v4341_v52, %v4340_v3 }
 0x662   : > { %vm4344_vm5 = vcmp.gt.f32.partialorder %v4343_v28, 1.0 }
 0x663   : > { %v4653_v62 = vsel %vm4344_vm5, 1.0, %v7414_v41 }
 0x664   : > { %v4347_v35 = vsub.f32 1.0, %v4653_v62  ;;  %v4349_v26 = vsub.f32 %v4653_v62, %v4338_v19 }
 0x666   : > { %v4348_v55 = vmul.f32 %v4347_v35, %v4343_v28  ;;  %v4350_v2 = vmul.f32 0.33333334, %v4349_v26 }
 0x668   : > { %v4351_v49 = vadd.f32 %v4350_v2, %v4338_v19  ;;  %v4353_v46 = vmul.f32 0.8, %v4348_v55 }
 0x66a   : > { %4352 = vst.msk [vmem:[%s7050_s20 + $0x1e] sm:$0x1] %vm3537_vm4, %v4351_v49  ;;  %v4356_v8 = vadd.f32 %v4354_v23, %v4353_v46 }
 0x66c   : > { %vm4357_vm7 = vcmp.gt.f32.partialorder %v4356_v8, 1.0 }
 0x66d   : > { %v4654_v40 = vsel %vm4357_vm7, 1.0, %v7414_v41 }
 0x66e   : > { %v4360_v47 = vsub.f32 %v4654_v40, %v4351_v49 }
 0x670   : > { %v4361_v14 = vmul.f32 0.33333334, %v4360_v47 }
 0x672   : > { %v4362_v36 = vadd.f32 %v4361_v14, %v4351_v49 }
 0x674   : > { %4363 = vst.msk [vmem:[%s7050_s20 + $0x1f] sm:$0x1] %vm3537_vm4, %v4362_v36 }
 0x675 PF: > { %s18_s27 = sadd.s32 1, %s4735_s27  }
 0x676   : > { %p15_p4 = scmp.ge.s32.totalorder %s18_s27, 4  }
 0x678   :  { %17 = sbr.rel (!%p15_p4) target bundleno = 1 (0x1), region = 82 }

</bundles_post_ra>
